<compile_context>
chip_gen: v6e
topology: v6e:2x2x1
jax: 0.10.0
libtpu: 0.0.40
codegen_flags: <defaults>
</compile_context>

<pallas_src>
import jax
import jax.numpy as jnp
from jax import lax
from jax.experimental import pallas as pl
from jax.experimental.pallas import tpu as pltpu


def _round_up(x, m):
    return (x + m - 1) // m * m


# Cache whether pl.Buffered(1) / pipeline_mode is accepted by this JAX version.
_PIPELINE_MODE_OK = [True]


def _lstm_rec_kernel(blkmax_ref, x_ref, wih_ref, whh_ref, b_ref, len_ref,
                     out_ref, ht_ref, ct_ref, g_ref):
    """One grid step = one (batch-block, time-block) tile of the recurrence.

    blkmax_ref : (nb,) int32 SMEM     max sequence length per batch block
    x_ref      : (TB*bblk, I)         time-major inputs (matmul dtype)
    wih_ref    : (I, 4*Hp)            input weights, gate-aligned lanes
    whh_ref    : (Hp, 4*Hp)           recurrent weights, gate-aligned lanes
    b_ref      : (1, 4*Hp) f32        b_ih + b_hh
    len_ref    : (bblk, 1) int32      per-sequence lengths
    out_ref    : (TB*bblk, Hp) f32    hidden state per step (0 on padding)
    ht_ref     : (bblk, Hp) f32       resident accumulator == recurrent h
    ct_ref     : (bblk, Hp) f32       resident accumulator == recurrent c
    g_ref      : (TB*bblk, 4*Hp) f32  VMEM scratch: fused input projection
    """
    b_blk = pl.program_id(0)
    tb = pl.program_id(1)
    bblk, Hp = ht_ref.shape
    TB = x_ref.shape[0] // bblk
    t0 = tb * TB

    @pl.when(tb == 0)
    def _init():
        ht_ref[...] = jnp.zeros_like(ht_ref)
        ct_ref[...] = jnp.zeros_like(ct_ref)

    blk_max = blkmax_ref[b_blk]

    @pl.when(t0 >= blk_max)
    def _skip():
        # Every sequence in this batch block has already ended: padded output,
        # ht/ct stay resident and untouched.
        out_ref[...] = jnp.zeros_like(out_ref)

    @pl.when(t0 < blk_max)
    def _run():
        # Fused input projection for the whole time block: one MXU matmul with
        # M = TB*bblk; the gates never round-trip through HBM.
        g_ref[...] = (jnp.dot(x_ref[...], wih_ref[...],
                              preferred_element_type=jnp.float32)
                      + b_ref[...])

        lens = len_ref[...]                                  # (bblk, 1) int32

        def step(s, carry):
            h, c = carry
            r0 = pl.multiple_of(s * bblk, bblk)
            rows = pl.ds(r0, bblk)                           # dense plane
            gates = g_ref[rows, :] + jnp.dot(
                h.astype(whh_ref.dtype), whh_ref[...],
                preferred_element_type=jnp.float32)          # (bblk, 4*Hp) f32
            # Lane-aligned gate slices (Hp is a multiple of 128).
            # sigmoid(x) = 0.5*tanh(0.5*x) + 0.5  -> one EUP op per gate.
            i_g = 0.5 * jnp.tanh(0.5 * gates[:, 0 * Hp:1 * Hp]) + 0.5
            f_g = 0.5 * jnp.tanh(0.5 * gates[:, 1 * Hp:2 * Hp]) + 0.5
            g_g = jnp.tanh(gates[:, 2 * Hp:3 * Hp])
            o_g = 0.5 * jnp.tanh(0.5 * gates[:, 3 * Hp:4 * Hp]) + 0.5
            c_new = f_g * c + i_g * g_g
            h_new = o_g * jnp.tanh(c_new)
            valid = lens > (t0 + s)                          # length mask
            out_ref[rows, :] = jnp.where(valid, h_new, 0.0).astype(out_ref.dtype)
            return (jnp.where(valid, h_new, h), jnp.where(valid, c_new, c))

        h, c = lax.fori_loop(0, TB, step, (ht_ref[...], ct_ref[...]),
                             unroll=True)
        ht_ref[...] = h
        ct_ref[...] = c


def dynamic_lstm(x, x_len, w_ih, w_hh, b_ih, b_hh,
                 only_use_last_hidden_state=False,
                 time_block=16, batch_block=None,
                 matmul_dtype=jnp.bfloat16):
    """Variable-length single-layer unidirectional LSTM (batch_first).

    x      : (B, T, I) float
    x_len  : (B,) int          valid length of each sequence
    w_ih   : (4H, I)           PyTorch gate order [i, f, g, o]
    w_hh   : (4H, H)
    b_ih, b_hh : (4H,)

    Returns (out, (ht, ct)) with out (B, T, H) (positions t >= x_len[b] are 0;
    caller may truncate to max(x_len) to match pad_packed_sequence exactly),
    ht/ct (1, B, H).  If only_use_last_hidden_state, returns ht only.
    """
    B, T, I = x.shape
    H = w_hh.shape[1]
    f32 = jnp.float32
    mm_dtype = jnp.dtype(matmul_dtype)

    H_pad = _round_up(H, 128)                    # lane-aligned gate groups
    # Sublane packing of the matmul dtype decides batch alignment (8 f32, 16 bf16).
    b_align = 8 * max(1, 4 // mm_dtype.itemsize)
    B_pad = _round_up(B, b_align)

    TB = max(1, min(int(time_block), T))
    T_pad = _round_up(T, TB)

    # VMEM budget (~85% of the chip's capacity; v7x only has 64 MiB per TC).
    vmem_cap = 64 * 1024 * 1024
    try:
        info = pltpu.get_tpu_info()
        vmem_cap = int(getattr(info, "vmem_capacity_bytes", vmem_cap))
    except Exception:
        pass
    vmem_limit = int(vmem_cap * 0.85)

    if batch_block is None:
        bblk = B_pad
        # v7x has 2 TensorCores: give the "parallel" batch axis >= 2 blocks.
        if bblk // 2 >= b_align and (bblk // 2) % b_align == 0:
            bblk //= 2
        # Bound the per-core working set (the f32 gates scratch dominates).
        while (bblk // 2 >= b_align and (bblk // 2) % b_align == 0
               and TB * bblk * 4 * H_pad * 4 > vmem_limit // 4):
            bblk //= 2
    else:
        bblk = int(batch_block)
    assert B_pad % bblk == 0 and bblk % b_align == 0, (B_pad, bblk, b_align)
    nb = B_pad // bblk

    # --- gate-aligned (padded) weights: gate k occupies lanes [k*Hp, k*Hp+H) ---
    w_ih_g = jnp.pad(w_ih.astype(f32).reshape(4, H, I),
                     ((0, 0), (0, H_pad - H), (0, 0)))
    wih_p = jnp.transpose(w_ih_g, (2, 0, 1)).reshape(I, 4 * H_pad).astype(mm_dtype)

    w_hh_g = jnp.pad(w_hh.astype(f32).reshape(4, H, H),
                     ((0, 0), (0, H_pad - H), (0, H_pad - H)))
    whh_p = jnp.transpose(w_hh_g, (2, 0, 1)).reshape(H_pad, 4 * H_pad).astype(mm_dtype)

    b_p = jnp.pad((b_ih + b_hh).astype(f32).reshape(4, H),
                  ((0, 0), (0, H_pad - H))).reshape(1, 4 * H_pad)

    # --- time-major, per-batch-block slab layout for x:  (nb, T_pad*bblk, I) ---
    # row  t*bblk + j  of slab b  ==  x[b*bblk + j, t, :]
    x_tm = jnp.transpose(x.astype(f32), (1, 0, 2))               # (T, B, I)
    x_tm = jnp.pad(x_tm, ((0, T_pad - T), (0, B_pad - B), (0, 0)))
    x_blk = (x_tm.reshape(T_pad, nb, bblk, I)
                 .transpose(1, 0, 2, 3)
                 .reshape(nb, T_pad * bblk, I)
                 .astype(mm_dtype))

    len_pad = jnp.pad(x_len.astype(jnp.int32), (0, B_pad - B))
    len_p = len_pad.reshape(B_pad, 1)
    blk_max = len_pad.reshape(nb, bblk).max(axis=1)              # (nb,) int32

    grid = (nb, T_pad // TB)

    out_shapes = (
        jax.ShapeDtypeStruct((nb, T_pad * bblk, H_pad), f32),    # out (slab)
        jax.ShapeDtypeStruct((B_pad, H_pad), f32),               # ht
        jax.ShapeDtypeStruct((B_pad, H_pad), f32),               # ct
    )

    def _call(single_buffer):
        # Grid-invariant operands are DMA'd once; single-buffer them so they do
        # not pay 2x VMEM (matters for large H on v7x's 64 MiB VMEM).
        inv = dict(pipeline_mode=pl.Buffered(1)) if single_buffer else {}
        grid_spec = pltpu.PrefetchScalarGridSpec(
            num_scalar_prefetch=1,
            grid=grid,
            in_specs=[
                pl.BlockSpec((None, TB * bblk, I),
                             lambda b, t, mx: (b, t, 0)),                  # x
                pl.BlockSpec((I, 4 * H_pad), lambda b, t, mx: (0, 0), **inv),   # W_ih^T
                pl.BlockSpec((H_pad, 4 * H_pad), lambda b, t, mx: (0, 0), **inv),  # W_hh^T
                pl.BlockSpec((1, 4 * H_pad), lambda b, t, mx: (0, 0), **inv),   # bias
                pl.BlockSpec((bblk, 1), lambda b, t, mx: (b, 0)),          # lengths
            ],
            out_specs=[
                pl.BlockSpec((None, TB * bblk, H_pad),
                             lambda b, t, mx: (b, t, 0)),                  # out
                pl.BlockSpec((bblk, H_pad), lambda b, t, mx: (b, 0)),      # ht (resident)
                pl.BlockSpec((bblk, H_pad), lambda b, t, mx: (b, 0)),      # ct (resident)
            ],
            scratch_shapes=[pltpu.VMEM((TB * bblk, 4 * H_pad), jnp.float32)],
        )
        return pl.pallas_call(
            _lstm_rec_kernel,
            out_shape=out_shapes,
            grid_spec=grid_spec,
            compiler_params=pltpu.CompilerParams(
                # batch blocks are independent (megacore); time is sequential
                dimension_semantics=("parallel", "arbitrary"),
                vmem_limit_bytes=vmem_limit),
        )(blk_max, x_blk, wih_p, whh_p, b_p, len_p)

    if _PIPELINE_MODE_OK[0]:
        try:
            out_slab, ht_full, ct_full = _call(True)
        except Exception:
            _PIPELINE_MODE_OK[0] = False
            out_slab, ht_full, ct_full = _call(False)
    else:
        out_slab, ht_full, ct_full = _call(False)

    ht = ht_full[:B, :H][None]                                   # (1, B, H)
    ct = ct_full[:B, :H][None]
    if only_use_last_hidden_state:
        return ht

    # Undo the slab layout: single wrapper transpose back to batch-first.
    out_bt = (out_slab.reshape(nb, T_pad, bblk, H_pad)
                      .transpose(0, 2, 1, 3)
                      .reshape(B_pad, T_pad, H_pad))
    out = out_bt[:B, :T, :H]                 # padded time positions are 0
    return out, (ht, ct)


def _lstm_ref(x, x_len, w_ih, w_hh, b_ih, b_hh):
    """Pure-JAX reference with identical semantics (full T, masked)."""
    B, T, I = x.shape
    H = w_hh.shape[1]

    def step(carry, inp):
        h, c = carry
        x_t, t = inp
        gates = x_t @ w_ih.T + h @ w_hh.T + b_ih + b_hh
        i = jax.nn.sigmoid(gates[:, :H])
        f = jax.nn.sigmoid(gates[:, H:2 * H])
        g = jnp.tanh(gates[:, 2 * H:3 * H])
        o = jax.nn.sigmoid(gates[:, 3 * H:])
        c_new = f * c + i * g
        h_new = o * jnp.tanh(c_new)
        valid = (x_len > t)[:, None]
        h2 = jnp.where(valid, h_new, h)
        c2 = jnp.where(valid, c_new, c)
        return (h2, c2), jnp.where(valid, h_new, 0.0)

    init = (jnp.zeros((B, H), jnp.float32), jnp.zeros((B, H), jnp.float32))
    xs = (jnp.transpose(x, (1, 0, 2)), jnp.arange(T))
    (hT, cT), outs = lax.scan(step, init, xs)
    return jnp.transpose(outs, (1, 0, 2)), hT[None], cT[None]


if __name__ == "__main__":
    B, T, I, H = 2, 8, 16, 32

    key = jax.random.PRNGKey(0)
    kx, k1, k2, k3, k4 = jax.random.split(key, 5)

    x = jax.random.normal(kx, (B, T, I), dtype=jnp.float32)
    x_len = jnp.array([5, 8], dtype=jnp.int32)   # variable lengths, unsorted

    # nn.LSTM default init: uniform(-1/sqrt(H), 1/sqrt(H)); gate order [i,f,g,o]
    bound = 1.0 / (H ** 0.5)
    w_ih = jax.random.uniform(k1, (4 * H, I), jnp.float32, -bound, bound)
    w_hh = jax.random.uniform(k2, (4 * H, H), jnp.float32, -bound, bound)
    b_ih = jax.random.uniform(k3, (4 * H,), jnp.float32, -bound, bound)
    b_hh = jax.random.uniform(k4, (4 * H,), jnp.float32, -bound, bound)

    out_r, ht_r, ct_r = _lstm_ref(x, x_len, w_ih, w_hh, b_ih, b_hh)

    # f32-MXU path: strict check against the pure-JAX reference.
    out, (ht, ct) = dynamic_lstm(x, x_len, w_ih, w_hh, b_ih, b_hh,
                                 matmul_dtype=jnp.float32)
    out = jax.block_until_ready(out)
    ht = jax.block_until_ready(ht)
    ct = jax.block_until_ready(ct)
    assert out.shape == (B, T, H)
    assert ht.shape == (1, B, H) and ct.shape == (1, B, H)
    assert jnp.allclose(out, out_r, atol=1e-4), "output mismatch (f32)"
    assert jnp.allclose(ht, ht_r, atol=1e-4), "ht mismatch (f32)"
    assert jnp.allclose(ct, ct_r, atol=1e-4), "ct mismatch (f32)"

    # pad_packed_sequence truncates time to max(x_len); done outside the kernel
    # so the grid stays static (no recompiles).
    t_out = int(x_len.max())
    assert jnp.allclose(out[:, :t_out], out_r[:, :t_out], atol=1e-4)

    # only_use_last_hidden_state path
    ht_only = dynamic_lstm(x, x_len, w_ih, w_hh, b_ih, b_hh,
                           only_use_last_hidden_state=True,
                           matmul_dtype=jnp.float32)
    ht_only = jax.block_until_ready(ht_only)
    assert jnp.allclose(ht_only, ht_r, atol=1e-4)

    # Default bf16-MXU path (state / gate math stay f32): loose sanity check.
    # Note: bf16 rounding of h feeds back through the recurrence, so error can
    # grow with T; use matmul_dtype=jnp.float32 for long sequences.
    out_bf, (ht_bf, ct_bf) = dynamic_lstm(x, x_len, w_ih, w_hh, b_ih, b_hh)
    out_bf = jax.block_until_ready(out_bf)
    assert jnp.allclose(out_bf, out_r, atol=1e-1), "bf16 output diverged"
    assert jnp.allclose(ht_bf, ht_r, atol=1e-1), "bf16 ht diverged"

    print("KERNEL_OK")
</pallas_src>

<mosaic_0001>
module attributes {stable_mosaic.version = 11 : i64} {
  func.func @_lstm_rec_kernel(%arg0: i32, %arg1: i32, %arg2: memref<1xi32, #tpu.memory_space<smem>>, %arg3: memref<1x64x16xf32, #tpu.memory_space<vmem>>, %arg4: memref<16x512xf32, #tpu.memory_space<vmem>>, %arg5: memref<128x512xf32, #tpu.memory_space<vmem>>, %arg6: memref<1x512xf32, #tpu.memory_space<vmem>>, %arg7: memref<8x1xi32, #tpu.memory_space<vmem>>, %arg8: memref<1x64x128xf32, #tpu.memory_space<vmem>>, %arg9: memref<8x128xf32, #tpu.memory_space<vmem>>, %arg10: memref<8x128xf32, #tpu.memory_space<vmem>>, %arg11: memref<64x512xf32, #tpu.memory_space<vmem>>) attributes {dimension_semantics = [#tpu.dimension_semantics<parallel>, #tpu.dimension_semantics<arbitrary>], iteration_bounds = array<i64: 1, 1>, scalar_prefetch = 1 : i64, scratch_operands = 1 : i64, tpu.core_type = #tpu.core_type<tc>, window_params = [{transform_indices = @transform_0, window_bounds = array<i64: 1, 64, 16>}, {pipeline_mode = #tpu.pipeline_mode<synchronous>, transform_indices = @transform_1, window_bounds = array<i64: 16, 512>}, {pipeline_mode = #tpu.pipeline_mode<synchronous>, transform_indices = @transform_2, window_bounds = array<i64: 128, 512>}, {pipeline_mode = #tpu.pipeline_mode<synchronous>, transform_indices = @transform_3, window_bounds = array<i64: 1, 512>}, {transform_indices = @transform_4, window_bounds = array<i64: 8, 1>}, {transform_indices = @transform_5, window_bounds = array<i64: 1, 64, 128>}, {transform_indices = @transform_6, window_bounds = array<i64: 8, 128>}, {transform_indices = @transform_7, window_bounds = array<i64: 8, 128>}]} {
    %c8_i32 = arith.constant 8 : i32
    %0 = arith.muli %arg1, %c8_i32 : i32
    %c0_i32 = arith.constant 0 : i32
    %1 = arith.cmpi eq, %arg1, %c0_i32 : i32
    %2 = arith.extui %1 : i1 to i32
    %c0_i32_0 = arith.constant 0 : i32
    %3 = arith.cmpi ne, %2, %c0_i32_0 : i32
    scf.if %3 {
      %cst = arith.constant 0.000000e+00 : f32
      %12 = vector.broadcast %cst : f32 to vector<8x128xf32>
      %c0 = arith.constant 0 : index
      %c0_3 = arith.constant 0 : index
      %13 = vector.load %arg9[%c0, %c0_3] : memref<8x128xf32, #tpu.memory_space<vmem>>, vector<8x128xf32>
      tpu.vector_store %arg9[%c0, %c0_3], %12 {strides = array<i32>} : memref<8x128xf32, #tpu.memory_space<vmem>>, vector<8x128xf32>,
      %cst_4 = arith.constant 0.000000e+00 : f32
      %14 = vector.broadcast %cst_4 : f32 to vector<8x128xf32>
      %c0_5 = arith.constant 0 : index
      %c0_6 = arith.constant 0 : index
      %15 = vector.load %arg10[%c0_5, %c0_6] : memref<8x128xf32, #tpu.memory_space<vmem>>, vector<8x128xf32>
      tpu.vector_store %arg10[%c0_5, %c0_6], %14 {strides = array<i32>} : memref<8x128xf32, #tpu.memory_space<vmem>>, vector<8x128xf32>,
    } else {
    }
    %4 = arith.index_cast %arg0 : i32 to index
    %5 = memref.load %arg2[%4] : memref<1xi32, #tpu.memory_space<smem>>
    %6 = arith.cmpi sge, %0, %5 : i32
    %7 = arith.extui %6 : i1 to i32
    %c0_i32_1 = arith.constant 0 : i32
    %8 = arith.cmpi ne, %7, %c0_i32_1 : i32
    scf.if %8 {
      %cst = arith.constant 0.000000e+00 : f32
      %12 = vector.broadcast %cst : f32 to vector<64x128xf32>
      %c0 = arith.constant 0 : index
      %c0_3 = arith.constant 0 : index
      %c0_4 = arith.constant 0 : index
      %13 = vector.load %arg8[%c0, %c0_3, %c0_4] : memref<1x64x128xf32, #tpu.memory_space<vmem>>, vector<1x64x128xf32>
      %14 = vector.shape_cast %13 : vector<1x64x128xf32> to vector<64x128xf32>
      %15 = vector.shape_cast %12 : vector<64x128xf32> to vector<1x64x128xf32>
      tpu.vector_store %arg8[%c0, %c0_3, %c0_4], %15 {strides = array<i32>} : memref<1x64x128xf32, #tpu.memory_space<vmem>>, vector<1x64x128xf32>,
    } else {
    }
    %9 = arith.cmpi slt, %0, %5 : i32
    %10 = arith.extui %9 : i1 to i32
    %c0_i32_2 = arith.constant 0 : i32
    %11 = arith.cmpi ne, %10, %c0_i32_2 : i32
    scf.if %11 {
      %c0 = arith.constant 0 : index
      %c0_3 = arith.constant 0 : index
      %c0_4 = arith.constant 0 : index
      %12 = vector.load %arg3[%c0, %c0_3, %c0_4] : memref<1x64x16xf32, #tpu.memory_space<vmem>>, vector<1x64x16xf32>
      %13 = vector.shape_cast %12 : vector<1x64x16xf32> to vector<64x16xf32>
      %c0_5 = arith.constant 0 : index
      %c0_6 = arith.constant 0 : index
      %14 = vector.load %arg4[%c0_5, %c0_6] : memref<16x512xf32, #tpu.memory_space<vmem>>, vector<16x512xf32>
      %cst = arith.constant dense<0.000000e+00> : vector<64x512xf32>
      %15 = tpu.matmul %13, %14, %cst {dimension_numbers = #tpu.dot_dimension_numbers<[1], [0], [0], [1], [0, 0, 1, 1], [], []>} : vector<64x16xf32>, vector<16x512xf32>, vector<64x512xf32> -> vector<64x512xf32>
      %c0_7 = arith.constant 0 : index
      %c0_8 = arith.constant 0 : index
      %16 = vector.load %arg6[%c0_7, %c0_8] : memref<1x512xf32, #tpu.memory_space<vmem>>, vector<1x512xf32>
      %17 = vector.broadcast %16 : vector<1x512xf32> to vector<64x512xf32>
      %18 = arith.addf %15, %17 : vector<64x512xf32>
      %c0_9 = arith.constant 0 : index
      %c0_10 = arith.constant 0 : index
      %19 = vector.load %arg11[%c0_9, %c0_10] : memref<64x512xf32, #tpu.memory_space<vmem>>, vector<64x512xf32>
      tpu.vector_store %arg11[%c0_9, %c0_10], %18 {strides = array<i32>} : memref<64x512xf32, #tpu.memory_space<vmem>>, vector<64x512xf32>,
      %c0_11 = arith.constant 0 : index
      %c0_12 = arith.constant 0 : index
      %20 = vector.load %arg7[%c0_11, %c0_12] : memref<8x1xi32, #tpu.memory_space<vmem>>, vector<8x1xi32>
      %c0_13 = arith.constant 0 : index
      %c0_14 = arith.constant 0 : index
      %21 = vector.load %arg9[%c0_13, %c0_14] : memref<8x128xf32, #tpu.memory_space<vmem>>, vector<8x128xf32>
      %c0_15 = arith.constant 0 : index
      %c0_16 = arith.constant 0 : index
      %22 = vector.load %arg10[%c0_15, %c0_16] : memref<8x128xf32, #tpu.memory_space<vmem>>, vector<8x128xf32>
      %c0_i32_17 = arith.constant 0 : i32
      %c8_i32_18 = arith.constant 8 : i32
      %23 = arith.muli %c0_i32_17, %c8_i32_18 : i32
      %24 = tpu.assume_multiple %23, 8 : i32
      %25 = arith.index_cast %24 : i32 to index
      %c0_19 = arith.constant 0 : index
      %26 = vector.load %arg11[%25, %c0_19] : memref<64x512xf32, #tpu.memory_space<vmem>>, vector<8x512xf32>
      %c0_20 = arith.constant 0 : index
      %c0_21 = arith.constant 0 : index
      %27 = vector.load %arg5[%c0_20, %c0_21] : memref<128x512xf32, #tpu.memory_space<vmem>>, vector<128x512xf32>
      %cst_22 = arith.constant dense<0.000000e+00> : vector<8x512xf32>
      %28 = tpu.matmul %21, %27, %cst_22 {dimension_numbers = #tpu.dot_dimension_numbers<[1], [0], [0], [1], [0, 0, 1, 1], [], []>} : vector<8x128xf32>, vector<128x512xf32>, vector<8x512xf32> -> vector<8x512xf32>
      %29 = arith.addf %26, %28 : vector<8x512xf32>
      %30 = vector.extract_strided_slice %29 {offsets = [0, 0], sizes = [8, 128], strides = [1, 1]} : vector<8x512xf32> to vector<8x128xf32>
      %cst_23 = arith.constant 5.000000e-01 : f32
      %31 = vector.broadcast %cst_23 : f32 to vector<8x128xf32>
      %32 = arith.mulf %31, %30 : vector<8x128xf32>
      %33 = math.tanh %32 : vector<8x128xf32>
      %cst_24 = arith.constant 5.000000e-01 : f32
      %34 = vector.broadcast %cst_24 : f32 to vector<8x128xf32>
      %35 = arith.mulf %34, %33 : vector<8x128xf32>
      %cst_25 = arith.constant 5.000000e-01 : f32
      %36 = vector.broadcast %cst_25 : f32 to vector<8x128xf32>
      %37 = arith.addf %35, %36 : vector<8x128xf32>
      %38 = vector.extract_strided_slice %29 {offsets = [0, 128], sizes = [8, 128], strides = [1, 1]} : vector<8x512xf32> to vector<8x128xf32>
      %cst_26 = arith.constant 5.000000e-01 : f32
      %39 = vector.broadcast %cst_26 : f32 to vector<8x128xf32>
      %40 = arith.mulf %39, %38 : vector<8x128xf32>
      %41 = math.tanh %40 : vector<8x128xf32>
      %cst_27 = arith.constant 5.000000e-01 : f32
      %42 = vector.broadcast %cst_27 : f32 to vector<8x128xf32>
      %43 = arith.mulf %42, %41 : vector<8x128xf32>
      %cst_28 = arith.constant 5.000000e-01 : f32
      %44 = vector.broadcast %cst_28 : f32 to vector<8x128xf32>
      %45 = arith.addf %43, %44 : vector<8x128xf32>
      %46 = vector.extract_strided_slice %29 {offsets = [0, 256], sizes = [8, 128], strides = [1, 1]} : vector<8x512xf32> to vector<8x128xf32>
      %47 = math.tanh %46 : vector<8x128xf32>
      %48 = vector.extract_strided_slice %29 {offsets = [0, 384], sizes = [8, 128], strides = [1, 1]} : vector<8x512xf32> to vector<8x128xf32>
      %cst_29 = arith.constant 5.000000e-01 : f32
      %49 = vector.broadcast %cst_29 : f32 to vector<8x128xf32>
      %50 = arith.mulf %49, %48 : vector<8x128xf32>
      %51 = math.tanh %50 : vector<8x128xf32>
      %cst_30 = arith.constant 5.000000e-01 : f32
      %52 = vector.broadcast %cst_30 : f32 to vector<8x128xf32>
      %53 = arith.mulf %52, %51 : vector<8x128xf32>
      %cst_31 = arith.constant 5.000000e-01 : f32
      %54 = vector.broadcast %cst_31 : f32 to vector<8x128xf32>
      %55 = arith.addf %53, %54 : vector<8x128xf32>
      %56 = arith.mulf %45, %22 : vector<8x128xf32>
      %57 = arith.mulf %37, %47 : vector<8x128xf32>
      %58 = arith.addf %56, %57 : vector<8x128xf32>
      %59 = math.tanh %58 : vector<8x128xf32>
      %60 = arith.mulf %55, %59 : vector<8x128xf32>
      %61 = arith.addi %0, %c0_i32_17 : i32
      %62 = vector.broadcast %61 : i32 to vector<8x1xi32>
      %63 = arith.cmpi sgt, %20, %62 : vector<8x1xi32>
      %cst_32 = arith.constant 0.000000e+00 : f32
      %64 = vector.shape_cast %63 : vector<8x1xi1> to vector<8x1xi1>
      %65 = vector.broadcast %64 : vector<8x1xi1> to vector<8x128xi1>
      %66 = vector.broadcast %cst_32 : f32 to vector<8x128xf32>
      %67 = arith.select %65, %60, %66 : vector<8x128xi1>, vector<8x128xf32>
      %c0_33 = arith.constant 0 : index
      %68 = arith.index_cast %24 : i32 to index
      %c0_34 = arith.constant 0 : index
      %69 = vector.load %arg8[%c0_33, %68, %c0_34] : memref<1x64x128xf32, #tpu.memory_space<vmem>>, vector<1x8x128xf32>
      %70 = vector.shape_cast %69 : vector<1x8x128xf32> to vector<8x128xf32>
      %71 = vector.shape_cast %67 : vector<8x128xf32> to vector<1x8x128xf32>
      tpu.vector_store %arg8[%c0_33, %68, %c0_34], %71 {strides = array<i32>} : memref<1x64x128xf32, #tpu.memory_space<vmem>>, vector<1x8x128xf32>,
      %72 = vector.shape_cast %63 : vector<8x1xi1> to vector<8x1xi1>
      %73 = vector.broadcast %72 : vector<8x1xi1> to vector<8x128xi1>
      %74 = arith.select %73, %60, %21 : vector<8x128xi1>, vector<8x128xf32>
      %75 = vector.shape_cast %63 : vector<8x1xi1> to vector<8x1xi1>
      %76 = vector.broadcast %75 : vector<8x1xi1> to vector<8x128xi1>
      %77 = arith.select %76, %58, %22 : vector<8x128xi1>, vector<8x128xf32>
      %c1_i32 = arith.constant 1 : i32
      %c8_i32_35 = arith.constant 8 : i32
      %78 = arith.muli %c1_i32, %c8_i32_35 : i32
      %79 = tpu.assume_multiple %78, 8 : i32
      %80 = arith.index_cast %79 : i32 to index
      %c0_36 = arith.constant 0 : index
      %81 = vector.load %arg11[%80, %c0_36] : memref<64x512xf32, #tpu.memory_space<vmem>>, vector<8x512xf32>
      %c0_37 = arith.constant 0 : index
      %c0_38 = arith.constant 0 : index
      %82 = vector.load %arg5[%c0_37, %c0_38] : memref<128x512xf32, #tpu.memory_space<vmem>>, vector<128x512xf32>
      %cst_39 = arith.constant dense<0.000000e+00> : vector<8x512xf32>
      %83 = tpu.matmul %74, %82, %cst_39 {dimension_numbers = #tpu.dot_dimension_numbers<[1], [0], [0], [1], [0, 0, 1, 1], [], []>} : vector<8x128xf32>, vector<128x512xf32>, vector<8x512xf32> -> vector<8x512xf32>
      %84 = arith.addf %81, %83 : vector<8x512xf32>
      %85 = vector.extract_strided_slice %84 {offsets = [0, 0], sizes = [8, 128], strides = [1, 1]} : vector<8x512xf32> to vector<8x128xf32>
      %cst_40 = arith.constant 5.000000e-01 : f32
      %86 = vector.broadcast %cst_40 : f32 to vector<8x128xf32>
      %87 = arith.mulf %86, %85 : vector<8x128xf32>
      %88 = math.tanh %87 : vector<8x128xf32>
      %cst_41 = arith.constant 5.000000e-01 : f32
      %89 = vector.broadcast %cst_41 : f32 to vector<8x128xf32>
      %90 = arith.mulf %89, %88 : vector<8x128xf32>
      %cst_42 = arith.constant 5.000000e-01 : f32
      %91 = vector.broadcast %cst_42 : f32 to vector<8x128xf32>
      %92 = arith.addf %90, %91 : vector<8x128xf32>
      %93 = vector.extract_strided_slice %84 {offsets = [0, 128], sizes = [8, 128], strides = [1, 1]} : vector<8x512xf32> to vector<8x128xf32>
      %cst_43 = arith.constant 5.000000e-01 : f32
      %94 = vector.broadcast %cst_43 : f32 to vector<8x128xf32>
      %95 = arith.mulf %94, %93 : vector<8x128xf32>
      %96 = math.tanh %95 : vector<8x128xf32>
      %cst_44 = arith.constant 5.000000e-01 : f32
      %97 = vector.broadcast %cst_44 : f32 to vector<8x128xf32>
      %98 = arith.mulf %97, %96 : vector<8x128xf32>
      %cst_45 = arith.constant 5.000000e-01 : f32
      %99 = vector.broadcast %cst_45 : f32 to vector<8x128xf32>
      %100 = arith.addf %98, %99 : vector<8x128xf32>
      %101 = vector.extract_strided_slice %84 {offsets = [0, 256], sizes = [8, 128], strides = [1, 1]} : vector<8x512xf32> to vector<8x128xf32>
      %102 = math.tanh %101 : vector<8x128xf32>
      %103 = vector.extract_strided_slice %84 {offsets = [0, 384], sizes = [8, 128], strides = [1, 1]} : vector<8x512xf32> to vector<8x128xf32>
      %cst_46 = arith.constant 5.000000e-01 : f32
      %104 = vector.broadcast %cst_46 : f32 to vector<8x128xf32>
      %105 = arith.mulf %104, %103 : vector<8x128xf32>
      %106 = math.tanh %105 : vector<8x128xf32>
      %cst_47 = arith.constant 5.000000e-01 : f32
      %107 = vector.broadcast %cst_47 : f32 to vector<8x128xf32>
      %108 = arith.mulf %107, %106 : vector<8x128xf32>
      %cst_48 = arith.constant 5.000000e-01 : f32
      %109 = vector.broadcast %cst_48 : f32 to vector<8x128xf32>
      %110 = arith.addf %108, %109 : vector<8x128xf32>
      %111 = arith.mulf %100, %77 : vector<8x128xf32>
      %112 = arith.mulf %92, %102 : vector<8x128xf32>
      %113 = arith.addf %111, %112 : vector<8x128xf32>
      %114 = math.tanh %113 : vector<8x128xf32>
      %115 = arith.mulf %110, %114 : vector<8x128xf32>
      %116 = arith.addi %0, %c1_i32 : i32
      %117 = vector.broadcast %116 : i32 to vector<8x1xi32>
      %118 = arith.cmpi sgt, %20, %117 : vector<8x1xi32>
      %cst_49 = arith.constant 0.000000e+00 : f32
      %119 = vector.shape_cast %118 : vector<8x1xi1> to vector<8x1xi1>
      %120 = vector.broadcast %119 : vector<8x1xi1> to vector<8x128xi1>
      %121 = vector.broadcast %cst_49 : f32 to vector<8x128xf32>
      %122 = arith.select %120, %115, %121 : vector<8x128xi1>, vector<8x128xf32>
      %c0_50 = arith.constant 0 : index
      %123 = arith.index_cast %79 : i32 to index
      %c0_51 = arith.constant 0 : index
      %124 = vector.load %arg8[%c0_50, %123, %c0_51] : memref<1x64x128xf32, #tpu.memory_space<vmem>>, vector<1x8x128xf32>
      %125 = vector.shape_cast %124 : vector<1x8x128xf32> to vector<8x128xf32>
      %126 = vector.shape_cast %122 : vector<8x128xf32> to vector<1x8x128xf32>
      tpu.vector_store %arg8[%c0_50, %123, %c0_51], %126 {strides = array<i32>} : memref<1x64x128xf32, #tpu.memory_space<vmem>>, vector<1x8x128xf32>,
      %127 = vector.shape_cast %118 : vector<8x1xi1> to vector<8x1xi1>
      %128 = vector.broadcast %127 : vector<8x1xi1> to vector<8x128xi1>
      %129 = arith.select %128, %115, %74 : vector<8x128xi1>, vector<8x128xf32>
      %130 = vector.shape_cast %118 : vector<8x1xi1> to vector<8x1xi1>
      %131 = vector.broadcast %130 : vector<8x1xi1> to vector<8x128xi1>
      %132 = arith.select %131, %113, %77 : vector<8x128xi1>, vector<8x128xf32>
      %c2_i32 = arith.constant 2 : i32
      %c8_i32_52 = arith.constant 8 : i32
      %133 = arith.muli %c2_i32, %c8_i32_52 : i32
      %134 = tpu.assume_multiple %133, 8 : i32
      %135 = arith.index_cast %134 : i32 to index
      %c0_53 = arith.constant 0 : index
      %136 = vector.load %arg11[%135, %c0_53] : memref<64x512xf32, #tpu.memory_space<vmem>>, vector<8x512xf32>
      %c0_54 = arith.constant 0 : index
      %c0_55 = arith.constant 0 : index
      %137 = vector.load %arg5[%c0_54, %c0_55] : memref<128x512xf32, #tpu.memory_space<vmem>>, vector<128x512xf32>
      %cst_56 = arith.constant dense<0.000000e+00> : vector<8x512xf32>
      %138 = tpu.matmul %129, %137, %cst_56 {dimension_numbers = #tpu.dot_dimension_numbers<[1], [0], [0], [1], [0, 0, 1, 1], [], []>} : vector<8x128xf32>, vector<128x512xf32>, vector<8x512xf32> -> vector<8x512xf32>
      %139 = arith.addf %136, %138 : vector<8x512xf32>
      %140 = vector.extract_strided_slice %139 {offsets = [0, 0], sizes = [8, 128], strides = [1, 1]} : vector<8x512xf32> to vector<8x128xf32>
      %cst_57 = arith.constant 5.000000e-01 : f32
      %141 = vector.broadcast %cst_57 : f32 to vector<8x128xf32>
      %142 = arith.mulf %141, %140 : vector<8x128xf32>
      %143 = math.tanh %142 : vector<8x128xf32>
      %cst_58 = arith.constant 5.000000e-01 : f32
      %144 = vector.broadcast %cst_58 : f32 to vector<8x128xf32>
      %145 = arith.mulf %144, %143 : vector<8x128xf32>
      %cst_59 = arith.constant 5.000000e-01 : f32
      %146 = vector.broadcast %cst_59 : f32 to vector<8x128xf32>
      %147 = arith.addf %145, %146 : vector<8x128xf32>
      %148 = vector.extract_strided_slice %139 {offsets = [0, 128], sizes = [8, 128], strides = [1, 1]} : vector<8x512xf32> to vector<8x128xf32>
      %cst_60 = arith.constant 5.000000e-01 : f32
      %149 = vector.broadcast %cst_60 : f32 to vector<8x128xf32>
      %150 = arith.mulf %149, %148 : vector<8x128xf32>
      %151 = math.tanh %150 : vector<8x128xf32>
      %cst_61 = arith.constant 5.000000e-01 : f32
      %152 = vector.broadcast %cst_61 : f32 to vector<8x128xf32>
      %153 = arith.mulf %152, %151 : vector<8x128xf32>
      %cst_62 = arith.constant 5.000000e-01 : f32
      %154 = vector.broadcast %cst_62 : f32 to vector<8x128xf32>
      %155 = arith.addf %153, %154 : vector<8x128xf32>
      %156 = vector.extract_strided_slice %139 {offsets = [0, 256], sizes = [8, 128], strides = [1, 1]} : vector<8x512xf32> to vector<8x128xf32>
      %157 = math.tanh %156 : vector<8x128xf32>
      %158 = vector.extract_strided_slice %139 {offsets = [0, 384], sizes = [8, 128], strides = [1, 1]} : vector<8x512xf32> to vector<8x128xf32>
      %cst_63 = arith.constant 5.000000e-01 : f32
      %159 = vector.broadcast %cst_63 : f32 to vector<8x128xf32>
      %160 = arith.mulf %159, %158 : vector<8x128xf32>
      %161 = math.tanh %160 : vector<8x128xf32>
      %cst_64 = arith.constant 5.000000e-01 : f32
      %162 = vector.broadcast %cst_64 : f32 to vector<8x128xf32>
      %163 = arith.mulf %162, %161 : vector<8x128xf32>
      %cst_65 = arith.constant 5.000000e-01 : f32
      %164 = vector.broadcast %cst_65 : f32 to vector<8x128xf32>
      %165 = arith.addf %163, %164 : vector<8x128xf32>
      %166 = arith.mulf %155, %132 : vector<8x128xf32>
      %167 = arith.mulf %147, %157 : vector<8x128xf32>
      %168 = arith.addf %166, %167 : vector<8x128xf32>
      %169 = math.tanh %168 : vector<8x128xf32>
      %170 = arith.mulf %165, %169 : vector<8x128xf32>
      %171 = arith.addi %0, %c2_i32 : i32
      %172 = vector.broadcast %171 : i32 to vector<8x1xi32>
      %173 = arith.cmpi sgt, %20, %172 : vector<8x1xi32>
      %cst_66 = arith.constant 0.000000e+00 : f32
      %174 = vector.shape_cast %173 : vector<8x1xi1> to vector<8x1xi1>
      %175 = vector.broadcast %174 : vector<8x1xi1> to vector<8x128xi1>
      %176 = vector.broadcast %cst_66 : f32 to vector<8x128xf32>
      %177 = arith.select %175, %170, %176 : vector<8x128xi1>, vector<8x128xf32>
      %c0_67 = arith.constant 0 : index
      %178 = arith.index_cast %134 : i32 to index
      %c0_68 = arith.constant 0 : index
      %179 = vector.load %arg8[%c0_67, %178, %c0_68] : memref<1x64x128xf32, #tpu.memory_space<vmem>>, vector<1x8x128xf32>
      %180 = vector.shape_cast %179 : vector<1x8x128xf32> to vector<8x128xf32>
      %181 = vector.shape_cast %177 : vector<8x128xf32> to vector<1x8x128xf32>
      tpu.vector_store %arg8[%c0_67, %178, %c0_68], %181 {strides = array<i32>} : memref<1x64x128xf32, #tpu.memory_space<vmem>>, vector<1x8x128xf32>,
      %182 = vector.shape_cast %173 : vector<8x1xi1> to vector<8x1xi1>
      %183 = vector.broadcast %182 : vector<8x1xi1> to vector<8x128xi1>
      %184 = arith.select %183, %170, %129 : vector<8x128xi1>, vector<8x128xf32>
      %185 = vector.shape_cast %173 : vector<8x1xi1> to vector<8x1xi1>
      %186 = vector.broadcast %185 : vector<8x1xi1> to vector<8x128xi1>
      %187 = arith.select %186, %168, %132 : vector<8x128xi1>, vector<8x128xf32>
      %c3_i32 = arith.constant 3 : i32
      %c8_i32_69 = arith.constant 8 : i32
      %188 = arith.muli %c3_i32, %c8_i32_69 : i32
      %189 = tpu.assume_multiple %188, 8 : i32
      %190 = arith.index_cast %189 : i32 to index
      %c0_70 = arith.constant 0 : index
      %191 = vector.load %arg11[%190, %c0_70] : memref<64x512xf32, #tpu.memory_space<vmem>>, vector<8x512xf32>
      %c0_71 = arith.constant 0 : index
      %c0_72 = arith.constant 0 : index
      %192 = vector.load %arg5[%c0_71, %c0_72] : memref<128x512xf32, #tpu.memory_space<vmem>>, vector<128x512xf32>
      %cst_73 = arith.constant dense<0.000000e+00> : vector<8x512xf32>
      %193 = tpu.matmul %184, %192, %cst_73 {dimension_numbers = #tpu.dot_dimension_numbers<[1], [0], [0], [1], [0, 0, 1, 1], [], []>} : vector<8x128xf32>, vector<128x512xf32>, vector<8x512xf32> -> vector<8x512xf32>
      %194 = arith.addf %191, %193 : vector<8x512xf32>
      %195 = vector.extract_strided_slice %194 {offsets = [0, 0], sizes = [8, 128], strides = [1, 1]} : vector<8x512xf32> to vector<8x128xf32>
      %cst_74 = arith.constant 5.000000e-01 : f32
      %196 = vector.broadcast %cst_74 : f32 to vector<8x128xf32>
      %197 = arith.mulf %196, %195 : vector<8x128xf32>
      %198 = math.tanh %197 : vector<8x128xf32>
      %cst_75 = arith.constant 5.000000e-01 : f32
      %199 = vector.broadcast %cst_75 : f32 to vector<8x128xf32>
      %200 = arith.mulf %199, %198 : vector<8x128xf32>
      %cst_76 = arith.constant 5.000000e-01 : f32
      %201 = vector.broadcast %cst_76 : f32 to vector<8x128xf32>
      %202 = arith.addf %200, %201 : vector<8x128xf32>
      %203 = vector.extract_strided_slice %194 {offsets = [0, 128], sizes = [8, 128], strides = [1, 1]} : vector<8x512xf32> to vector<8x128xf32>
      %cst_77 = arith.constant 5.000000e-01 : f32
      %204 = vector.broadcast %cst_77 : f32 to vector<8x128xf32>
      %205 = arith.mulf %204, %203 : vector<8x128xf32>
      %206 = math.tanh %205 : vector<8x128xf32>
      %cst_78 = arith.constant 5.000000e-01 : f32
      %207 = vector.broadcast %cst_78 : f32 to vector<8x128xf32>
      %208 = arith.mulf %207, %206 : vector<8x128xf32>
      %cst_79 = arith.constant 5.000000e-01 : f32
      %209 = vector.broadcast %cst_79 : f32 to vector<8x128xf32>
      %210 = arith.addf %208, %209 : vector<8x128xf32>
      %211 = vector.extract_strided_slice %194 {offsets = [0, 256], sizes = [8, 128], strides = [1, 1]} : vector<8x512xf32> to vector<8x128xf32>
      %212 = math.tanh %211 : vector<8x128xf32>
      %213 = vector.extract_strided_slice %194 {offsets = [0, 384], sizes = [8, 128], strides = [1, 1]} : vector<8x512xf32> to vector<8x128xf32>
      %cst_80 = arith.constant 5.000000e-01 : f32
      %214 = vector.broadcast %cst_80 : f32 to vector<8x128xf32>
      %215 = arith.mulf %214, %213 : vector<8x128xf32>
      %216 = math.tanh %215 : vector<8x128xf32>
      %cst_81 = arith.constant 5.000000e-01 : f32
      %217 = vector.broadcast %cst_81 : f32 to vector<8x128xf32>
      %218 = arith.mulf %217, %216 : vector<8x128xf32>
      %cst_82 = arith.constant 5.000000e-01 : f32
      %219 = vector.broadcast %cst_82 : f32 to vector<8x128xf32>
      %220 = arith.addf %218, %219 : vector<8x128xf32>
      %221 = arith.mulf %210, %187 : vector<8x128xf32>
      %222 = arith.mulf %202, %212 : vector<8x128xf32>
      %223 = arith.addf %221, %222 : vector<8x128xf32>
      %224 = math.tanh %223 : vector<8x128xf32>
      %225 = arith.mulf %220, %224 : vector<8x128xf32>
      %226 = arith.addi %0, %c3_i32 : i32
      %227 = vector.broadcast %226 : i32 to vector<8x1xi32>
      %228 = arith.cmpi sgt, %20, %227 : vector<8x1xi32>
      %cst_83 = arith.constant 0.000000e+00 : f32
      %229 = vector.shape_cast %228 : vector<8x1xi1> to vector<8x1xi1>
      %230 = vector.broadcast %229 : vector<8x1xi1> to vector<8x128xi1>
      %231 = vector.broadcast %cst_83 : f32 to vector<8x128xf32>
      %232 = arith.select %230, %225, %231 : vector<8x128xi1>, vector<8x128xf32>
      %c0_84 = arith.constant 0 : index
      %233 = arith.index_cast %189 : i32 to index
      %c0_85 = arith.constant 0 : index
      %234 = vector.load %arg8[%c0_84, %233, %c0_85] : memref<1x64x128xf32, #tpu.memory_space<vmem>>, vector<1x8x128xf32>
      %235 = vector.shape_cast %234 : vector<1x8x128xf32> to vector<8x128xf32>
      %236 = vector.shape_cast %232 : vector<8x128xf32> to vector<1x8x128xf32>
      tpu.vector_store %arg8[%c0_84, %233, %c0_85], %236 {strides = array<i32>} : memref<1x64x128xf32, #tpu.memory_space<vmem>>, vector<1x8x128xf32>,
      %237 = vector.shape_cast %228 : vector<8x1xi1> to vector<8x1xi1>
      %238 = vector.broadcast %237 : vector<8x1xi1> to vector<8x128xi1>
      %239 = arith.select %238, %225, %184 : vector<8x128xi1>, vector<8x128xf32>
      %240 = vector.shape_cast %228 : vector<8x1xi1> to vector<8x1xi1>
      %241 = vector.broadcast %240 : vector<8x1xi1> to vector<8x128xi1>
      %242 = arith.select %241, %223, %187 : vector<8x128xi1>, vector<8x128xf32>
      %c4_i32 = arith.constant 4 : i32
      %c8_i32_86 = arith.constant 8 : i32
      %243 = arith.muli %c4_i32, %c8_i32_86 : i32
      %244 = tpu.assume_multiple %243, 8 : i32
      %245 = arith.index_cast %244 : i32 to index
      %c0_87 = arith.constant 0 : index
      %246 = vector.load %arg11[%245, %c0_87] : memref<64x512xf32, #tpu.memory_space<vmem>>, vector<8x512xf32>
      %c0_88 = arith.constant 0 : index
      %c0_89 = arith.constant 0 : index
      %247 = vector.load %arg5[%c0_88, %c0_89] : memref<128x512xf32, #tpu.memory_space<vmem>>, vector<128x512xf32>
      %cst_90 = arith.constant dense<0.000000e+00> : vector<8x512xf32>
      %248 = tpu.matmul %239, %247, %cst_90 {dimension_numbers = #tpu.dot_dimension_numbers<[1], [0], [0], [1], [0, 0, 1, 1], [], []>} : vector<8x128xf32>, vector<128x512xf32>, vector<8x512xf32> -> vector<8x512xf32>
      %249 = arith.addf %246, %248 : vector<8x512xf32>
      %250 = vector.extract_strided_slice %249 {offsets = [0, 0], sizes = [8, 128], strides = [1, 1]} : vector<8x512xf32> to vector<8x128xf32>
      %cst_91 = arith.constant 5.000000e-01 : f32
      %251 = vector.broadcast %cst_91 : f32 to vector<8x128xf32>
      %252 = arith.mulf %251, %250 : vector<8x128xf32>
      %253 = math.tanh %252 : vector<8x128xf32>
      %cst_92 = arith.constant 5.000000e-01 : f32
      %254 = vector.broadcast %cst_92 : f32 to vector<8x128xf32>
      %255 = arith.mulf %254, %253 : vector<8x128xf32>
      %cst_93 = arith.constant 5.000000e-01 : f32
      %256 = vector.broadcast %cst_93 : f32 to vector<8x128xf32>
      %257 = arith.addf %255, %256 : vector<8x128xf32>
      %258 = vector.extract_strided_slice %249 {offsets = [0, 128], sizes = [8, 128], strides = [1, 1]} : vector<8x512xf32> to vector<8x128xf32>
      %cst_94 = arith.constant 5.000000e-01 : f32
      %259 = vector.broadcast %cst_94 : f32 to vector<8x128xf32>
      %260 = arith.mulf %259, %258 : vector<8x128xf32>
      %261 = math.tanh %260 : vector<8x128xf32>
      %cst_95 = arith.constant 5.000000e-01 : f32
      %262 = vector.broadcast %cst_95 : f32 to vector<8x128xf32>
      %263 = arith.mulf %262, %261 : vector<8x128xf32>
      %cst_96 = arith.constant 5.000000e-01 : f32
      %264 = vector.broadcast %cst_96 : f32 to vector<8x128xf32>
      %265 = arith.addf %263, %264 : vector<8x128xf32>
      %266 = vector.extract_strided_slice %249 {offsets = [0, 256], sizes = [8, 128], strides = [1, 1]} : vector<8x512xf32> to vector<8x128xf32>
      %267 = math.tanh %266 : vector<8x128xf32>
      %268 = vector.extract_strided_slice %249 {offsets = [0, 384], sizes = [8, 128], strides = [1, 1]} : vector<8x512xf32> to vector<8x128xf32>
      %cst_97 = arith.constant 5.000000e-01 : f32
      %269 = vector.broadcast %cst_97 : f32 to vector<8x128xf32>
      %270 = arith.mulf %269, %268 : vector<8x128xf32>
      %271 = math.tanh %270 : vector<8x128xf32>
      %cst_98 = arith.constant 5.000000e-01 : f32
      %272 = vector.broadcast %cst_98 : f32 to vector<8x128xf32>
      %273 = arith.mulf %272, %271 : vector<8x128xf32>
      %cst_99 = arith.constant 5.000000e-01 : f32
      %274 = vector.broadcast %cst_99 : f32 to vector<8x128xf32>
      %275 = arith.addf %273, %274 : vector<8x128xf32>
      %276 = arith.mulf %265, %242 : vector<8x128xf32>
      %277 = arith.mulf %257, %267 : vector<8x128xf32>
      %278 = arith.addf %276, %277 : vector<8x128xf32>
      %279 = math.tanh %278 : vector<8x128xf32>
      %280 = arith.mulf %275, %279 : vector<8x128xf32>
      %281 = arith.addi %0, %c4_i32 : i32
      %282 = vector.broadcast %281 : i32 to vector<8x1xi32>
      %283 = arith.cmpi sgt, %20, %282 : vector<8x1xi32>
      %cst_100 = arith.constant 0.000000e+00 : f32
      %284 = vector.shape_cast %283 : vector<8x1xi1> to vector<8x1xi1>
      %285 = vector.broadcast %284 : vector<8x1xi1> to vector<8x128xi1>
      %286 = vector.broadcast %cst_100 : f32 to vector<8x128xf32>
      %287 = arith.select %285, %280, %286 : vector<8x128xi1>, vector<8x128xf32>
      %c0_101 = arith.constant 0 : index
      %288 = arith.index_cast %244 : i32 to index
      %c0_102 = arith.constant 0 : index
      %289 = vector.load %arg8[%c0_101, %288, %c0_102] : memref<1x64x128xf32, #tpu.memory_space<vmem>>, vector<1x8x128xf32>
      %290 = vector.shape_cast %289 : vector<1x8x128xf32> to vector<8x128xf32>
      %291 = vector.shape_cast %287 : vector<8x128xf32> to vector<1x8x128xf32>
      tpu.vector_store %arg8[%c0_101, %288, %c0_102], %291 {strides = array<i32>} : memref<1x64x128xf32, #tpu.memory_space<vmem>>, vector<1x8x128xf32>,
      %292 = vector.shape_cast %283 : vector<8x1xi1> to vector<8x1xi1>
      %293 = vector.broadcast %292 : vector<8x1xi1> to vector<8x128xi1>
      %294 = arith.select %293, %280, %239 : vector<8x128xi1>, vector<8x128xf32>
      %295 = vector.shape_cast %283 : vector<8x1xi1> to vector<8x1xi1>
      %296 = vector.broadcast %295 : vector<8x1xi1> to vector<8x128xi1>
      %297 = arith.select %296, %278, %242 : vector<8x128xi1>, vector<8x128xf32>
      %c5_i32 = arith.constant 5 : i32
      %c8_i32_103 = arith.constant 8 : i32
      %298 = arith.muli %c5_i32, %c8_i32_103 : i32
      %299 = tpu.assume_multiple %298, 8 : i32
      %300 = arith.index_cast %299 : i32 to index
      %c0_104 = arith.constant 0 : index
      %301 = vector.load %arg11[%300, %c0_104] : memref<64x512xf32, #tpu.memory_space<vmem>>, vector<8x512xf32>
      %c0_105 = arith.constant 0 : index
      %c0_106 = arith.constant 0 : index
      %302 = vector.load %arg5[%c0_105, %c0_106] : memref<128x512xf32, #tpu.memory_space<vmem>>, vector<128x512xf32>
      %cst_107 = arith.constant dense<0.000000e+00> : vector<8x512xf32>
      %303 = tpu.matmul %294, %302, %cst_107 {dimension_numbers = #tpu.dot_dimension_numbers<[1], [0], [0], [1], [0, 0, 1, 1], [], []>} : vector<8x128xf32>, vector<128x512xf32>, vector<8x512xf32> -> vector<8x512xf32>
      %304 = arith.addf %301, %303 : vector<8x512xf32>
      %305 = vector.extract_strided_slice %304 {offsets = [0, 0], sizes = [8, 128], strides = [1, 1]} : vector<8x512xf32> to vector<8x128xf32>
      %cst_108 = arith.constant 5.000000e-01 : f32
      %306 = vector.broadcast %cst_108 : f32 to vector<8x128xf32>
      %307 = arith.mulf %306, %305 : vector<8x128xf32>
      %308 = math.tanh %307 : vector<8x128xf32>
      %cst_109 = arith.constant 5.000000e-01 : f32
      %309 = vector.broadcast %cst_109 : f32 to vector<8x128xf32>
      %310 = arith.mulf %309, %308 : vector<8x128xf32>
      %cst_110 = arith.constant 5.000000e-01 : f32
      %311 = vector.broadcast %cst_110 : f32 to vector<8x128xf32>
      %312 = arith.addf %310, %311 : vector<8x128xf32>
      %313 = vector.extract_strided_slice %304 {offsets = [0, 128], sizes = [8, 128], strides = [1, 1]} : vector<8x512xf32> to vector<8x128xf32>
      %cst_111 = arith.constant 5.000000e-01 : f32
      %314 = vector.broadcast %cst_111 : f32 to vector<8x128xf32>
      %315 = arith.mulf %314, %313 : vector<8x128xf32>
      %316 = math.tanh %315 : vector<8x128xf32>
      %cst_112 = arith.constant 5.000000e-01 : f32
      %317 = vector.broadcast %cst_112 : f32 to vector<8x128xf32>
      %318 = arith.mulf %317, %316 : vector<8x128xf32>
      %cst_113 = arith.constant 5.000000e-01 : f32
      %319 = vector.broadcast %cst_113 : f32 to vector<8x128xf32>
      %320 = arith.addf %318, %319 : vector<8x128xf32>
      %321 = vector.extract_strided_slice %304 {offsets = [0, 256], sizes = [8, 128], strides = [1, 1]} : vector<8x512xf32> to vector<8x128xf32>
      %322 = math.tanh %321 : vector<8x128xf32>
      %323 = vector.extract_strided_slice %304 {offsets = [0, 384], sizes = [8, 128], strides = [1, 1]} : vector<8x512xf32> to vector<8x128xf32>
      %cst_114 = arith.constant 5.000000e-01 : f32
      %324 = vector.broadcast %cst_114 : f32 to vector<8x128xf32>
      %325 = arith.mulf %324, %323 : vector<8x128xf32>
      %326 = math.tanh %325 : vector<8x128xf32>
      %cst_115 = arith.constant 5.000000e-01 : f32
      %327 = vector.broadcast %cst_115 : f32 to vector<8x128xf32>
      %328 = arith.mulf %327, %326 : vector<8x128xf32>
      %cst_116 = arith.constant 5.000000e-01 : f32
      %329 = vector.broadcast %cst_116 : f32 to vector<8x128xf32>
      %330 = arith.addf %328, %329 : vector<8x128xf32>
      %331 = arith.mulf %320, %297 : vector<8x128xf32>
      %332 = arith.mulf %312, %322 : vector<8x128xf32>
      %333 = arith.addf %331, %332 : vector<8x128xf32>
      %334 = math.tanh %333 : vector<8x128xf32>
      %335 = arith.mulf %330, %334 : vector<8x128xf32>
      %336 = arith.addi %0, %c5_i32 : i32
      %337 = vector.broadcast %336 : i32 to vector<8x1xi32>
      %338 = arith.cmpi sgt, %20, %337 : vector<8x1xi32>
      %cst_117 = arith.constant 0.000000e+00 : f32
      %339 = vector.shape_cast %338 : vector<8x1xi1> to vector<8x1xi1>
      %340 = vector.broadcast %339 : vector<8x1xi1> to vector<8x128xi1>
      %341 = vector.broadcast %cst_117 : f32 to vector<8x128xf32>
      %342 = arith.select %340, %335, %341 : vector<8x128xi1>, vector<8x128xf32>
      %c0_118 = arith.constant 0 : index
      %343 = arith.index_cast %299 : i32 to index
      %c0_119 = arith.constant 0 : index
      %344 = vector.load %arg8[%c0_118, %343, %c0_119] : memref<1x64x128xf32, #tpu.memory_space<vmem>>, vector<1x8x128xf32>
      %345 = vector.shape_cast %344 : vector<1x8x128xf32> to vector<8x128xf32>
      %346 = vector.shape_cast %342 : vector<8x128xf32> to vector<1x8x128xf32>
      tpu.vector_store %arg8[%c0_118, %343, %c0_119], %346 {strides = array<i32>} : memref<1x64x128xf32, #tpu.memory_space<vmem>>, vector<1x8x128xf32>,
      %347 = vector.shape_cast %338 : vector<8x1xi1> to vector<8x1xi1>
      %348 = vector.broadcast %347 : vector<8x1xi1> to vector<8x128xi1>
      %349 = arith.select %348, %335, %294 : vector<8x128xi1>, vector<8x128xf32>
      %350 = vector.shape_cast %338 : vector<8x1xi1> to vector<8x1xi1>
      %351 = vector.broadcast %350 : vector<8x1xi1> to vector<8x128xi1>
      %352 = arith.select %351, %333, %297 : vector<8x128xi1>, vector<8x128xf32>
      %c6_i32 = arith.constant 6 : i32
      %c8_i32_120 = arith.constant 8 : i32
      %353 = arith.muli %c6_i32, %c8_i32_120 : i32
      %354 = tpu.assume_multiple %353, 8 : i32
      %355 = arith.index_cast %354 : i32 to index
      %c0_121 = arith.constant 0 : index
      %356 = vector.load %arg11[%355, %c0_121] : memref<64x512xf32, #tpu.memory_space<vmem>>, vector<8x512xf32>
      %c0_122 = arith.constant 0 : index
      %c0_123 = arith.constant 0 : index
      %357 = vector.load %arg5[%c0_122, %c0_123] : memref<128x512xf32, #tpu.memory_space<vmem>>, vector<128x512xf32>
      %cst_124 = arith.constant dense<0.000000e+00> : vector<8x512xf32>
      %358 = tpu.matmul %349, %357, %cst_124 {dimension_numbers = #tpu.dot_dimension_numbers<[1], [0], [0], [1], [0, 0, 1, 1], [], []>} : vector<8x128xf32>, vector<128x512xf32>, vector<8x512xf32> -> vector<8x512xf32>
      %359 = arith.addf %356, %358 : vector<8x512xf32>
      %360 = vector.extract_strided_slice %359 {offsets = [0, 0], sizes = [8, 128], strides = [1, 1]} : vector<8x512xf32> to vector<8x128xf32>
      %cst_125 = arith.constant 5.000000e-01 : f32
      %361 = vector.broadcast %cst_125 : f32 to vector<8x128xf32>
      %362 = arith.mulf %361, %360 : vector<8x128xf32>
      %363 = math.tanh %362 : vector<8x128xf32>
      %cst_126 = arith.constant 5.000000e-01 : f32
      %364 = vector.broadcast %cst_126 : f32 to vector<8x128xf32>
      %365 = arith.mulf %364, %363 : vector<8x128xf32>
      %cst_127 = arith.constant 5.000000e-01 : f32
      %366 = vector.broadcast %cst_127 : f32 to vector<8x128xf32>
      %367 = arith.addf %365, %366 : vector<8x128xf32>
      %368 = vector.extract_strided_slice %359 {offsets = [0, 128], sizes = [8, 128], strides = [1, 1]} : vector<8x512xf32> to vector<8x128xf32>
      %cst_128 = arith.constant 5.000000e-01 : f32
      %369 = vector.broadcast %cst_128 : f32 to vector<8x128xf32>
      %370 = arith.mulf %369, %368 : vector<8x128xf32>
      %371 = math.tanh %370 : vector<8x128xf32>
      %cst_129 = arith.constant 5.000000e-01 : f32
      %372 = vector.broadcast %cst_129 : f32 to vector<8x128xf32>
      %373 = arith.mulf %372, %371 : vector<8x128xf32>
      %cst_130 = arith.constant 5.000000e-01 : f32
      %374 = vector.broadcast %cst_130 : f32 to vector<8x128xf32>
      %375 = arith.addf %373, %374 : vector<8x128xf32>
      %376 = vector.extract_strided_slice %359 {offsets = [0, 256], sizes = [8, 128], strides = [1, 1]} : vector<8x512xf32> to vector<8x128xf32>
      %377 = math.tanh %376 : vector<8x128xf32>
      %378 = vector.extract_strided_slice %359 {offsets = [0, 384], sizes = [8, 128], strides = [1, 1]} : vector<8x512xf32> to vector<8x128xf32>
      %cst_131 = arith.constant 5.000000e-01 : f32
      %379 = vector.broadcast %cst_131 : f32 to vector<8x128xf32>
      %380 = arith.mulf %379, %378 : vector<8x128xf32>
      %381 = math.tanh %380 : vector<8x128xf32>
      %cst_132 = arith.constant 5.000000e-01 : f32
      %382 = vector.broadcast %cst_132 : f32 to vector<8x128xf32>
      %383 = arith.mulf %382, %381 : vector<8x128xf32>
      %cst_133 = arith.constant 5.000000e-01 : f32
      %384 = vector.broadcast %cst_133 : f32 to vector<8x128xf32>
      %385 = arith.addf %383, %384 : vector<8x128xf32>
      %386 = arith.mulf %375, %352 : vector<8x128xf32>
      %387 = arith.mulf %367, %377 : vector<8x128xf32>
      %388 = arith.addf %386, %387 : vector<8x128xf32>
      %389 = math.tanh %388 : vector<8x128xf32>
      %390 = arith.mulf %385, %389 : vector<8x128xf32>
      %391 = arith.addi %0, %c6_i32 : i32
      %392 = vector.broadcast %391 : i32 to vector<8x1xi32>
      %393 = arith.cmpi sgt, %20, %392 : vector<8x1xi32>
      %cst_134 = arith.constant 0.000000e+00 : f32
      %394 = vector.shape_cast %393 : vector<8x1xi1> to vector<8x1xi1>
      %395 = vector.broadcast %394 : vector<8x1xi1> to vector<8x128xi1>
      %396 = vector.broadcast %cst_134 : f32 to vector<8x128xf32>
      %397 = arith.select %395, %390, %396 : vector<8x128xi1>, vector<8x128xf32>
      %c0_135 = arith.constant 0 : index
      %398 = arith.index_cast %354 : i32 to index
      %c0_136 = arith.constant 0 : index
      %399 = vector.load %arg8[%c0_135, %398, %c0_136] : memref<1x64x128xf32, #tpu.memory_space<vmem>>, vector<1x8x128xf32>
      %400 = vector.shape_cast %399 : vector<1x8x128xf32> to vector<8x128xf32>
      %401 = vector.shape_cast %397 : vector<8x128xf32> to vector<1x8x128xf32>
      tpu.vector_store %arg8[%c0_135, %398, %c0_136], %401 {strides = array<i32>} : memref<1x64x128xf32, #tpu.memory_space<vmem>>, vector<1x8x128xf32>,
      %402 = vector.shape_cast %393 : vector<8x1xi1> to vector<8x1xi1>
      %403 = vector.broadcast %402 : vector<8x1xi1> to vector<8x128xi1>
      %404 = arith.select %403, %390, %349 : vector<8x128xi1>, vector<8x128xf32>
      %405 = vector.shape_cast %393 : vector<8x1xi1> to vector<8x1xi1>
      %406 = vector.broadcast %405 : vector<8x1xi1> to vector<8x128xi1>
      %407 = arith.select %406, %388, %352 : vector<8x128xi1>, vector<8x128xf32>
      %c7_i32 = arith.constant 7 : i32
      %c8_i32_137 = arith.constant 8 : i32
      %408 = arith.muli %c7_i32, %c8_i32_137 : i32
      %409 = tpu.assume_multiple %408, 8 : i32
      %410 = arith.index_cast %409 : i32 to index
      %c0_138 = arith.constant 0 : index
      %411 = vector.load %arg11[%410, %c0_138] : memref<64x512xf32, #tpu.memory_space<vmem>>, vector<8x512xf32>
      %c0_139 = arith.constant 0 : index
      %c0_140 = arith.constant 0 : index
      %412 = vector.load %arg5[%c0_139, %c0_140] : memref<128x512xf32, #tpu.memory_space<vmem>>, vector<128x512xf32>
      %cst_141 = arith.constant dense<0.000000e+00> : vector<8x512xf32>
      %413 = tpu.matmul %404, %412, %cst_141 {dimension_numbers = #tpu.dot_dimension_numbers<[1], [0], [0], [1], [0, 0, 1, 1], [], []>} : vector<8x128xf32>, vector<128x512xf32>, vector<8x512xf32> -> vector<8x512xf32>
      %414 = arith.addf %411, %413 : vector<8x512xf32>
      %415 = vector.extract_strided_slice %414 {offsets = [0, 0], sizes = [8, 128], strides = [1, 1]} : vector<8x512xf32> to vector<8x128xf32>
      %cst_142 = arith.constant 5.000000e-01 : f32
      %416 = vector.broadcast %cst_142 : f32 to vector<8x128xf32>
      %417 = arith.mulf %416, %415 : vector<8x128xf32>
      %418 = math.tanh %417 : vector<8x128xf32>
      %cst_143 = arith.constant 5.000000e-01 : f32
      %419 = vector.broadcast %cst_143 : f32 to vector<8x128xf32>
      %420 = arith.mulf %419, %418 : vector<8x128xf32>
      %cst_144 = arith.constant 5.000000e-01 : f32
      %421 = vector.broadcast %cst_144 : f32 to vector<8x128xf32>
      %422 = arith.addf %420, %421 : vector<8x128xf32>
      %423 = vector.extract_strided_slice %414 {offsets = [0, 128], sizes = [8, 128], strides = [1, 1]} : vector<8x512xf32> to vector<8x128xf32>
      %cst_145 = arith.constant 5.000000e-01 : f32
      %424 = vector.broadcast %cst_145 : f32 to vector<8x128xf32>
      %425 = arith.mulf %424, %423 : vector<8x128xf32>
      %426 = math.tanh %425 : vector<8x128xf32>
      %cst_146 = arith.constant 5.000000e-01 : f32
      %427 = vector.broadcast %cst_146 : f32 to vector<8x128xf32>
      %428 = arith.mulf %427, %426 : vector<8x128xf32>
      %cst_147 = arith.constant 5.000000e-01 : f32
      %429 = vector.broadcast %cst_147 : f32 to vector<8x128xf32>
      %430 = arith.addf %428, %429 : vector<8x128xf32>
      %431 = vector.extract_strided_slice %414 {offsets = [0, 256], sizes = [8, 128], strides = [1, 1]} : vector<8x512xf32> to vector<8x128xf32>
      %432 = math.tanh %431 : vector<8x128xf32>
      %433 = vector.extract_strided_slice %414 {offsets = [0, 384], sizes = [8, 128], strides = [1, 1]} : vector<8x512xf32> to vector<8x128xf32>
      %cst_148 = arith.constant 5.000000e-01 : f32
      %434 = vector.broadcast %cst_148 : f32 to vector<8x128xf32>
      %435 = arith.mulf %434, %433 : vector<8x128xf32>
      %436 = math.tanh %435 : vector<8x128xf32>
      %cst_149 = arith.constant 5.000000e-01 : f32
      %437 = vector.broadcast %cst_149 : f32 to vector<8x128xf32>
      %438 = arith.mulf %437, %436 : vector<8x128xf32>
      %cst_150 = arith.constant 5.000000e-01 : f32
      %439 = vector.broadcast %cst_150 : f32 to vector<8x128xf32>
      %440 = arith.addf %438, %439 : vector<8x128xf32>
      %441 = arith.mulf %430, %407 : vector<8x128xf32>
      %442 = arith.mulf %422, %432 : vector<8x128xf32>
      %443 = arith.addf %441, %442 : vector<8x128xf32>
      %444 = math.tanh %443 : vector<8x128xf32>
      %445 = arith.mulf %440, %444 : vector<8x128xf32>
      %446 = arith.addi %0, %c7_i32 : i32
      %447 = vector.broadcast %446 : i32 to vector<8x1xi32>
      %448 = arith.cmpi sgt, %20, %447 : vector<8x1xi32>
      %cst_151 = arith.constant 0.000000e+00 : f32
      %449 = vector.shape_cast %448 : vector<8x1xi1> to vector<8x1xi1>
      %450 = vector.broadcast %449 : vector<8x1xi1> to vector<8x128xi1>
      %451 = vector.broadcast %cst_151 : f32 to vector<8x128xf32>
      %452 = arith.select %450, %445, %451 : vector<8x128xi1>, vector<8x128xf32>
      %c0_152 = arith.constant 0 : index
      %453 = arith.index_cast %409 : i32 to index
      %c0_153 = arith.constant 0 : index
      %454 = vector.load %arg8[%c0_152, %453, %c0_153] : memref<1x64x128xf32, #tpu.memory_space<vmem>>, vector<1x8x128xf32>
      %455 = vector.shape_cast %454 : vector<1x8x128xf32> to vector<8x128xf32>
      %456 = vector.shape_cast %452 : vector<8x128xf32> to vector<1x8x128xf32>
      tpu.vector_store %arg8[%c0_152, %453, %c0_153], %456 {strides = array<i32>} : memref<1x64x128xf32, #tpu.memory_space<vmem>>, vector<1x8x128xf32>,
      %457 = vector.shape_cast %448 : vector<8x1xi1> to vector<8x1xi1>
      %458 = vector.broadcast %457 : vector<8x1xi1> to vector<8x128xi1>
      %459 = arith.select %458, %445, %404 : vector<8x128xi1>, vector<8x128xf32>
      %460 = vector.shape_cast %448 : vector<8x1xi1> to vector<8x1xi1>
      %461 = vector.broadcast %460 : vector<8x1xi1> to vector<8x128xi1>
      %462 = arith.select %461, %443, %407 : vector<8x128xi1>, vector<8x128xf32>
      %c8_i32_154 = arith.constant 8 : i32
      %c0_155 = arith.constant 0 : index
      %c0_156 = arith.constant 0 : index
      %463 = vector.load %arg9[%c0_155, %c0_156] : memref<8x128xf32, #tpu.memory_space<vmem>>, vector<8x128xf32>
      tpu.vector_store %arg9[%c0_155, %c0_156], %459 {strides = array<i32>} : memref<8x128xf32, #tpu.memory_space<vmem>>, vector<8x128xf32>,
      %c0_157 = arith.constant 0 : index
      %c0_158 = arith.constant 0 : index
      %464 = vector.load %arg10[%c0_157, %c0_158] : memref<8x128xf32, #tpu.memory_space<vmem>>, vector<8x128xf32>
      tpu.vector_store %arg10[%c0_157, %c0_158], %462 {strides = array<i32>} : memref<8x128xf32, #tpu.memory_space<vmem>>, vector<8x128xf32>,
    } else {
    }
    return
  }
  func.func @transform_0(%arg0: i32, %arg1: i32, %arg2: memref<1xi32, #tpu.memory_space<smem>>) -> (i32, i32, i32) {
    %c0_i32 = arith.constant 0 : i32
    %c0_i32_0 = arith.constant 0 : i32
    return %arg0, %arg1, %c0_i32 : i32, i32, i32
  }
  func.func @transform_1(%arg0: i32, %arg1: i32, %arg2: memref<1xi32, #tpu.memory_space<smem>>) -> (i32, i32) {
    %c0_i32 = arith.constant 0 : i32
    %c0_i32_0 = arith.constant 0 : i32
    %c0_i32_1 = arith.constant 0 : i32
    return %c0_i32, %c0_i32_0 : i32, i32
  }
  func.func @transform_2(%arg0: i32, %arg1: i32, %arg2: memref<1xi32, #tpu.memory_space<smem>>) -> (i32, i32) {
    %c0_i32 = arith.constant 0 : i32
    %c0_i32_0 = arith.constant 0 : i32
    %c0_i32_1 = arith.constant 0 : i32
    return %c0_i32, %c0_i32_0 : i32, i32
  }
  func.func @transform_3(%arg0: i32, %arg1: i32, %arg2: memref<1xi32, #tpu.memory_space<smem>>) -> (i32, i32) {
    %c0_i32 = arith.constant 0 : i32
    %c0_i32_0 = arith.constant 0 : i32
    %c0_i32_1 = arith.constant 0 : i32
    return %c0_i32, %c0_i32_0 : i32, i32
  }
  func.func @transform_4(%arg0: i32, %arg1: i32, %arg2: memref<1xi32, #tpu.memory_space<smem>>) -> (i32, i32) {
    %c0_i32 = arith.constant 0 : i32
    %c0_i32_0 = arith.constant 0 : i32
    return %arg0, %c0_i32 : i32, i32
  }
  func.func @transform_5(%arg0: i32, %arg1: i32, %arg2: memref<1xi32, #tpu.memory_space<smem>>) -> (i32, i32, i32) {
    %c0_i32 = arith.constant 0 : i32
    %c0_i32_0 = arith.constant 0 : i32
    return %arg0, %arg1, %c0_i32 : i32, i32, i32
  }
  func.func @transform_6(%arg0: i32, %arg1: i32, %arg2: memref<1xi32, #tpu.memory_space<smem>>) -> (i32, i32) {
    %c0_i32 = arith.constant 0 : i32
    %c0_i32_0 = arith.constant 0 : i32
    return %arg0, %c0_i32 : i32, i32
  }
  func.func @transform_7(%arg0: i32, %arg1: i32, %arg2: memref<1xi32, #tpu.memory_space<smem>>) -> (i32, i32) {
    %c0_i32 = arith.constant 0 : i32
    %c0_i32_0 = arith.constant 0 : i32
    return %arg0, %c0_i32 : i32, i32
  }
}

module attributes {stable_mosaic.version = 11 : i64} {
  func.func @_lstm_rec_kernel(%arg0: i32, %arg1: i32, %arg2: memref<1xi32, #tpu.memory_space<smem>>, %arg3: memref<1x64x16xf32, #tpu.memory_space<vmem>>, %arg4: memref<16x512xf32, #tpu.memory_space<vmem>>, %arg5: memref<128x512xf32, #tpu.memory_space<vmem>>, %arg6: memref<1x512xf32, #tpu.memory_space<vmem>>, %arg7: memref<8x1xi32, #tpu.memory_space<vmem>>, %arg8: memref<1x64x128xf32, #tpu.memory_space<vmem>>, %arg9: memref<8x128xf32, #tpu.memory_space<vmem>>, %arg10: memref<8x128xf32, #tpu.memory_space<vmem>>, %arg11: memref<64x512xf32, #tpu.memory_space<vmem>>) attributes {dimension_semantics = [#tpu.dimension_semantics<parallel>, #tpu.dimension_semantics<arbitrary>], iteration_bounds = array<i64: 1, 1>, scalar_prefetch = 1 : i64, scratch_operands = 1 : i64, tpu.core_type = #tpu.core_type<tc>, window_params = [{transform_indices = @transform_0, window_bounds = array<i64: 1, 64, 16>}, {pipeline_mode = #tpu.pipeline_mode<synchronous>, transform_indices = @transform_1, window_bounds = array<i64: 16, 512>}, {pipeline_mode = #tpu.pipeline_mode<synchronous>, transform_indices = @transform_2, window_bounds = array<i64: 128, 512>}, {pipeline_mode = #tpu.pipeline_mode<synchronous>, transform_indices = @transform_3, window_bounds = array<i64: 1, 512>}, {transform_indices = @transform_4, window_bounds = array<i64: 8, 1>}, {transform_indices = @transform_5, window_bounds = array<i64: 1, 64, 128>}, {transform_indices = @transform_6, window_bounds = array<i64: 8, 128>}, {transform_indices = @transform_7, window_bounds = array<i64: 8, 128>}]} {
    %c8_i32 = arith.constant 8 : i32
    %0 = arith.muli %arg1, %c8_i32 : i32
    %c0_i32 = arith.constant 0 : i32
    %1 = arith.cmpi eq, %arg1, %c0_i32 : i32
    %2 = arith.extui %1 : i1 to i32
    %c0_i32_0 = arith.constant 0 : i32
    %3 = arith.cmpi ne, %2, %c0_i32_0 : i32
    scf.if %3 {
      %cst = arith.constant 0.000000e+00 : f32
      %12 = vector.broadcast %cst : f32 to vector<8x128xf32>
      %c0 = arith.constant 0 : index
      %c0_3 = arith.constant 0 : index
      %13 = vector.load %arg9[%c0, %c0_3] : memref<8x128xf32, #tpu.memory_space<vmem>>, vector<8x128xf32>
      tpu.vector_store %arg9[%c0, %c0_3], %12 {strides = array<i32>} : memref<8x128xf32, #tpu.memory_space<vmem>>, vector<8x128xf32>,
      %cst_4 = arith.constant 0.000000e+00 : f32
      %14 = vector.broadcast %cst_4 : f32 to vector<8x128xf32>
      %c0_5 = arith.constant 0 : index
      %c0_6 = arith.constant 0 : index
      %15 = vector.load %arg10[%c0_5, %c0_6] : memref<8x128xf32, #tpu.memory_space<vmem>>, vector<8x128xf32>
      tpu.vector_store %arg10[%c0_5, %c0_6], %14 {strides = array<i32>} : memref<8x128xf32, #tpu.memory_space<vmem>>, vector<8x128xf32>,
    } else {
    }
    %4 = arith.index_cast %arg0 : i32 to index
    %5 = memref.load %arg2[%4] : memref<1xi32, #tpu.memory_space<smem>>
    %6 = arith.cmpi sge, %0, %5 : i32
    %7 = arith.extui %6 : i1 to i32
    %c0_i32_1 = arith.constant 0 : i32
    %8 = arith.cmpi ne, %7, %c0_i32_1 : i32
    scf.if %8 {
      %cst = arith.constant 0.000000e+00 : f32
      %12 = vector.broadcast %cst : f32 to vector<64x128xf32>
      %c0 = arith.constant 0 : index
      %c0_3 = arith.constant 0 : index
      %c0_4 = arith.constant 0 : index
      %13 = vector.load %arg8[%c0, %c0_3, %c0_4] : memref<1x64x128xf32, #tpu.memory_space<vmem>>, vector<1x64x128xf32>
      %14 = vector.shape_cast %13 : vector<1x64x128xf32> to vector<64x128xf32>
      %15 = vector.shape_cast %12 : vector<64x128xf32> to vector<1x64x128xf32>
      tpu.vector_store %arg8[%c0, %c0_3, %c0_4], %15 {strides = array<i32>} : memref<1x64x128xf32, #tpu.memory_space<vmem>>, vector<1x64x128xf32>,
    } else {
    }
    %9 = arith.cmpi slt, %0, %5 : i32
    %10 = arith.extui %9 : i1 to i32
    %c0_i32_2 = arith.constant 0 : i32
    %11 = arith.cmpi ne, %10, %c0_i32_2 : i32
    scf.if %11 {
      %c0 = arith.constant 0 : index
      %c0_3 = arith.constant 0 : index
      %c0_4 = arith.constant 0 : index
      %12 = vector.load %arg3[%c0, %c0_3, %c0_4] : memref<1x64x16xf32, #tpu.memory_space<vmem>>, vector<1x64x16xf32>
      %13 = vector.shape_cast %12 : vector<1x64x16xf32> to vector<64x16xf32>
      %c0_5 = arith.constant 0 : index
      %c0_6 = arith.constant 0 : index
      %14 = vector.load %arg4[%c0_5, %c0_6] : memref<16x512xf32, #tpu.memory_space<vmem>>, vector<16x512xf32>
      %cst = arith.constant dense<0.000000e+00> : vector<64x512xf32>
      %15 = tpu.matmul %13, %14, %cst {dimension_numbers = #tpu.dot_dimension_numbers<[1], [0], [0], [1], [0, 0, 1, 1], [], []>} : vector<64x16xf32>, vector<16x512xf32>, vector<64x512xf32> -> vector<64x512xf32>
      %c0_7 = arith.constant 0 : index
      %c0_8 = arith.constant 0 : index
      %16 = vector.load %arg6[%c0_7, %c0_8] : memref<1x512xf32, #tpu.memory_space<vmem>>, vector<1x512xf32>
      %17 = vector.broadcast %16 : vector<1x512xf32> to vector<64x512xf32>
      %18 = arith.addf %15, %17 : vector<64x512xf32>
      %c0_9 = arith.constant 0 : index
      %c0_10 = arith.constant 0 : index
      %19 = vector.load %arg11[%c0_9, %c0_10] : memref<64x512xf32, #tpu.memory_space<vmem>>, vector<64x512xf32>
      tpu.vector_store %arg11[%c0_9, %c0_10], %18 {strides = array<i32>} : memref<64x512xf32, #tpu.memory_space<vmem>>, vector<64x512xf32>,
      %c0_11 = arith.constant 0 : index
      %c0_12 = arith.constant 0 : index
      %20 = vector.load %arg7[%c0_11, %c0_12] : memref<8x1xi32, #tpu.memory_space<vmem>>, vector<8x1xi32>
      %c0_13 = arith.constant 0 : index
      %c0_14 = arith.constant 0 : index
      %21 = vector.load %arg9[%c0_13, %c0_14] : memref<8x128xf32, #tpu.memory_space<vmem>>, vector<8x128xf32>
      %c0_15 = arith.constant 0 : index
      %c0_16 = arith.constant 0 : index
      %22 = vector.load %arg10[%c0_15, %c0_16] : memref<8x128xf32, #tpu.memory_space<vmem>>, vector<8x128xf32>
      %c0_i32_17 = arith.constant 0 : i32
      %c8_i32_18 = arith.constant 8 : i32
      %23 = arith.muli %c0_i32_17, %c8_i32_18 : i32
      %24 = tpu.assume_multiple %23, 8 : i32
      %25 = arith.index_cast %24 : i32 to index
      %c0_19 = arith.constant 0 : index
      %26 = vector.load %arg11[%25, %c0_19] : memref<64x512xf32, #tpu.memory_space<vmem>>, vector<8x512xf32>
      %c0_20 = arith.constant 0 : index
      %c0_21 = arith.constant 0 : index
      %27 = vector.load %arg5[%c0_20, %c0_21] : memref<128x512xf32, #tpu.memory_space<vmem>>, vector<128x512xf32>
      %cst_22 = arith.constant dense<0.000000e+00> : vector<8x512xf32>
      %28 = tpu.matmul %21, %27, %cst_22 {dimension_numbers = #tpu.dot_dimension_numbers<[1], [0], [0], [1], [0, 0, 1, 1], [], []>} : vector<8x128xf32>, vector<128x512xf32>, vector<8x512xf32> -> vector<8x512xf32>
      %29 = arith.addf %26, %28 : vector<8x512xf32>
      %30 = vector.extract_strided_slice %29 {offsets = [0, 0], sizes = [8, 128], strides = [1, 1]} : vector<8x512xf32> to vector<8x128xf32>
      %cst_23 = arith.constant 5.000000e-01 : f32
      %31 = vector.broadcast %cst_23 : f32 to vector<8x128xf32>
      %32 = arith.mulf %31, %30 : vector<8x128xf32>
      %33 = math.tanh %32 : vector<8x128xf32>
      %cst_24 = arith.constant 5.000000e-01 : f32
      %34 = vector.broadcast %cst_24 : f32 to vector<8x128xf32>
      %35 = arith.mulf %34, %33 : vector<8x128xf32>
      %cst_25 = arith.constant 5.000000e-01 : f32
      %36 = vector.broadcast %cst_25 : f32 to vector<8x128xf32>
      %37 = arith.addf %35, %36 : vector<8x128xf32>
      %38 = vector.extract_strided_slice %29 {offsets = [0, 128], sizes = [8, 128], strides = [1, 1]} : vector<8x512xf32> to vector<8x128xf32>
      %cst_26 = arith.constant 5.000000e-01 : f32
      %39 = vector.broadcast %cst_26 : f32 to vector<8x128xf32>
      %40 = arith.mulf %39, %38 : vector<8x128xf32>
      %41 = math.tanh %40 : vector<8x128xf32>
      %cst_27 = arith.constant 5.000000e-01 : f32
      %42 = vector.broadcast %cst_27 : f32 to vector<8x128xf32>
      %43 = arith.mulf %42, %41 : vector<8x128xf32>
      %cst_28 = arith.constant 5.000000e-01 : f32
      %44 = vector.broadcast %cst_28 : f32 to vector<8x128xf32>
      %45 = arith.addf %43, %44 : vector<8x128xf32>
      %46 = vector.extract_strided_slice %29 {offsets = [0, 256], sizes = [8, 128], strides = [1, 1]} : vector<8x512xf32> to vector<8x128xf32>
      %47 = math.tanh %46 : vector<8x128xf32>
      %48 = vector.extract_strided_slice %29 {offsets = [0, 384], sizes = [8, 128], strides = [1, 1]} : vector<8x512xf32> to vector<8x128xf32>
      %cst_29 = arith.constant 5.000000e-01 : f32
      %49 = vector.broadcast %cst_29 : f32 to vector<8x128xf32>
      %50 = arith.mulf %49, %48 : vector<8x128xf32>
      %51 = math.tanh %50 : vector<8x128xf32>
      %cst_30 = arith.constant 5.000000e-01 : f32
      %52 = vector.broadcast %cst_30 : f32 to vector<8x128xf32>
      %53 = arith.mulf %52, %51 : vector<8x128xf32>
      %cst_31 = arith.constant 5.000000e-01 : f32
      %54 = vector.broadcast %cst_31 : f32 to vector<8x128xf32>
      %55 = arith.addf %53, %54 : vector<8x128xf32>
      %56 = arith.mulf %45, %22 : vector<8x128xf32>
      %57 = arith.mulf %37, %47 : vector<8x128xf32>
      %58 = arith.addf %56, %57 : vector<8x128xf32>
      %59 = math.tanh %58 : vector<8x128xf32>
      %60 = arith.mulf %55, %59 : vector<8x128xf32>
      %61 = arith.addi %0, %c0_i32_17 : i32
      %62 = vector.broadcast %61 : i32 to vector<8x1xi32>
      %63 = arith.cmpi sgt, %20, %62 : vector<8x1xi32>
      %cst_32 = arith.constant 0.000000e+00 : f32
      %64 = vector.shape_cast %63 : vector<8x1xi1> to vector<8x1xi1>
      %65 = vector.broadcast %64 : vector<8x1xi1> to vector<8x128xi1>
      %66 = vector.broadcast %cst_32 : f32 to vector<8x128xf32>
      %67 = arith.select %65, %60, %66 : vector<8x128xi1>, vector<8x128xf32>
      %c0_33 = arith.constant 0 : index
      %68 = arith.index_cast %24 : i32 to index
      %c0_34 = arith.constant 0 : index
      %69 = vector.load %arg8[%c0_33, %68, %c0_34] : memref<1x64x128xf32, #tpu.memory_space<vmem>>, vector<1x8x128xf32>
      %70 = vector.shape_cast %69 : vector<1x8x128xf32> to vector<8x128xf32>
      %71 = vector.shape_cast %67 : vector<8x128xf32> to vector<1x8x128xf32>
      tpu.vector_store %arg8[%c0_33, %68, %c0_34], %71 {strides = array<i32>} : memref<1x64x128xf32, #tpu.memory_space<vmem>>, vector<1x8x128xf32>,
      %72 = vector.shape_cast %63 : vector<8x1xi1> to vector<8x1xi1>
      %73 = vector.broadcast %72 : vector<8x1xi1> to vector<8x128xi1>
      %74 = arith.select %73, %60, %21 : vector<8x128xi1>, vector<8x128xf32>
      %75 = vector.shape_cast %63 : vector<8x1xi1> to vector<8x1xi1>
      %76 = vector.broadcast %75 : vector<8x1xi1> to vector<8x128xi1>
      %77 = arith.select %76, %58, %22 : vector<8x128xi1>, vector<8x128xf32>
      %c1_i32 = arith.constant 1 : i32
      %c8_i32_35 = arith.constant 8 : i32
      %78 = arith.muli %c1_i32, %c8_i32_35 : i32
      %79 = tpu.assume_multiple %78, 8 : i32
      %80 = arith.index_cast %79 : i32 to index
      %c0_36 = arith.constant 0 : index
      %81 = vector.load %arg11[%80, %c0_36] : memref<64x512xf32, #tpu.memory_space<vmem>>, vector<8x512xf32>
      %c0_37 = arith.constant 0 : index
      %c0_38 = arith.constant 0 : index
      %82 = vector.load %arg5[%c0_37, %c0_38] : memref<128x512xf32, #tpu.memory_space<vmem>>, vector<128x512xf32>
      %cst_39 = arith.constant dense<0.000000e+00> : vector<8x512xf32>
      %83 = tpu.matmul %74, %82, %cst_39 {dimension_numbers = #tpu.dot_dimension_numbers<[1], [0], [0], [1], [0, 0, 1, 1], [], []>} : vector<8x128xf32>, vector<128x512xf32>, vector<8x512xf32> -> vector<8x512xf32>
      %84 = arith.addf %81, %83 : vector<8x512xf32>
      %85 = vector.extract_strided_slice %84 {offsets = [0, 0], sizes = [8, 128], strides = [1, 1]} : vector<8x512xf32> to vector<8x128xf32>
      %cst_40 = arith.constant 5.000000e-01 : f32
      %86 = vector.broadcast %cst_40 : f32 to vector<8x128xf32>
      %87 = arith.mulf %86, %85 : vector<8x128xf32>
      %88 = math.tanh %87 : vector<8x128xf32>
      %cst_41 = arith.constant 5.000000e-01 : f32
      %89 = vector.broadcast %cst_41 : f32 to vector<8x128xf32>
      %90 = arith.mulf %89, %88 : vector<8x128xf32>
      %cst_42 = arith.constant 5.000000e-01 : f32
      %91 = vector.broadcast %cst_42 : f32 to vector<8x128xf32>
      %92 = arith.addf %90, %91 : vector<8x128xf32>
      %93 = vector.extract_strided_slice %84 {offsets = [0, 128], sizes = [8, 128], strides = [1, 1]} : vector<8x512xf32> to vector<8x128xf32>
      %cst_43 = arith.constant 5.000000e-01 : f32
      %94 = vector.broadcast %cst_43 : f32 to vector<8x128xf32>
      %95 = arith.mulf %94, %93 : vector<8x128xf32>
      %96 = math.tanh %95 : vector<8x128xf32>
      %cst_44 = arith.constant 5.000000e-01 : f32
      %97 = vector.broadcast %cst_44 : f32 to vector<8x128xf32>
      %98 = arith.mulf %97, %96 : vector<8x128xf32>
      %cst_45 = arith.constant 5.000000e-01 : f32
      %99 = vector.broadcast %cst_45 : f32 to vector<8x128xf32>
      %100 = arith.addf %98, %99 : vector<8x128xf32>
      %101 = vector.extract_strided_slice %84 {offsets = [0, 256], sizes = [8, 128], strides = [1, 1]} : vector<8x512xf32> to vector<8x128xf32>
      %102 = math.tanh %101 : vector<8x128xf32>
      %103 = vector.extract_strided_slice %84 {offsets = [0, 384], sizes = [8, 128], strides = [1, 1]} : vector<8x512xf32> to vector<8x128xf32>
      %cst_46 = arith.constant 5.000000e-01 : f32
      %104 = vector.broadcast %cst_46 : f32 to vector<8x128xf32>
      %105 = arith.mulf %104, %103 : vector<8x128xf32>
      %106 = math.tanh %105 : vector<8x128xf32>
      %cst_47 = arith.constant 5.000000e-01 : f32
      %107 = vector.broadcast %cst_47 : f32 to vector<8x128xf32>
      %108 = arith.mulf %107, %106 : vector<8x128xf32>
      %cst_48 = arith.constant 5.000000e-01 : f32
      %109 = vector.broadcast %cst_48 : f32 to vector<8x128xf32>
      %110 = arith.addf %108, %109 : vector<8x128xf32>
      %111 = arith.mulf %100, %77 : vector<8x128xf32>
      %112 = arith.mulf %92, %102 : vector<8x128xf32>
      %113 = arith.addf %111, %112 : vector<8x128xf32>
      %114 = math.tanh %113 : vector<8x128xf32>
      %115 = arith.mulf %110, %114 : vector<8x128xf32>
      %116 = arith.addi %0, %c1_i32 : i32
      %117 = vector.broadcast %116 : i32 to vector<8x1xi32>
      %118 = arith.cmpi sgt, %20, %117 : vector<8x1xi32>
      %cst_49 = arith.constant 0.000000e+00 : f32
      %119 = vector.shape_cast %118 : vector<8x1xi1> to vector<8x1xi1>
      %120 = vector.broadcast %119 : vector<8x1xi1> to vector<8x128xi1>
      %121 = vector.broadcast %cst_49 : f32 to vector<8x128xf32>
      %122 = arith.select %120, %115, %121 : vector<8x128xi1>, vector<8x128xf32>
      %c0_50 = arith.constant 0 : index
      %123 = arith.index_cast %79 : i32 to index
      %c0_51 = arith.constant 0 : index
      %124 = vector.load %arg8[%c0_50, %123, %c0_51] : memref<1x64x128xf32, #tpu.memory_space<vmem>>, vector<1x8x128xf32>
      %125 = vector.shape_cast %124 : vector<1x8x128xf32> to vector<8x128xf32>
      %126 = vector.shape_cast %122 : vector<8x128xf32> to vector<1x8x128xf32>
      tpu.vector_store %arg8[%c0_50, %123, %c0_51], %126 {strides = array<i32>} : memref<1x64x128xf32, #tpu.memory_space<vmem>>, vector<1x8x128xf32>,
      %127 = vector.shape_cast %118 : vector<8x1xi1> to vector<8x1xi1>
      %128 = vector.broadcast %127 : vector<8x1xi1> to vector<8x128xi1>
      %129 = arith.select %128, %115, %74 : vector<8x128xi1>, vector<8x128xf32>
      %130 = vector.shape_cast %118 : vector<8x1xi1> to vector<8x1xi1>
      %131 = vector.broadcast %130 : vector<8x1xi1> to vector<8x128xi1>
      %132 = arith.select %131, %113, %77 : vector<8x128xi1>, vector<8x128xf32>
      %c2_i32 = arith.constant 2 : i32
      %c8_i32_52 = arith.constant 8 : i32
      %133 = arith.muli %c2_i32, %c8_i32_52 : i32
      %134 = tpu.assume_multiple %133, 8 : i32
      %135 = arith.index_cast %134 : i32 to index
      %c0_53 = arith.constant 0 : index
      %136 = vector.load %arg11[%135, %c0_53] : memref<64x512xf32, #tpu.memory_space<vmem>>, vector<8x512xf32>
      %c0_54 = arith.constant 0 : index
      %c0_55 = arith.constant 0 : index
      %137 = vector.load %arg5[%c0_54, %c0_55] : memref<128x512xf32, #tpu.memory_space<vmem>>, vector<128x512xf32>
      %cst_56 = arith.constant dense<0.000000e+00> : vector<8x512xf32>
      %138 = tpu.matmul %129, %137, %cst_56 {dimension_numbers = #tpu.dot_dimension_numbers<[1], [0], [0], [1], [0, 0, 1, 1], [], []>} : vector<8x128xf32>, vector<128x512xf32>, vector<8x512xf32> -> vector<8x512xf32>
      %139 = arith.addf %136, %138 : vector<8x512xf32>
      %140 = vector.extract_strided_slice %139 {offsets = [0, 0], sizes = [8, 128], strides = [1, 1]} : vector<8x512xf32> to vector<8x128xf32>
      %cst_57 = arith.constant 5.000000e-01 : f32
      %141 = vector.broadcast %cst_57 : f32 to vector<8x128xf32>
      %142 = arith.mulf %141, %140 : vector<8x128xf32>
      %143 = math.tanh %142 : vector<8x128xf32>
      %cst_58 = arith.constant 5.000000e-01 : f32
      %144 = vector.broadcast %cst_58 : f32 to vector<8x128xf32>
      %145 = arith.mulf %144, %143 : vector<8x128xf32>
      %cst_59 = arith.constant 5.000000e-01 : f32
      %146 = vector.broadcast %cst_59 : f32 to vector<8x128xf32>
      %147 = arith.addf %145, %146 : vector<8x128xf32>
      %148 = vector.extract_strided_slice %139 {offsets = [0, 128], sizes = [8, 128], strides = [1, 1]} : vector<8x512xf32> to vector<8x128xf32>
      %cst_60 = arith.constant 5.000000e-01 : f32
      %149 = vector.broadcast %cst_60 : f32 to vector<8x128xf32>
      %150 = arith.mulf %149, %148 : vector<8x128xf32>
      %151 = math.tanh %150 : vector<8x128xf32>
      %cst_61 = arith.constant 5.000000e-01 : f32
      %152 = vector.broadcast %cst_61 : f32 to vector<8x128xf32>
      %153 = arith.mulf %152, %151 : vector<8x128xf32>
      %cst_62 = arith.constant 5.000000e-01 : f32
      %154 = vector.broadcast %cst_62 : f32 to vector<8x128xf32>
      %155 = arith.addf %153, %154 : vector<8x128xf32>
      %156 = vector.extract_strided_slice %139 {offsets = [0, 256], sizes = [8, 128], strides = [1, 1]} : vector<8x512xf32> to vector<8x128xf32>
      %157 = math.tanh %156 : vector<8x128xf32>
      %158 = vector.extract_strided_slice %139 {offsets = [0, 384], sizes = [8, 128], strides = [1, 1]} : vector<8x512xf32> to vector<8x128xf32>
      %cst_63 = arith.constant 5.000000e-01 : f32
      %159 = vector.broadcast %cst_63 : f32 to vector<8x128xf32>
      %160 = arith.mulf %159, %158 : vector<8x128xf32>
      %161 = math.tanh %160 : vector<8x128xf32>
      %cst_64 = arith.constant 5.000000e-01 : f32
      %162 = vector.broadcast %cst_64 : f32 to vector<8x128xf32>
      %163 = arith.mulf %162, %161 : vector<8x128xf32>
      %cst_65 = arith.constant 5.000000e-01 : f32
      %164 = vector.broadcast %cst_65 : f32 to vector<8x128xf32>
      %165 = arith.addf %163, %164 : vector<8x128xf32>
      %166 = arith.mulf %155, %132 : vector<8x128xf32>
      %167 = arith.mulf %147, %157 : vector<8x128xf32>
      %168 = arith.addf %166, %167 : vector<8x128xf32>
      %169 = math.tanh %168 : vector<8x128xf32>
      %170 = arith.mulf %165, %169 : vector<8x128xf32>
      %171 = arith.addi %0, %c2_i32 : i32
      %172 = vector.broadcast %171 : i32 to vector<8x1xi32>
      %173 = arith.cmpi sgt, %20, %172 : vector<8x1xi32>
      %cst_66 = arith.constant 0.000000e+00 : f32
      %174 = vector.shape_cast %173 : vector<8x1xi1> to vector<8x1xi1>
      %175 = vector.broadcast %174 : vector<8x1xi1> to vector<8x128xi1>
      %176 = vector.broadcast %cst_66 : f32 to vector<8x128xf32>
      %177 = arith.select %175, %170, %176 : vector<8x128xi1>, vector<8x128xf32>
      %c0_67 = arith.constant 0 : index
      %178 = arith.index_cast %134 : i32 to index
      %c0_68 = arith.constant 0 : index
      %179 = vector.load %arg8[%c0_67, %178, %c0_68] : memref<1x64x128xf32, #tpu.memory_space<vmem>>, vector<1x8x128xf32>
      %180 = vector.shape_cast %179 : vector<1x8x128xf32> to vector<8x128xf32>
      %181 = vector.shape_cast %177 : vector<8x128xf32> to vector<1x8x128xf32>
      tpu.vector_store %arg8[%c0_67, %178, %c0_68], %181 {strides = array<i32>} : memref<1x64x128xf32, #tpu.memory_space<vmem>>, vector<1x8x128xf32>,
      %182 = vector.shape_cast %173 : vector<8x1xi1> to vector<8x1xi1>
      %183 = vector.broadcast %182 : vector<8x1xi1> to vector<8x128xi1>
      %184 = arith.select %183, %170, %129 : vector<8x128xi1>, vector<8x128xf32>
      %185 = vector.shape_cast %173 : vector<8x1xi1> to vector<8x1xi1>
      %186 = vector.broadcast %185 : vector<8x1xi1> to vector<8x128xi1>
      %187 = arith.select %186, %168, %132 : vector<8x128xi1>, vector<8x128xf32>
      %c3_i32 = arith.constant 3 : i32
      %c8_i32_69 = arith.constant 8 : i32
      %188 = arith.muli %c3_i32, %c8_i32_69 : i32
      %189 = tpu.assume_multiple %188, 8 : i32
      %190 = arith.index_cast %189 : i32 to index
      %c0_70 = arith.constant 0 : index
      %191 = vector.load %arg11[%190, %c0_70] : memref<64x512xf32, #tpu.memory_space<vmem>>, vector<8x512xf32>
      %c0_71 = arith.constant 0 : index
      %c0_72 = arith.constant 0 : index
      %192 = vector.load %arg5[%c0_71, %c0_72] : memref<128x512xf32, #tpu.memory_space<vmem>>, vector<128x512xf32>
      %cst_73 = arith.constant dense<0.000000e+00> : vector<8x512xf32>
      %193 = tpu.matmul %184, %192, %cst_73 {dimension_numbers = #tpu.dot_dimension_numbers<[1], [0], [0], [1], [0, 0, 1, 1], [], []>} : vector<8x128xf32>, vector<128x512xf32>, vector<8x512xf32> -> vector<8x512xf32>
      %194 = arith.addf %191, %193 : vector<8x512xf32>
      %195 = vector.extract_strided_slice %194 {offsets = [0, 0], sizes = [8, 128], strides = [1, 1]} : vector<8x512xf32> to vector<8x128xf32>
      %cst_74 = arith.constant 5.000000e-01 : f32
      %196 = vector.broadcast %cst_74 : f32 to vector<8x128xf32>
      %197 = arith.mulf %196, %195 : vector<8x128xf32>
      %198 = math.tanh %197 : vector<8x128xf32>
      %cst_75 = arith.constant 5.000000e-01 : f32
      %199 = vector.broadcast %cst_75 : f32 to vector<8x128xf32>
      %200 = arith.mulf %199, %198 : vector<8x128xf32>
      %cst_76 = arith.constant 5.000000e-01 : f32
      %201 = vector.broadcast %cst_76 : f32 to vector<8x128xf32>
      %202 = arith.addf %200, %201 : vector<8x128xf32>
      %203 = vector.extract_strided_slice %194 {offsets = [0, 128], sizes = [8, 128], strides = [1, 1]} : vector<8x512xf32> to vector<8x128xf32>
      %cst_77 = arith.constant 5.000000e-01 : f32
      %204 = vector.broadcast %cst_77 : f32 to vector<8x128xf32>
      %205 = arith.mulf %204, %203 : vector<8x128xf32>
      %206 = math.tanh %205 : vector<8x128xf32>
      %cst_78 = arith.constant 5.000000e-01 : f32
      %207 = vector.broadcast %cst_78 : f32 to vector<8x128xf32>
      %208 = arith.mulf %207, %206 : vector<8x128xf32>
      %cst_79 = arith.constant 5.000000e-01 : f32
      %209 = vector.broadcast %cst_79 : f32 to vector<8x128xf32>
      %210 = arith.addf %208, %209 : vector<8x128xf32>
      %211 = vector.extract_strided_slice %194 {offsets = [0, 256], sizes = [8, 128], strides = [1, 1]} : vector<8x512xf32> to vector<8x128xf32>
      %212 = math.tanh %211 : vector<8x128xf32>
      %213 = vector.extract_strided_slice %194 {offsets = [0, 384], sizes = [8, 128], strides = [1, 1]} : vector<8x512xf32> to vector<8x128xf32>
      %cst_80 = arith.constant 5.000000e-01 : f32
      %214 = vector.broadcast %cst_80 : f32 to vector<8x128xf32>
      %215 = arith.mulf %214, %213 : vector<8x128xf32>
      %216 = math.tanh %215 : vector<8x128xf32>
      %cst_81 = arith.constant 5.000000e-01 : f32
      %217 = vector.broadcast %cst_81 : f32 to vector<8x128xf32>
      %218 = arith.mulf %217, %216 : vector<8x128xf32>
      %cst_82 = arith.constant 5.000000e-01 : f32
      %219 = vector.broadcast %cst_82 : f32 to vector<8x128xf32>
      %220 = arith.addf %218, %219 : vector<8x128xf32>
      %221 = arith.mulf %210, %187 : vector<8x128xf32>
      %222 = arith.mulf %202, %212 : vector<8x128xf32>
      %223 = arith.addf %221, %222 : vector<8x128xf32>
      %224 = math.tanh %223 : vector<8x128xf32>
      %225 = arith.mulf %220, %224 : vector<8x128xf32>
      %226 = arith.addi %0, %c3_i32 : i32
      %227 = vector.broadcast %226 : i32 to vector<8x1xi32>
      %228 = arith.cmpi sgt, %20, %227 : vector<8x1xi32>
      %cst_83 = arith.constant 0.000000e+00 : f32
      %229 = vector.shape_cast %228 : vector<8x1xi1> to vector<8x1xi1>
      %230 = vector.broadcast %229 : vector<8x1xi1> to vector<8x128xi1>
      %231 = vector.broadcast %cst_83 : f32 to vector<8x128xf32>
      %232 = arith.select %230, %225, %231 : vector<8x128xi1>, vector<8x128xf32>
      %c0_84 = arith.constant 0 : index
      %233 = arith.index_cast %189 : i32 to index
      %c0_85 = arith.constant 0 : index
      %234 = vector.load %arg8[%c0_84, %233, %c0_85] : memref<1x64x128xf32, #tpu.memory_space<vmem>>, vector<1x8x128xf32>
      %235 = vector.shape_cast %234 : vector<1x8x128xf32> to vector<8x128xf32>
      %236 = vector.shape_cast %232 : vector<8x128xf32> to vector<1x8x128xf32>
      tpu.vector_store %arg8[%c0_84, %233, %c0_85], %236 {strides = array<i32>} : memref<1x64x128xf32, #tpu.memory_space<vmem>>, vector<1x8x128xf32>,
      %237 = vector.shape_cast %228 : vector<8x1xi1> to vector<8x1xi1>
      %238 = vector.broadcast %237 : vector<8x1xi1> to vector<8x128xi1>
      %239 = arith.select %238, %225, %184 : vector<8x128xi1>, vector<8x128xf32>
      %240 = vector.shape_cast %228 : vector<8x1xi1> to vector<8x1xi1>
      %241 = vector.broadcast %240 : vector<8x1xi1> to vector<8x128xi1>
      %242 = arith.select %241, %223, %187 : vector<8x128xi1>, vector<8x128xf32>
      %c4_i32 = arith.constant 4 : i32
      %c8_i32_86 = arith.constant 8 : i32
      %243 = arith.muli %c4_i32, %c8_i32_86 : i32
      %244 = tpu.assume_multiple %243, 8 : i32
      %245 = arith.index_cast %244 : i32 to index
      %c0_87 = arith.constant 0 : index
      %246 = vector.load %arg11[%245, %c0_87] : memref<64x512xf32, #tpu.memory_space<vmem>>, vector<8x512xf32>
      %c0_88 = arith.constant 0 : index
      %c0_89 = arith.constant 0 : index
      %247 = vector.load %arg5[%c0_88, %c0_89] : memref<128x512xf32, #tpu.memory_space<vmem>>, vector<128x512xf32>
      %cst_90 = arith.constant dense<0.000000e+00> : vector<8x512xf32>
      %248 = tpu.matmul %239, %247, %cst_90 {dimension_numbers = #tpu.dot_dimension_numbers<[1], [0], [0], [1], [0, 0, 1, 1], [], []>} : vector<8x128xf32>, vector<128x512xf32>, vector<8x512xf32> -> vector<8x512xf32>
      %249 = arith.addf %246, %248 : vector<8x512xf32>
      %250 = vector.extract_strided_slice %249 {offsets = [0, 0], sizes = [8, 128], strides = [1, 1]} : vector<8x512xf32> to vector<8x128xf32>
      %cst_91 = arith.constant 5.000000e-01 : f32
      %251 = vector.broadcast %cst_91 : f32 to vector<8x128xf32>
      %252 = arith.mulf %251, %250 : vector<8x128xf32>
      %253 = math.tanh %252 : vector<8x128xf32>
      %cst_92 = arith.constant 5.000000e-01 : f32
      %254 = vector.broadcast %cst_92 : f32 to vector<8x128xf32>
      %255 = arith.mulf %254, %253 : vector<8x128xf32>
      %cst_93 = arith.constant 5.000000e-01 : f32
      %256 = vector.broadcast %cst_93 : f32 to vector<8x128xf32>
      %257 = arith.addf %255, %256 : vector<8x128xf32>
      %258 = vector.extract_strided_slice %249 {offsets = [0, 128], sizes = [8, 128], strides = [1, 1]} : vector<8x512xf32> to vector<8x128xf32>
      %cst_94 = arith.constant 5.000000e-01 : f32
      %259 = vector.broadcast %cst_94 : f32 to vector<8x128xf32>
      %260 = arith.mulf %259, %258 : vector<8x128xf32>
      %261 = math.tanh %260 : vector<8x128xf32>
      %cst_95 = arith.constant 5.000000e-01 : f32
      %262 = vector.broadcast %cst_95 : f32 to vector<8x128xf32>
      %263 = arith.mulf %262, %261 : vector<8x128xf32>
      %cst_96 = arith.constant 5.000000e-01 : f32
      %264 = vector.broadcast %cst_96 : f32 to vector<8x128xf32>
      %265 = arith.addf %263, %264 : vector<8x128xf32>
      %266 = vector.extract_strided_slice %249 {offsets = [0, 256], sizes = [8, 128], strides = [1, 1]} : vector<8x512xf32> to vector<8x128xf32>
      %267 = math.tanh %266 : vector<8x128xf32>
      %268 = vector.extract_strided_slice %249 {offsets = [0, 384], sizes = [8, 128], strides = [1, 1]} : vector<8x512xf32> to vector<8x128xf32>
      %cst_97 = arith.constant 5.000000e-01 : f32
      %269 = vector.broadcast %cst_97 : f32 to vector<8x128xf32>
      %270 = arith.mulf %269, %268 : vector<8x128xf32>
      %271 = math.tanh %270 : vector<8x128xf32>
      %cst_98 = arith.constant 5.000000e-01 : f32
      %272 = vector.broadcast %cst_98 : f32 to vector<8x128xf32>
      %273 = arith.mulf %272, %271 : vector<8x128xf32>
      %cst_99 = arith.constant 5.000000e-01 : f32
      %274 = vector.broadcast %cst_99 : f32 to vector<8x128xf32>
      %275 = arith.addf %273, %274 : vector<8x128xf32>
      %276 = arith.mulf %265, %242 : vector<8x128xf32>
      %277 = arith.mulf %257, %267 : vector<8x128xf32>
      %278 = arith.addf %276, %277 : vector<8x128xf32>
      %279 = math.tanh %278 : vector<8x128xf32>
      %280 = arith.mulf %275, %279 : vector<8x128xf32>
      %281 = arith.addi %0, %c4_i32 : i32
      %282 = vector.broadcast %281 : i32 to vector<8x1xi32>
      %283 = arith.cmpi sgt, %20, %282 : vector<8x1xi32>
      %cst_100 = arith.constant 0.000000e+00 : f32
      %284 = vector.shape_cast %283 : vector<8x1xi1> to vector<8x1xi1>
      %285 = vector.broadcast %284 : vector<8x1xi1> to vector<8x128xi1>
      %286 = vector.broadcast %cst_100 : f32 to vector<8x128xf32>
      %287 = arith.select %285, %280, %286 : vector<8x128xi1>, vector<8x128xf32>
      %c0_101 = arith.constant 0 : index
      %288 = arith.index_cast %244 : i32 to index
      %c0_102 = arith.constant 0 : index
      %289 = vector.load %arg8[%c0_101, %288, %c0_102] : memref<1x64x128xf32, #tpu.memory_space<vmem>>, vector<1x8x128xf32>
      %290 = vector.shape_cast %289 : vector<1x8x128xf32> to vector<8x128xf32>
      %291 = vector.shape_cast %287 : vector<8x128xf32> to vector<1x8x128xf32>
      tpu.vector_store %arg8[%c0_101, %288, %c0_102], %291 {strides = array<i32>} : memref<1x64x128xf32, #tpu.memory_space<vmem>>, vector<1x8x128xf32>,
      %292 = vector.shape_cast %283 : vector<8x1xi1> to vector<8x1xi1>
      %293 = vector.broadcast %292 : vector<8x1xi1> to vector<8x128xi1>
      %294 = arith.select %293, %280, %239 : vector<8x128xi1>, vector<8x128xf32>
      %295 = vector.shape_cast %283 : vector<8x1xi1> to vector<8x1xi1>
      %296 = vector.broadcast %295 : vector<8x1xi1> to vector<8x128xi1>
      %297 = arith.select %296, %278, %242 : vector<8x128xi1>, vector<8x128xf32>
      %c5_i32 = arith.constant 5 : i32
      %c8_i32_103 = arith.constant 8 : i32
      %298 = arith.muli %c5_i32, %c8_i32_103 : i32
      %299 = tpu.assume_multiple %298, 8 : i32
      %300 = arith.index_cast %299 : i32 to index
      %c0_104 = arith.constant 0 : index
      %301 = vector.load %arg11[%300, %c0_104] : memref<64x512xf32, #tpu.memory_space<vmem>>, vector<8x512xf32>
      %c0_105 = arith.constant 0 : index
      %c0_106 = arith.constant 0 : index
      %302 = vector.load %arg5[%c0_105, %c0_106] : memref<128x512xf32, #tpu.memory_space<vmem>>, vector<128x512xf32>
      %cst_107 = arith.constant dense<0.000000e+00> : vector<8x512xf32>
      %303 = tpu.matmul %294, %302, %cst_107 {dimension_numbers = #tpu.dot_dimension_numbers<[1], [0], [0], [1], [0, 0, 1, 1], [], []>} : vector<8x128xf32>, vector<128x512xf32>, vector<8x512xf32> -> vector<8x512xf32>
      %304 = arith.addf %301, %303 : vector<8x512xf32>
      %305 = vector.extract_strided_slice %304 {offsets = [0, 0], sizes = [8, 128], strides = [1, 1]} : vector<8x512xf32> to vector<8x128xf32>
      %cst_108 = arith.constant 5.000000e-01 : f32
      %306 = vector.broadcast %cst_108 : f32 to vector<8x128xf32>
      %307 = arith.mulf %306, %305 : vector<8x128xf32>
      %308 = math.tanh %307 : vector<8x128xf32>
      %cst_109 = arith.constant 5.000000e-01 : f32
      %309 = vector.broadcast %cst_109 : f32 to vector<8x128xf32>
      %310 = arith.mulf %309, %308 : vector<8x128xf32>
      %cst_110 = arith.constant 5.000000e-01 : f32
      %311 = vector.broadcast %cst_110 : f32 to vector<8x128xf32>
      %312 = arith.addf %310, %311 : vector<8x128xf32>
      %313 = vector.extract_strided_slice %304 {offsets = [0, 128], sizes = [8, 128], strides = [1, 1]} : vector<8x512xf32> to vector<8x128xf32>
      %cst_111 = arith.constant 5.000000e-01 : f32
      %314 = vector.broadcast %cst_111 : f32 to vector<8x128xf32>
      %315 = arith.mulf %314, %313 : vector<8x128xf32>
      %316 = math.tanh %315 : vector<8x128xf32>
      %cst_112 = arith.constant 5.000000e-01 : f32
      %317 = vector.broadcast %cst_112 : f32 to vector<8x128xf32>
      %318 = arith.mulf %317, %316 : vector<8x128xf32>
      %cst_113 = arith.constant 5.000000e-01 : f32
      %319 = vector.broadcast %cst_113 : f32 to vector<8x128xf32>
      %320 = arith.addf %318, %319 : vector<8x128xf32>
      %321 = vector.extract_strided_slice %304 {offsets = [0, 256], sizes = [8, 128], strides = [1, 1]} : vector<8x512xf32> to vector<8x128xf32>
      %322 = math.tanh %321 : vector<8x128xf32>
      %323 = vector.extract_strided_slice %304 {offsets = [0, 384], sizes = [8, 128], strides = [1, 1]} : vector<8x512xf32> to vector<8x128xf32>
      %cst_114 = arith.constant 5.000000e-01 : f32
      %324 = vector.broadcast %cst_114 : f32 to vector<8x128xf32>
      %325 = arith.mulf %324, %323 : vector<8x128xf32>
      %326 = math.tanh %325 : vector<8x128xf32>
      %cst_115 = arith.constant 5.000000e-01 : f32
      %327 = vector.broadcast %cst_115 : f32 to vector<8x128xf32>
      %328 = arith.mulf %327, %326 : vector<8x128xf32>
      %cst_116 = arith.constant 5.000000e-01 : f32
      %329 = vector.broadcast %cst_116 : f32 to vector<8x128xf32>
      %330 = arith.addf %328, %329 : vector<8x128xf32>
      %331 = arith.mulf %320, %297 : vector<8x128xf32>
      %332 = arith.mulf %312, %322 : vector<8x128xf32>
      %333 = arith.addf %331, %332 : vector<8x128xf32>
      %334 = math.tanh %333 : vector<8x128xf32>
      %335 = arith.mulf %330, %334 : vector<8x128xf32>
      %336 = arith.addi %0, %c5_i32 : i32
      %337 = vector.broadcast %336 : i32 to vector<8x1xi32>
      %338 = arith.cmpi sgt, %20, %337 : vector<8x1xi32>
      %cst_117 = arith.constant 0.000000e+00 : f32
      %339 = vector.shape_cast %338 : vector<8x1xi1> to vector<8x1xi1>
      %340 = vector.broadcast %339 : vector<8x1xi1> to vector<8x128xi1>
      %341 = vector.broadcast %cst_117 : f32 to vector<8x128xf32>
      %342 = arith.select %340, %335, %341 : vector<8x128xi1>, vector<8x128xf32>
      %c0_118 = arith.constant 0 : index
      %343 = arith.index_cast %299 : i32 to index
      %c0_119 = arith.constant 0 : index
      %344 = vector.load %arg8[%c0_118, %343, %c0_119] : memref<1x64x128xf32, #tpu.memory_space<vmem>>, vector<1x8x128xf32>
      %345 = vector.shape_cast %344 : vector<1x8x128xf32> to vector<8x128xf32>
      %346 = vector.shape_cast %342 : vector<8x128xf32> to vector<1x8x128xf32>
      tpu.vector_store %arg8[%c0_118, %343, %c0_119], %346 {strides = array<i32>} : memref<1x64x128xf32, #tpu.memory_space<vmem>>, vector<1x8x128xf32>,
      %347 = vector.shape_cast %338 : vector<8x1xi1> to vector<8x1xi1>
      %348 = vector.broadcast %347 : vector<8x1xi1> to vector<8x128xi1>
      %349 = arith.select %348, %335, %294 : vector<8x128xi1>, vector<8x128xf32>
      %350 = vector.shape_cast %338 : vector<8x1xi1> to vector<8x1xi1>
      %351 = vector.broadcast %350 : vector<8x1xi1> to vector<8x128xi1>
      %352 = arith.select %351, %333, %297 : vector<8x128xi1>, vector<8x128xf32>
      %c6_i32 = arith.constant 6 : i32
      %c8_i32_120 = arith.constant 8 : i32
      %353 = arith.muli %c6_i32, %c8_i32_120 : i32
      %354 = tpu.assume_multiple %353, 8 : i32
      %355 = arith.index_cast %354 : i32 to index
      %c0_121 = arith.constant 0 : index
      %356 = vector.load %arg11[%355, %c0_121] : memref<64x512xf32, #tpu.memory_space<vmem>>, vector<8x512xf32>
      %c0_122 = arith.constant 0 : index
      %c0_123 = arith.constant 0 : index
      %357 = vector.load %arg5[%c0_122, %c0_123] : memref<128x512xf32, #tpu.memory_space<vmem>>, vector<128x512xf32>
      %cst_124 = arith.constant dense<0.000000e+00> : vector<8x512xf32>
      %358 = tpu.matmul %349, %357, %cst_124 {dimension_numbers = #tpu.dot_dimension_numbers<[1], [0], [0], [1], [0, 0, 1, 1], [], []>} : vector<8x128xf32>, vector<128x512xf32>, vector<8x512xf32> -> vector<8x512xf32>
      %359 = arith.addf %356, %358 : vector<8x512xf32>
      %360 = vector.extract_strided_slice %359 {offsets = [0, 0], sizes = [8, 128], strides = [1, 1]} : vector<8x512xf32> to vector<8x128xf32>
      %cst_125 = arith.constant 5.000000e-01 : f32
      %361 = vector.broadcast %cst_125 : f32 to vector<8x128xf32>
      %362 = arith.mulf %361, %360 : vector<8x128xf32>
      %363 = math.tanh %362 : vector<8x128xf32>
      %cst_126 = arith.constant 5.000000e-01 : f32
      %364 = vector.broadcast %cst_126 : f32 to vector<8x128xf32>
      %365 = arith.mulf %364, %363 : vector<8x128xf32>
      %cst_127 = arith.constant 5.000000e-01 : f32
      %366 = vector.broadcast %cst_127 : f32 to vector<8x128xf32>
      %367 = arith.addf %365, %366 : vector<8x128xf32>
      %368 = vector.extract_strided_slice %359 {offsets = [0, 128], sizes = [8, 128], strides = [1, 1]} : vector<8x512xf32> to vector<8x128xf32>
      %cst_128 = arith.constant 5.000000e-01 : f32
      %369 = vector.broadcast %cst_128 : f32 to vector<8x128xf32>
      %370 = arith.mulf %369, %368 : vector<8x128xf32>
      %371 = math.tanh %370 : vector<8x128xf32>
      %cst_129 = arith.constant 5.000000e-01 : f32
      %372 = vector.broadcast %cst_129 : f32 to vector<8x128xf32>
      %373 = arith.mulf %372, %371 : vector<8x128xf32>
      %cst_130 = arith.constant 5.000000e-01 : f32
      %374 = vector.broadcast %cst_130 : f32 to vector<8x128xf32>
      %375 = arith.addf %373, %374 : vector<8x128xf32>
      %376 = vector.extract_strided_slice %359 {offsets = [0, 256], sizes = [8, 128], strides = [1, 1]} : vector<8x512xf32> to vector<8x128xf32>
      %377 = math.tanh %376 : vector<8x128xf32>
      %378 = vector.extract_strided_slice %359 {offsets = [0, 384], sizes = [8, 128], strides = [1, 1]} : vector<8x512xf32> to vector<8x128xf32>
      %cst_131 = arith.constant 5.000000e-01 : f32
      %379 = vector.broadcast %cst_131 : f32 to vector<8x128xf32>
      %380 = arith.mulf %379, %378 : vector<8x128xf32>
      %381 = math.tanh %380 : vector<8x128xf32>
      %cst_132 = arith.constant 5.000000e-01 : f32
      %382 = vector.broadcast %cst_132 : f32 to vector<8x128xf32>
      %383 = arith.mulf %382, %381 : vector<8x128xf32>
      %cst_133 = arith.constant 5.000000e-01 : f32
      %384 = vector.broadcast %cst_133 : f32 to vector<8x128xf32>
      %385 = arith.addf %383, %384 : vector<8x128xf32>
      %386 = arith.mulf %375, %352 : vector<8x128xf32>
      %387 = arith.mulf %367, %377 : vector<8x128xf32>
      %388 = arith.addf %386, %387 : vector<8x128xf32>
      %389 = math.tanh %388 : vector<8x128xf32>
      %390 = arith.mulf %385, %389 : vector<8x128xf32>
      %391 = arith.addi %0, %c6_i32 : i32
      %392 = vector.broadcast %391 : i32 to vector<8x1xi32>
      %393 = arith.cmpi sgt, %20, %392 : vector<8x1xi32>
      %cst_134 = arith.constant 0.000000e+00 : f32
      %394 = vector.shape_cast %393 : vector<8x1xi1> to vector<8x1xi1>
      %395 = vector.broadcast %394 : vector<8x1xi1> to vector<8x128xi1>
      %396 = vector.broadcast %cst_134 : f32 to vector<8x128xf32>
      %397 = arith.select %395, %390, %396 : vector<8x128xi1>, vector<8x128xf32>
      %c0_135 = arith.constant 0 : index
      %398 = arith.index_cast %354 : i32 to index
      %c0_136 = arith.constant 0 : index
      %399 = vector.load %arg8[%c0_135, %398, %c0_136] : memref<1x64x128xf32, #tpu.memory_space<vmem>>, vector<1x8x128xf32>
      %400 = vector.shape_cast %399 : vector<1x8x128xf32> to vector<8x128xf32>
      %401 = vector.shape_cast %397 : vector<8x128xf32> to vector<1x8x128xf32>
      tpu.vector_store %arg8[%c0_135, %398, %c0_136], %401 {strides = array<i32>} : memref<1x64x128xf32, #tpu.memory_space<vmem>>, vector<1x8x128xf32>,
      %402 = vector.shape_cast %393 : vector<8x1xi1> to vector<8x1xi1>
      %403 = vector.broadcast %402 : vector<8x1xi1> to vector<8x128xi1>
      %404 = arith.select %403, %390, %349 : vector<8x128xi1>, vector<8x128xf32>
      %405 = vector.shape_cast %393 : vector<8x1xi1> to vector<8x1xi1>
      %406 = vector.broadcast %405 : vector<8x1xi1> to vector<8x128xi1>
      %407 = arith.select %406, %388, %352 : vector<8x128xi1>, vector<8x128xf32>
      %c7_i32 = arith.constant 7 : i32
      %c8_i32_137 = arith.constant 8 : i32
      %408 = arith.muli %c7_i32, %c8_i32_137 : i32
      %409 = tpu.assume_multiple %408, 8 : i32
      %410 = arith.index_cast %409 : i32 to index
      %c0_138 = arith.constant 0 : index
      %411 = vector.load %arg11[%410, %c0_138] : memref<64x512xf32, #tpu.memory_space<vmem>>, vector<8x512xf32>
      %c0_139 = arith.constant 0 : index
      %c0_140 = arith.constant 0 : index
      %412 = vector.load %arg5[%c0_139, %c0_140] : memref<128x512xf32, #tpu.memory_space<vmem>>, vector<128x512xf32>
      %cst_141 = arith.constant dense<0.000000e+00> : vector<8x512xf32>
      %413 = tpu.matmul %404, %412, %cst_141 {dimension_numbers = #tpu.dot_dimension_numbers<[1], [0], [0], [1], [0, 0, 1, 1], [], []>} : vector<8x128xf32>, vector<128x512xf32>, vector<8x512xf32> -> vector<8x512xf32>
      %414 = arith.addf %411, %413 : vector<8x512xf32>
      %415 = vector.extract_strided_slice %414 {offsets = [0, 0], sizes = [8, 128], strides = [1, 1]} : vector<8x512xf32> to vector<8x128xf32>
      %cst_142 = arith.constant 5.000000e-01 : f32
      %416 = vector.broadcast %cst_142 : f32 to vector<8x128xf32>
      %417 = arith.mulf %416, %415 : vector<8x128xf32>
      %418 = math.tanh %417 : vector<8x128xf32>
      %cst_143 = arith.constant 5.000000e-01 : f32
      %419 = vector.broadcast %cst_143 : f32 to vector<8x128xf32>
      %420 = arith.mulf %419, %418 : vector<8x128xf32>
      %cst_144 = arith.constant 5.000000e-01 : f32
      %421 = vector.broadcast %cst_144 : f32 to vector<8x128xf32>
      %422 = arith.addf %420, %421 : vector<8x128xf32>
      %423 = vector.extract_strided_slice %414 {offsets = [0, 128], sizes = [8, 128], strides = [1, 1]} : vector<8x512xf32> to vector<8x128xf32>
      %cst_145 = arith.constant 5.000000e-01 : f32
      %424 = vector.broadcast %cst_145 : f32 to vector<8x128xf32>
      %425 = arith.mulf %424, %423 : vector<8x128xf32>
      %426 = math.tanh %425 : vector<8x128xf32>
      %cst_146 = arith.constant 5.000000e-01 : f32
      %427 = vector.broadcast %cst_146 : f32 to vector<8x128xf32>
      %428 = arith.mulf %427, %426 : vector<8x128xf32>
      %cst_147 = arith.constant 5.000000e-01 : f32
      %429 = vector.broadcast %cst_147 : f32 to vector<8x128xf32>
      %430 = arith.addf %428, %429 : vector<8x128xf32>
      %431 = vector.extract_strided_slice %414 {offsets = [0, 256], sizes = [8, 128], strides = [1, 1]} : vector<8x512xf32> to vector<8x128xf32>
      %432 = math.tanh %431 : vector<8x128xf32>
      %433 = vector.extract_strided_slice %414 {offsets = [0, 384], sizes = [8, 128], strides = [1, 1]} : vector<8x512xf32> to vector<8x128xf32>
      %cst_148 = arith.constant 5.000000e-01 : f32
      %434 = vector.broadcast %cst_148 : f32 to vector<8x128xf32>
      %435 = arith.mulf %434, %433 : vector<8x128xf32>
      %436 = math.tanh %435 : vector<8x128xf32>
      %cst_149 = arith.constant 5.000000e-01 : f32
      %437 = vector.broadcast %cst_149 : f32 to vector<8x128xf32>
      %438 = arith.mulf %437, %436 : vector<8x128xf32>
      %cst_150 = arith.constant 5.000000e-01 : f32
      %439 = vector.broadcast %cst_150 : f32 to vector<8x128xf32>
      %440 = arith.addf %438, %439 : vector<8x128xf32>
      %441 = arith.mulf %430, %407 : vector<8x128xf32>
      %442 = arith.mulf %422, %432 : vector<8x128xf32>
      %443 = arith.addf %441, %442 : vector<8x128xf32>
      %444 = math.tanh %443 : vector<8x128xf32>
      %445 = arith.mulf %440, %444 : vector<8x128xf32>
      %446 = arith.addi %0, %c7_i32 : i32
      %447 = vector.broadcast %446 : i32 to vector<8x1xi32>
      %448 = arith.cmpi sgt, %20, %447 : vector<8x1xi32>
      %cst_151 = arith.constant 0.000000e+00 : f32
      %449 = vector.shape_cast %448 : vector<8x1xi1> to vector<8x1xi1>
      %450 = vector.broadcast %449 : vector<8x1xi1> to vector<8x128xi1>
      %451 = vector.broadcast %cst_151 : f32 to vector<8x128xf32>
      %452 = arith.select %450, %445, %451 : vector<8x128xi1>, vector<8x128xf32>
      %c0_152 = arith.constant 0 : index
      %453 = arith.index_cast %409 : i32 to index
      %c0_153 = arith.constant 0 : index
      %454 = vector.load %arg8[%c0_152, %453, %c0_153] : memref<1x64x128xf32, #tpu.memory_space<vmem>>, vector<1x8x128xf32>
      %455 = vector.shape_cast %454 : vector<1x8x128xf32> to vector<8x128xf32>
      %456 = vector.shape_cast %452 : vector<8x128xf32> to vector<1x8x128xf32>
      tpu.vector_store %arg8[%c0_152, %453, %c0_153], %456 {strides = array<i32>} : memref<1x64x128xf32, #tpu.memory_space<vmem>>, vector<1x8x128xf32>,
      %457 = vector.shape_cast %448 : vector<8x1xi1> to vector<8x1xi1>
      %458 = vector.broadcast %457 : vector<8x1xi1> to vector<8x128xi1>
      %459 = arith.select %458, %445, %404 : vector<8x128xi1>, vector<8x128xf32>
      %460 = vector.shape_cast %448 : vector<8x1xi1> to vector<8x1xi1>
      %461 = vector.broadcast %460 : vector<8x1xi1> to vector<8x128xi1>
      %462 = arith.select %461, %443, %407 : vector<8x128xi1>, vector<8x128xf32>
      %c8_i32_154 = arith.constant 8 : i32
      %c0_155 = arith.constant 0 : index
      %c0_156 = arith.constant 0 : index
      %463 = vector.load %arg9[%c0_155, %c0_156] : memref<8x128xf32, #tpu.memory_space<vmem>>, vector<8x128xf32>
      tpu.vector_store %arg9[%c0_155, %c0_156], %459 {strides = array<i32>} : memref<8x128xf32, #tpu.memory_space<vmem>>, vector<8x128xf32>,
      %c0_157 = arith.constant 0 : index
      %c0_158 = arith.constant 0 : index
      %464 = vector.load %arg10[%c0_157, %c0_158] : memref<8x128xf32, #tpu.memory_space<vmem>>, vector<8x128xf32>
      tpu.vector_store %arg10[%c0_157, %c0_158], %462 {strides = array<i32>} : memref<8x128xf32, #tpu.memory_space<vmem>>, vector<8x128xf32>,
    } else {
    }
    return
  }
  func.func @transform_0(%arg0: i32, %arg1: i32, %arg2: memref<1xi32, #tpu.memory_space<smem>>) -> (i32, i32, i32) {
    %c0_i32 = arith.constant 0 : i32
    %c0_i32_0 = arith.constant 0 : i32
    return %arg0, %arg1, %c0_i32 : i32, i32, i32
  }
  func.func @transform_1(%arg0: i32, %arg1: i32, %arg2: memref<1xi32, #tpu.memory_space<smem>>) -> (i32, i32) {
    %c0_i32 = arith.constant 0 : i32
    %c0_i32_0 = arith.constant 0 : i32
    %c0_i32_1 = arith.constant 0 : i32
    return %c0_i32, %c0_i32_0 : i32, i32
  }
  func.func @transform_2(%arg0: i32, %arg1: i32, %arg2: memref<1xi32, #tpu.memory_space<smem>>) -> (i32, i32) {
    %c0_i32 = arith.constant 0 : i32
    %c0_i32_0 = arith.constant 0 : i32
    %c0_i32_1 = arith.constant 0 : i32
    return %c0_i32, %c0_i32_0 : i32, i32
  }
  func.func @transform_3(%arg0: i32, %arg1: i32, %arg2: memref<1xi32, #tpu.memory_space<smem>>) -> (i32, i32) {
    %c0_i32 = arith.constant 0 : i32
    %c0_i32_0 = arith.constant 0 : i32
    %c0_i32_1 = arith.constant 0 : i32
    return %c0_i32, %c0_i32_0 : i32, i32
  }
  func.func @transform_4(%arg0: i32, %arg1: i32, %arg2: memref<1xi32, #tpu.memory_space<smem>>) -> (i32, i32) {
    %c0_i32 = arith.constant 0 : i32
    %c0_i32_0 = arith.constant 0 : i32
    return %arg0, %c0_i32 : i32, i32
  }
  func.func @transform_5(%arg0: i32, %arg1: i32, %arg2: memref<1xi32, #tpu.memory_space<smem>>) -> (i32, i32, i32) {
    %c0_i32 = arith.constant 0 : i32
    %c0_i32_0 = arith.constant 0 : i32
    return %arg0, %arg1, %c0_i32 : i32, i32, i32
  }
  func.func @transform_6(%arg0: i32, %arg1: i32, %arg2: memref<1xi32, #tpu.memory_space<smem>>) -> (i32, i32) {
    %c0_i32 = arith.constant 0 : i32
    %c0_i32_0 = arith.constant 0 : i32
    return %arg0, %c0_i32 : i32, i32
  }
  func.func @transform_7(%arg0: i32, %arg1: i32, %arg2: memref<1xi32, #tpu.memory_space<smem>>) -> (i32, i32) {
    %c0_i32 = arith.constant 0 : i32
    %c0_i32_0 = arith.constant 0 : i32
    return %arg0, %c0_i32 : i32, i32
  }
}

</mosaic_0001>

<bundles_post_ra>
// kernel: tpu_custom_call.1
= control target key start
LH: loop header
LB: loop body
LE: loop exit
PB: predicated region body
PF: predicated region fallthrough
CT: control target
= control target key end

     0   :  { %15 = vsyncpa [#allocation6], 0  ;;  %s3700_s0 = inlined_call_operand.<no memory space> [shape: s32[1], index: 0, kind: input, shape index: {}]   ;;  %s3701_s1 = inlined_call_operand.vmem [shape: f32[1,64,16], index: 1, kind: input, shape index: {}]   ;;  %s3702_s2 = inlined_call_operand.vmem [shape: f32[16,512], index: 2, kind: input, shape index: {}]   ;;  %s3703_s3 = inlined_call_operand.hbm [shape: f32[128,512], index: 3, kind: input, shape index: {}]   ;;  %s3704_s4 = inlined_call_operand.vmem [shape: f32[1,512], index: 4, kind: input, shape index: {}]   ;;  %s3705_s5 = inlined_call_operand.vmem [shape: s32[8,1], index: 5, kind: input, shape index: {}]   ;;  %s3706_s6 = inlined_call_operand.hbm [shape: f32[1,64,128], index: 6, kind: output, shape index: {0}]   ;;  %s3707_s7 = inlined_call_operand.hbm [shape: f32[8,128], index: 7, kind: output, shape index: {1}]   ;;  %s3708_s8 = inlined_call_operand.hbm [shape: f32[8,128], index: 8, kind: output, shape index: {2}]  }
   0x1   :  { %16 = vsyncpa [#allocation7], 0 }
   0x2   :  { %17 = vsyncpa [#allocation10], 0  ;;  %s2624_s27 = smov [#allocation5]  }
   0x3   :  { %s27_s28 = sshll.u32 %s2624_s27, 4  ;;  %s28_s28 = int_to_ptr.vmem [resolvable:$true] %s27_s28 }
   0x4   :  { %s2546_s29 = scalar_lea.vmem %s28_s28, 8192  ;;  %p2551_p1 = scmp.lt.s32.totalorder %s28_s28, %s28_s28 }
   0x5   :  { %p2547_p0 = scmp.ne.s32.totalorder %s28_s28, %s2546_s29  ;;  %p2552_p2 = scmp.lt.s32.totalorder %s2546_s29, %s2546_s29 }
   0x7   :  { %p2553_p3 = por %p2552_p2, %p2551_p1 }
   0x9   :  { %p2554_p4 = pnand %p2553_p3, %p2547_p0 }
   0xb   :  { %2557 = shalt.err (!%p2554_p4)
}
   0xc   :  { %s2625_s30 = smov 512   ;;  %s2626_s9 = smov 32  }
   0xd   :  { %33 = dma.hbm_to_vmem [thread:$0]  %s3703_s3, 8192, %s28_s28, [#allocation6], %s2625_s30, %s2625_s30, %s2626_s9  }
   0xe   :  { %2618 = dma.done.wait [#allocation6], 8192  }
   0xf   :  { %2619 = vsyncadd [#allocation6], 4294959104  ;;  %v2627_v0 = vmov 0.0   ;;  %p2425_p5 = scmp.gt.s32.totalorder %s3700_s0, 0 }
  0x10   :  { %46 = vst [vmem:[#allocation9] sm:$0xff] %v2627_v0  ;;  %47 = vst [vmem:[#allocation11] sm:$0xff] %v2627_v0 }
  0x11   :  { %52 = sbr.rel (%p2425_p5) target bundleno = 27 (0x1b), region = 33 }
  0x16   :  { %v2628_v1 = vmov 0.0  }
  0x17   :  { %53 = vst [vmem:[#allocation8] sm:$0xff] %v2628_v1  ;;  %54 = vst [vmem:[#allocation8 + $0x8] sm:$0xff] %v2628_v1 }
  0x18   :  { %55 = vst [vmem:[#allocation8 + $0x10] sm:$0xff] %v2628_v1  ;;  %56 = vst [vmem:[#allocation8 + $0x18] sm:$0xff] %v2628_v1 }
  0x19   :  { %57 = vst [vmem:[#allocation8 + $0x20] sm:$0xff] %v2628_v1  ;;  %58 = vst [vmem:[#allocation8 + $0x28] sm:$0xff] %v2628_v1 }
  0x1a   :  { %59 = vst [vmem:[#allocation8 + $0x30] sm:$0xff] %v2628_v1  ;;  %60 = vst [vmem:[#allocation8 + $0x38] sm:$0xff] %v2628_v1 }
  0x1b PF:  { %p2427_p6 = scmp.le.s32.totalorder %s3700_s0, 0 }
  0x1d   :  { %64 = sbr.rel (%p2427_p6) target bundleno = 1993 (0x7c9), region = 37 }
  0x22   :  { %v78_v2 = vld [vmem:[%s3702_s2 + $0x28] sm:$0xff]  ;;  %v80_v3 = vld [vmem:[%s3702_s2 + $0x38] sm:$0xff]  ;;  %v77_v4 = vld [vmem:[%s3702_s2 + $0x20] sm:$0xff]  ;;  %vm103_vm0 = vcmask 130048   ;;  %v3709_v11 = vmov 0.0  }
  0x23   :  { %156 = vmatprep.subr.mxu0 %v78_v2  ;;  %269 = vmatprep.subr.mxu1 %v80_v3  ;;  %v79_v5 = vld [vmem:[%s3702_s2 + $0x30] sm:$0xff]  ;;  %v74_v6 = vld [vmem:[%s3702_s2 + $0x8] sm:$0xff]  ;;  %v76_v7 = vld [vmem:[%s3702_s2 + $0x18] sm:$0xff] }
  0x24   :  { %157 = vmatpush1.msra.mxu0 %v77_v4  ;;  %270 = vmatpush1.msra.mxu1 %v79_v5  ;;  %v73_v8 = vld [vmem:[%s3702_s2] sm:$0xff]  ;;  %v75_v9 = vld [vmem:[%s3702_s2 + $0x10] sm:$0xff]  ;;  %v2718_v12 = vld [vmem:[#allocation5 + $0x1e8] sm:$0xff] }
  0x25   :  { %158 = vmatprep.subr.mxu0 %v74_v6  ;;  %271 = vmatprep.subr.mxu1 %v76_v7  ;;  %v65_v10 = vld [vmem:[%s3701_s1] sm:$0xff]  ;;  %v2720_v13 = vld [vmem:[#allocation5 + $0x1f8] sm:$0xff]  ;;  %v2725_v15 = vld [vmem:[#allocation5 + $0x1f0] sm:$0xff] }
  0x26   :  { %159 = vmatpush1.msra.mxu0 %v73_v8  ;;  %192 = vmatprep.mubr.f32.mxu0 %v3709_v11  ;;  %v2723_v14 = vld [vmem:[#allocation5 + $0x1e0] sm:$0xff]  ;;  %v2729_v16 = vld [vmem:[#allocation5 + $0x1c8] sm:$0xff]  ;;  %v2731_v17 = vld [vmem:[#allocation5 + $0x1d8] sm:$0xff] }
  0x27   :  { %272 = vmatpush1.msra.mxu1 %v75_v9  ;;  %305 = vmatprep.mubr.f32.mxu1 %v3709_v11  ;;  %v2737_v18 = vld [vmem:[#allocation5 + $0x1c0] sm:$0xff]  ;;  %v2739_v19 = vld [vmem:[#allocation5 + $0x1d0] sm:$0xff]  ;;  %v66_v20 = vld [vmem:[%s3701_s1 + $0x8] sm:$0xff] }
  0x28   :  { %2428 = vmatmul.mubr.msk.f32.vlgmr.msra.gmra.mxu0 %vm103_vm0, %v65_v10  ;;  %2436 = vmatmul.mubr.msk.f32.vlgmr.msra.gmra.mxu1 %vm103_vm0, %v65_v10  ;;  %v2748_v21 = vld [vmem:[#allocation5 + $0x1a8] sm:$0xff]  ;;  %v2750_v22 = vld [vmem:[#allocation5 + $0x1b8] sm:$0xff]  ;;  %v2754_v23 = vld [vmem:[#allocation5 + $0x1a0] sm:$0xff] }
  0x29   :  { %460 = vmatprep.subr.mxu0 %v2718_v12  ;;  %531 = vmatprep.subr.mxu1 %v2720_v13  ;;  %v2756_v24 = vld [vmem:[#allocation5 + $0x1b0] sm:$0xff]  ;;  %v2760_v25 = vld [vmem:[#allocation5 + $0x188] sm:$0xff]  ;;  %v2762_v26 = vld [vmem:[#allocation5 + $0x198] sm:$0xff] }
  0x2a   :  { %461 = vmatpush1.msra.mxu0 %v2723_v14  ;;  %532 = vmatpush1.msra.mxu1 %v2725_v15  ;;  %v2768_v27 = vld [vmem:[#allocation5 + $0x180] sm:$0xff]  ;;  %v2770_v28 = vld [vmem:[#allocation5 + $0x190] sm:$0xff]  ;;  %v2779_v30 = vld [vmem:[#allocation5 + $0x168] sm:$0xff] }
  0x2b   :  { %462 = vmatprep.subr.mxu0 %v2729_v16  ;;  %533 = vmatprep.subr.mxu1 %v2731_v17  ;;  %v67_v29 = vld [vmem:[%s3701_s1 + $0x10] sm:$0xff]  ;;  %v2781_v31 = vld [vmem:[#allocation5 + $0x178] sm:$0xff]  ;;  %v2785_v32 = vld [vmem:[#allocation5 + $0x160] sm:$0xff] }
  0x2c   :  { %198 = vmatprep.mubr.f32.mxu0 %v3709_v11  ;;  %311 = vmatprep.mubr.f32.mxu1 %v3709_v11  ;;  %v2787_v33 = vld [vmem:[#allocation5 + $0x170] sm:$0xff]  ;;  %v2791_v34 = vld [vmem:[#allocation5 + $0x148] sm:$0xff]  ;;  %v2793_v35 = vld [vmem:[#allocation5 + $0x158] sm:$0xff] }
  0x2d   :  { %463 = vmatpush1.msra.mxu0 %v2737_v18  ;;  %534 = vmatpush1.msra.mxu1 %v2739_v19  ;;  %v2799_v36 = vld [vmem:[#allocation5 + $0x140] sm:$0xff]  ;;  %v2801_v37 = vld [vmem:[#allocation5 + $0x150] sm:$0xff]  ;;  %v68_v38 = vld [vmem:[%s3701_s1 + $0x18] sm:$0xff] }
  0x2e   :  { %2429 = vmatmul.mubr.msk.f32.gmra.mxu0 %vm103_vm0, %v66_v20  ;;  %2437 = vmatmul.mubr.msk.f32.gmra.mxu1 %vm103_vm0, %v66_v20  ;;  %v2810_v39 = vld [vmem:[#allocation5 + $0x128] sm:$0xff]  ;;  %v2812_v40 = vld [vmem:[#allocation5 + $0x138] sm:$0xff]  ;;  %v2816_v41 = vld [vmem:[#allocation5 + $0x120] sm:$0xff] }
  0x2f   :  { %464 = vmatprep.subr.mxu0 %v2748_v21  ;;  %535 = vmatprep.subr.mxu1 %v2750_v22  ;;  %v2818_v42 = vld [vmem:[#allocation5 + $0x130] sm:$0xff]  ;;  %v2822_v43 = vld [vmem:[#allocation5 + $0x108] sm:$0xff]  ;;  %v2824_v44 = vld [vmem:[#allocation5 + $0x118] sm:$0xff] }
  0x30   :  { %465 = vmatpush1.msra.mxu0 %v2754_v23  ;;  %536 = vmatpush1.msra.mxu1 %v2756_v24  ;;  %v2830_v45 = vld [vmem:[#allocation5 + $0x100] sm:$0xff]  ;;  %v2832_v46 = vld [vmem:[#allocation5 + $0x110] sm:$0xff]  ;;  %v2841_v48 = vld [vmem:[#allocation5 + $0xe8] sm:$0xff] }
  0x31   :  { %466 = vmatprep.subr.mxu0 %v2760_v25  ;;  %537 = vmatprep.subr.mxu1 %v2762_v26  ;;  %v69_v47 = vld [vmem:[%s3701_s1 + $0x20] sm:$0xff]  ;;  %v2843_v49 = vld [vmem:[#allocation5 + $0xf8] sm:$0xff]  ;;  %v2849_v51 = vld [vmem:[#allocation5 + $0xf0] sm:$0xff] }
  0x32   :  { %204 = vmatprep.mubr.f32.mxu0 %v3709_v11  ;;  %317 = vmatprep.mubr.f32.mxu1 %v3709_v11  ;;  %v2847_v50 = vld [vmem:[#allocation5 + $0xe0] sm:$0xff]  ;;  %v2853_v52 = vld [vmem:[#allocation5 + $0xc8] sm:$0xff]  ;;  %v2855_v53 = vld [vmem:[#allocation5 + $0xd8] sm:$0xff] }
  0x33   :  { %467 = vmatpush1.msra.mxu0 %v2768_v27  ;;  %538 = vmatpush1.msra.mxu1 %v2770_v28  ;;  %v2861_v54 = vld [vmem:[#allocation5 + $0xc0] sm:$0xff]  ;;  %v2863_v55 = vld [vmem:[#allocation5 + $0xd0] sm:$0xff]  ;;  %v70_v56 = vld [vmem:[%s3701_s1 + $0x28] sm:$0xff] }
  0x34   :  { %2430 = vmatmul.mubr.msk.f32.gmra.mxu0 %vm103_vm0, %v67_v29  ;;  %2438 = vmatmul.mubr.msk.f32.gmra.mxu1 %vm103_vm0, %v67_v29  ;;  %v2872_v57 = vld [vmem:[#allocation5 + $0xa8] sm:$0xff]  ;;  %v2874_v58 = vld [vmem:[#allocation5 + $0xb8] sm:$0xff]  ;;  %v2878_v59 = vld [vmem:[#allocation5 + $0xa0] sm:$0xff] }
  0x35   :  { %468 = vmatprep.subr.mxu0 %v2779_v30  ;;  %539 = vmatprep.subr.mxu1 %v2781_v31  ;;  %v2880_v60 = vld [vmem:[#allocation5 + $0xb0] sm:$0xff]  ;;  %v2884_v61 = vld [vmem:[#allocation5 + $0x88] sm:$0xff]  ;;  %v2886_v62 = vld [vmem:[#allocation5 + $0x98] sm:$0xff] }
  0x36   :  { %469 = vmatpush1.msra.mxu0 %v2785_v32  ;;  %540 = vmatpush1.msra.mxu1 %v2787_v33  ;;  %3790 = vst [vmem:[#allocation15_spill] sm:$0xff] %v2880_v60  ;;  %3791 = vst [vmem:[#allocation16_spill] sm:$0xff] %v2884_v61  ;;  %v2892_v63 = vld [vmem:[#allocation5 + $0x80] sm:$0xff]  ;;  %v2894_v0 = vld [vmem:[#allocation5 + $0x90] sm:$0xff] }
  0x37   :  { %470 = vmatprep.subr.mxu0 %v2791_v34  ;;  %541 = vmatprep.subr.mxu1 %v2793_v35  ;;  %3792 = vst [vmem:[#allocation17_spill] sm:$0xff] %v2886_v62  ;;  %3793 = vst [vmem:[#allocation18_spill] sm:$0xff] %v2892_v63  ;;  %v71_v1 = vld [vmem:[%s3701_s1 + $0x30] sm:$0xff]  ;;  %v2903_v2 = vld [vmem:[#allocation5 + $0x68] sm:$0xff] }
  0x38   :  { %210 = vmatprep.mubr.f32.mxu0 %v3709_v11  ;;  %323 = vmatprep.mubr.f32.mxu1 %v3709_v11  ;;  %3794 = vst [vmem:[#allocation19_spill] sm:$0xff] %v2894_v0  ;;  %3795 = vst [vmem:[#allocation20_spill] sm:$0xff] %v2903_v2  ;;  %v2905_v3 = vld [vmem:[#allocation5 + $0x78] sm:$0xff]  ;;  %v2909_v4 = vld [vmem:[#allocation5 + $0x60] sm:$0xff] }
  0x39   :  { %471 = vmatpush1.msra.mxu0 %v2799_v36  ;;  %542 = vmatpush1.msra.mxu1 %v2801_v37  ;;  %3796 = vst [vmem:[#allocation21_spill] sm:$0xff] %v2905_v3  ;;  %3797 = vst [vmem:[#allocation22_spill] sm:$0xff] %v2909_v4  ;;  %v2911_v5 = vld [vmem:[#allocation5 + $0x70] sm:$0xff]  ;;  %v2915_v6 = vld [vmem:[#allocation5 + $0x48] sm:$0xff] }
  0x3a   :  { %2431 = vmatmul.mubr.msk.f32.gmra.mxu0 %vm103_vm0, %v68_v38  ;;  %2439 = vmatmul.mubr.msk.f32.gmra.mxu1 %vm103_vm0, %v68_v38  ;;  %3798 = vst [vmem:[#allocation23_spill] sm:$0xff] %v2911_v5  ;;  %3799 = vst [vmem:[#allocation24_spill] sm:$0xff] %v2915_v6  ;;  %v2917_v7 = vld [vmem:[#allocation5 + $0x58] sm:$0xff]  ;;  %v2923_v8 = vld [vmem:[#allocation5 + $0x40] sm:$0xff] }
  0x3b   :  { %472 = vmatprep.subr.mxu0 %v2810_v39  ;;  %543 = vmatprep.subr.mxu1 %v2812_v40  ;;  %3800 = vst [vmem:[#allocation25_spill] sm:$0xff] %v2917_v7  ;;  %3801 = vst [vmem:[#allocation26_spill] sm:$0xff] %v2923_v8  ;;  %v2925_v9 = vld [vmem:[#allocation5 + $0x50] sm:$0xff]  ;;  %v72_v10 = vld [vmem:[%s3701_s1 + $0x38] sm:$0xff] }
  0x3c   :  { %473 = vmatpush1.msra.mxu0 %v2816_v41  ;;  %544 = vmatpush1.msra.mxu1 %v2818_v42  ;;  %3802 = vst [vmem:[#allocation27_spill] sm:$0xff] %v2925_v9  ;;  %v2934_v20 = vld [vmem:[#allocation5 + $0x28] sm:$0xff]  ;;  %v2936_v29 = vld [vmem:[#allocation5 + $0x38] sm:$0xff]  ;;  %v2940_v38 = vld [vmem:[#allocation5 + $0x20] sm:$0xff] }
  0x3d   :  { %474 = vmatprep.subr.mxu0 %v2822_v43  ;;  %545 = vmatprep.subr.mxu1 %v2824_v44  ;;  %3803 = vst [vmem:[#allocation28_spill] sm:$0xff] %v2934_v20  ;;  %3804 = vst [vmem:[#allocation29_spill] sm:$0xff] %v2936_v29 }
  0x3e   :  { %216 = vmatprep.mubr.f32.mxu0 %v3709_v11  ;;  %329 = vmatprep.mubr.f32.mxu1 %v3709_v11  ;;  %3805 = vst [vmem:[#allocation30_spill] sm:$0xff] %v2940_v38 }
  0x3f   :  { %475 = vmatpush1.msra.mxu0 %v2830_v45  ;;  %546 = vmatpush1.msra.mxu1 %v2832_v46 }
  0x40   :  { %2432 = vmatmul.mubr.msk.f32.gmra.mxu0 %vm103_vm0, %v69_v47  ;;  %2440 = vmatmul.mubr.msk.f32.gmra.mxu1 %vm103_vm0, %v69_v47  ;;  %v2942_v47 = vld [vmem:[#allocation5 + $0x30] sm:$0xff] }
  0x41   :  { %476 = vmatprep.subr.mxu0 %v2841_v48  ;;  %547 = vmatprep.subr.mxu1 %v2843_v49  ;;  %3806 = vst [vmem:[#allocation31_spill] sm:$0xff] %v2942_v47 }
  0x42   :  { %477 = vmatpush1.msra.mxu0 %v2847_v50  ;;  %548 = vmatpush1.msra.mxu1 %v2849_v51 }
  0x43   :  { %478 = vmatprep.subr.mxu0 %v2853_v52  ;;  %549 = vmatprep.subr.mxu1 %v2855_v53 }
  0x44   :  { %222 = vmatprep.mubr.f32.mxu0 %v3709_v11  ;;  %335 = vmatprep.mubr.f32.mxu1 %v3709_v11 }
  0x45   :  { %479 = vmatpush1.msra.mxu0 %v2861_v54  ;;  %550 = vmatpush1.msra.mxu1 %v2863_v55 }
  0x46   :  { %2433 = vmatmul.mubr.msk.f32.gmra.mxu0 %vm103_vm0, %v70_v56  ;;  %2441 = vmatmul.mubr.msk.f32.gmra.mxu1 %vm103_vm0, %v70_v56  ;;  %v2947_v56 = vld [vmem:[%s3705_s5] sm:$0xff] }
  0x47   :  { %480 = vmatprep.subr.mxu0 %v2872_v57  ;;  %551 = vmatprep.subr.mxu1 %v2874_v58  ;;  %3807 = vst [vmem:[#allocation32_spill] sm:$0xff] %v2947_v56  ;;  %vm625_vm1 = vcmp.gt.s32.totalorder %v2947_v56, 0  ;;  %vm872_vm2 = vcmp.gt.s32.totalorder %v2947_v56, 1  ;;  %vm1616_vm3 = vcmp.gt.s32.totalorder %v2947_v56, 4  ;;  %vm2112_vm4 = vcmp.gt.s32.totalorder %v2947_v56, 6  ;;  %v3816_v56 = vld [vmem:[#allocation30_spill] sm:$0xff] }
  0x48   :  { %481 = vmatpush1.msra.mxu0 %v2878_v59  ;;  %552 = vmatpush1.msra.mxu1 %v2880_v60 }
  0x49   :  { %482 = vmatprep.subr.mxu0 %v2884_v61  ;;  %553 = vmatprep.subr.mxu1 %v2886_v62 }
  0x4a   :  { %228 = vmatprep.mubr.f32.mxu0 %v3709_v11  ;;  %341 = vmatprep.mubr.f32.mxu1 %v3709_v11 }
  0x4b   :  { %483 = vmatpush1.msra.mxu0 %v2892_v63  ;;  %554 = vmatpush1.msra.mxu1 %v2894_v0 }
  0x4c   :  { %2434 = vmatmul.mubr.msk.f32.gmra.mxu0 %vm103_vm0, %v71_v1  ;;  %2442 = vmatmul.mubr.msk.f32.gmra.mxu1 %vm103_vm0, %v71_v1  ;;  %v2951_v1 = vld [vmem:[#allocation5 + $0x8] sm:$0xff] }
  0x4d   :  { %484 = vmatprep.subr.mxu0 %v2903_v2  ;;  %555 = vmatprep.subr.mxu1 %v2905_v3  ;;  %3808 = vst [vmem:[#allocation33_spill] sm:$0xff] %v2951_v1 }
  0x4e   :  { %485 = vmatpush1.msra.mxu0 %v2909_v4  ;;  %556 = vmatpush1.msra.mxu1 %v2911_v5 }
  0x4f   :  { %486 = vmatprep.subr.mxu0 %v2915_v6  ;;  %557 = vmatprep.subr.mxu1 %v2917_v7 }
  0x50   :  { %234 = vmatprep.mubr.f32.mxu0 %v3709_v11  ;;  %347 = vmatprep.mubr.f32.mxu1 %v3709_v11  ;;  %v2953_v11 = vld [vmem:[#allocation5 + $0x18] sm:$0xff] }
  0x51   :  { %487 = vmatpush1.msra.mxu0 %v2923_v8  ;;  %558 = vmatpush1.msra.mxu1 %v2925_v9  ;;  %3809 = vst [vmem:[#allocation34_spill] sm:$0xff] %v2953_v11  ;;  %v2957_v9 = vld [vmem:[#allocation5] sm:$0xff]  ;;  %v2961_v8 = vld [vmem:[#allocation5 + $0x10] sm:$0xff] }
  0x52   :  { %2435 = vmatmul.mubr.msk.f32.gmra.mxu0 %vm103_vm0, %v72_v10  ;;  %2443 = vmatmul.mubr.msk.f32.gmra.mxu1 %vm103_vm0, %v72_v10  ;;  %3810 = vst [vmem:[#allocation35_spill] sm:$0xff] %v2957_v9  ;;  %3811 = vst [vmem:[#allocation36_spill] sm:$0xff] %v2961_v8  ;;  %v2966_v10 = vld [vmem:[#allocation9] sm:$0xff] }
  0x53   :  { %488 = vmatprep.subr.mxu0 %v2934_v20  ;;  %559 = vmatprep.subr.mxu1 %v2936_v29  ;;  %v3812_v20 = vmov 0.0  }
  0x54   :  { %489 = vmatpush1.msra.mxu0 %v2940_v38  ;;  %560 = vmatpush1.msra.mxu1 %v2942_v47  ;;  %v3723_v38 = vmov 0  }
  0x55   :  { %490 = vmatprep.subr.mxu0 %v2951_v1  ;;  %561 = vmatprep.subr.mxu1 %v2953_v11  ;;  %v626_v47 = vsel %vm625_vm1, 1, %v3723_v38 }
  0x56   :  { %491 = vmatpush1.msra.mxu0 %v2957_v9  ;;  %524 = vmatprep.mubr.f32.mxu0 %v3812_v20 }
  0x57   :  { %562 = vmatpush1.msra.mxu1 %v2961_v8  ;;  %595 = vmatprep.mubr.f32.mxu1 %v3812_v20  ;;  %v873_v8 = vsel %vm872_vm2, 1, %v3723_v38 }
  0x58   :  { %525 = vmatmul.mubr.f32.vlgmr.msra.gmra.mxu0 %v2966_v10  ;;  %596 = vmatmul.mubr.f32.vlgmr.msra.gmra.mxu1 %v2966_v10 }
  0x59   :  { %2456 = vset.pattern.permute.xlu0 %v3723_v38  ;;  %706 = vmatprep.subr.mxu0 %v2718_v12 }
  0x5a   :  { %628 = vperm.xlu0 %2456, %v626_v47   ;;  %777 = vmatprep.subr.mxu1 %v2720_v13  ;;  %v1617_v47 = vsel %vm1616_vm3, 1, %v3723_v38 }
  0x5b   :  { %707 = vmatpush1.msra.mxu0 %v2723_v14  ;;  %778 = vmatpush1.msra.mxu1 %v2725_v15 }
  0x5c   :  { %708 = vmatprep.subr.mxu0 %v2729_v16  ;;  %779 = vmatprep.subr.mxu1 %v2731_v17 }
  0x5d   :  { %709 = vmatpush1.msra.mxu0 %v2737_v18  ;;  %780 = vmatpush1.msra.mxu1 %v2739_v19 }
  0x5e   :  { %875 = vperm.xlu0 %2456, %v873_v8   ;;  %710 = vmatprep.subr.mxu0 %v2748_v21  ;;  %v2113_v8 = vsel %vm2112_vm4, 1, %v3723_v38  ;;  %v3815_v38 = vld [vmem:[#allocation28_spill] sm:$0xff] }
  0x5f   :  { %781 = vmatprep.subr.mxu1 %v2750_v22  ;;  %711 = vmatpush1.msra.mxu0 %v2754_v23 }
  0x60   :  { %782 = vmatpush1.msra.mxu1 %v2756_v24  ;;  %712 = vmatprep.subr.mxu0 %v2760_v25 }
  0x61   :  { %783 = vmatprep.subr.mxu1 %v2762_v26  ;;  %713 = vmatpush1.msra.mxu0 %v2768_v27 }
  0x62   :  { %1619 = vperm.xlu0 %2456, %v1617_v47   ;;  %784 = vmatpush1.msra.mxu1 %v2770_v28  ;;  %v3813_v47 = vld [vmem:[#allocation26_spill] sm:$0xff] }
  0x63   :  { %714 = vmatprep.subr.mxu0 %v2779_v30  ;;  %785 = vmatprep.subr.mxu1 %v2781_v31 }
  0x64   :  { %715 = vmatpush1.msra.mxu0 %v2785_v32  ;;  %786 = vmatpush1.msra.mxu1 %v2787_v33 }
  0x65   :  { %716 = vmatprep.subr.mxu0 %v2791_v34  ;;  %787 = vmatprep.subr.mxu1 %v2793_v35 }
  0x66   :  { %2115 = vperm.xlu0 %2456, %v2113_v8   ;;  %717 = vmatpush1.msra.mxu0 %v2799_v36  ;;  %v3814_v8 = vld [vmem:[#allocation27_spill] sm:$0xff] }
  0x67   :  { %788 = vmatpush1.msra.mxu1 %v2801_v37  ;;  %718 = vmatprep.subr.mxu0 %v2810_v39 }
  0x68   :  { %789 = vmatprep.subr.mxu1 %v2812_v40  ;;  %719 = vmatpush1.msra.mxu0 %v2816_v41 }
  0x69   :  { %790 = vmatpush1.msra.mxu1 %v2818_v42  ;;  %720 = vmatprep.subr.mxu0 %v2822_v43 }
  0x6a   :  { %791 = vmatprep.subr.mxu1 %v2824_v44  ;;  %721 = vmatpush1.msra.mxu0 %v2830_v45 }
  0x6b   :  { %792 = vmatpush1.msra.mxu1 %v2832_v46  ;;  %722 = vmatprep.subr.mxu0 %v2841_v48 }
  0x6c   :  { %793 = vmatprep.subr.mxu1 %v2843_v49  ;;  %723 = vmatpush1.msra.mxu0 %v2847_v50 }
  0x6d   :  { %794 = vmatpush1.msra.mxu1 %v2849_v51  ;;  %724 = vmatprep.subr.mxu0 %v2853_v52 }
  0x6e   :  { %795 = vmatprep.subr.mxu1 %v2855_v53  ;;  %725 = vmatpush1.msra.mxu0 %v2861_v54 }
  0x6f   :  { %796 = vmatpush1.msra.mxu1 %v2863_v55  ;;  %726 = vmatprep.subr.mxu0 %v2872_v57 }
  0x70   :  { %797 = vmatprep.subr.mxu1 %v2874_v58  ;;  %727 = vmatpush1.msra.mxu0 %v2878_v59 }
  0x71   :  { %798 = vmatpush1.msra.mxu1 %v2880_v60  ;;  %728 = vmatprep.subr.mxu0 %v2884_v61 }
  0x72   :  { %799 = vmatprep.subr.mxu1 %v2886_v62  ;;  %729 = vmatpush1.msra.mxu0 %v2892_v63 }
  0x73   :  { %800 = vmatpush1.msra.mxu1 %v2894_v0  ;;  %730 = vmatprep.subr.mxu0 %v2903_v2  ;;  %v3817_v2 = vld [vmem:[#allocation31_spill] sm:$0xff] }
  0x74   :  { %801 = vmatprep.subr.mxu1 %v2905_v3  ;;  %731 = vmatpush1.msra.mxu0 %v2909_v4 }
  0x75   :  { %802 = vmatpush1.msra.mxu1 %v2911_v5  ;;  %732 = vmatprep.subr.mxu0 %v2915_v6 }
  0x76   :  { %803 = vmatprep.subr.mxu1 %v2917_v7  ;;  %733 = vmatpush1.msra.mxu0 %v3813_v47  ;;  %v3818_v7 = vld [vmem:[#allocation36_spill] sm:$0xff] }
  0x77   :  { %804 = vmatpush1.msra.mxu1 %v3814_v8  ;;  %734 = vmatprep.subr.mxu0 %v3815_v38 }
  0x78   :  { %805 = vmatprep.subr.mxu1 %v2936_v29  ;;  %735 = vmatpush1.msra.mxu0 %v3816_v56  ;;  %v3819_v29 = vmov 0   ;;  %v83_v56 = vlaneseq }
  0x79   :  { %806 = vmatpush1.msra.mxu1 %v3817_v2  ;;  %736 = vmatprep.subr.mxu0 %v2951_v1 }
  0x7a   :  { %807 = vmatprep.subr.mxu1 %v2953_v11  ;;  %737 = vmatpush1.msra.mxu0 %v2957_v9  ;;  %v84_v2 = vshrl.u32 %v83_v56, 7 }
  0x7b   :  { %770 = vmatprep.mubr.f32.mxu0 %v3812_v20  ;;  %808 = vmatpush1.msra.mxu1 %v3818_v7  ;;  %v81_v7 = vld [vmem:[%s3704_s4] sm:$0xf] }
  0x7c   :  { %841 = vmatprep.mubr.f32.mxu1 %v3812_v20  ;;  %954 = vmatprep.subr.mxu0 %v2718_v12  ;;  %v85_v11 = vsub.s32 0, %v84_v2  ;;  %v93_v9 = vsub.s32 2, %v84_v2  ;;  %v89_v12 = vsub.s32 1, %v84_v2 }
  0x7d   :  { %1025 = vmatprep.subr.mxu1 %v2720_v13  ;;  %2457 = vset.pattern.permute.xlu1 %v3819_v29  ;;  %v97_v13 = vsub.s32 3, %v84_v2 }
  0x7e   :  { %v86_v47 = vrot.slane %v81_v7, %v85_v11  ;;  %v3062_v29 = vrot.slane %v81_v7, %v93_v9  ;;  %v90_v5 = vrot.slane %v81_v7, %v89_v12 }
  0x7f   :  { %v3064_v4 = vrot.slane %v81_v7, %v97_v13 }
  0xe8   :  { %v3051_v38 = vpop.f32.mrf.mxu0  ;;  %v3053_v1 = vpop.f32.mrf.mxu1 }
  0xea   :  { %v3058_v8 = vpop.f32.mrf.mxu0  ;;  %v3060_v20 = vpop.f32.mrf.mxu1 }
  0xee   :  { %v200_v56 = vpop.f32.mrf.mxu0  ;;  %v313_v6 = vpop.f32.mrf.mxu1 }
  0xef   :  { %v3066_v3 = vadd.f32 %v200_v56, %v86_v47  ;;  %v3069_v0 = vadd.f32 %v313_v6, %v3062_v29 }
  0xf0   :  { %v202_v63 = vpop.f32.mrf.mxu0  ;;  %v315_v62 = vpop.f32.mrf.mxu1 }
  0xf1   :  { %3820 = vst [vmem:[#allocation37_spill] sm:$0xff] %v3066_v3  ;;  %3821 = vst [vmem:[#allocation38_spill] sm:$0xff] %v3069_v0  ;;  %v3071_v61 = vadd.f32 %v202_v63, %v90_v5  ;;  %v3074_v60 = vadd.f32 %v315_v62, %v3064_v4 }
  0xf3   :  { %3822 = vst [vmem:[#allocation39_spill] sm:$0xff] %v3071_v61  ;;  %3823 = vst [vmem:[#allocation40_spill] sm:$0xff] %v3074_v60 }
  0xf4   :  { %v206_v11 = vpop.f32.mrf.mxu0  ;;  %v319_v2 = vpop.f32.mrf.mxu1 }
  0xf5   :  { %v3076_v9 = vadd.f32 %v206_v11, %v86_v47  ;;  %v3079_v12 = vadd.f32 %v319_v2, %v3062_v29 }
  0xf6   :  { %v208_v7 = vpop.f32.mrf.mxu0  ;;  %v321_v13 = vpop.f32.mrf.mxu1 }
  0xf7   :  { %3824 = vst [vmem:[#allocation41_spill] sm:$0xff] %v3076_v9  ;;  %3825 = vst [vmem:[#allocation42_spill] sm:$0xff] %v3079_v12  ;;  %v3081_v56 = vadd.f32 %v208_v7, %v90_v5  ;;  %v3084_v6 = vadd.f32 %v321_v13, %v3064_v4 }
  0xf9   :  { %3826 = vst [vmem:[#allocation43_spill] sm:$0xff] %v3081_v56  ;;  %3827 = vst [vmem:[#allocation44_spill] sm:$0xff] %v3084_v6 }
  0xfa   :  { %v212_v0 = vpop.f32.mrf.mxu0  ;;  %v325_v63 = vpop.f32.mrf.mxu1 }
  0xfb   :  { %v3086_v61 = vadd.f32 %v212_v0, %v86_v47  ;;  %v3089_v62 = vadd.f32 %v325_v63, %v3062_v29 }
  0xfc   :  { %v214_v60 = vpop.f32.mrf.mxu0  ;;  %v327_v11 = vpop.f32.mrf.mxu1 }
  0xfd   :  { %3828 = vst [vmem:[#allocation45_spill] sm:$0xff] %v3086_v61  ;;  %3829 = vst [vmem:[#allocation46_spill] sm:$0xff] %v3089_v62  ;;  %v3091_v9 = vadd.f32 %v214_v60, %v90_v5  ;;  %v3094_v2 = vadd.f32 %v327_v11, %v3064_v4 }
  0xff   :  { %3830 = vst [vmem:[#allocation47_spill] sm:$0xff] %v3091_v9  ;;  %3831 = vst [vmem:[#allocation48_spill] sm:$0xff] %v3094_v2 }
 0x100   :  { %v218_v12 = vpop.f32.mrf.mxu0  ;;  %v331_v7 = vpop.f32.mrf.mxu1 }
 0x101   :  { %v3096_v56 = vadd.f32 %v218_v12, %v86_v47  ;;  %v3099_v13 = vadd.f32 %v331_v7, %v3062_v29 }
 0x102   :  { %v220_v6 = vpop.f32.mrf.mxu0  ;;  %v333_v0 = vpop.f32.mrf.mxu1 }
 0x103   :  { %3832 = vst [vmem:[#allocation49_spill] sm:$0xff] %v3096_v56  ;;  %3833 = vst [vmem:[#allocation50_spill] sm:$0xff] %v3099_v13  ;;  %v3101_v61 = vadd.f32 %v220_v6, %v90_v5  ;;  %v3104_v63 = vadd.f32 %v333_v0, %v3064_v4 }
 0x105   :  { %3834 = vst [vmem:[#allocation51_spill] sm:$0xff] %v3101_v61  ;;  %3835 = vst [vmem:[#allocation52_spill] sm:$0xff] %v3104_v63 }
 0x106   :  { %v224_v62 = vpop.f32.mrf.mxu0  ;;  %v337_v60 = vpop.f32.mrf.mxu1 }
 0x107   :  { %v3106_v9 = vadd.f32 %v224_v62, %v86_v47  ;;  %v3109_v11 = vadd.f32 %v337_v60, %v3062_v29 }
 0x108   :  { %v226_v2 = vpop.f32.mrf.mxu0  ;;  %v339_v12 = vpop.f32.mrf.mxu1 }
 0x109   :  { %3836 = vst [vmem:[#allocation53_spill] sm:$0xff] %v3106_v9  ;;  %3837 = vst [vmem:[#allocation54_spill] sm:$0xff] %v3109_v11  ;;  %v3111_v56 = vadd.f32 %v226_v2, %v90_v5  ;;  %v3114_v7 = vadd.f32 %v339_v12, %v3064_v4 }
 0x10b   :  { %3838 = vst [vmem:[#allocation55_spill] sm:$0xff] %v3111_v56  ;;  %3839 = vst [vmem:[#allocation56_spill] sm:$0xff] %v3114_v7 }
 0x10c   :  { %v230_v13 = vpop.f32.mrf.mxu0  ;;  %v343_v6 = vpop.f32.mrf.mxu1 }
 0x10d   :  { %v3116_v61 = vadd.f32 %v230_v13, %v86_v47  ;;  %v3119_v0 = vadd.f32 %v343_v6, %v3062_v29 }
 0x10e   :  { %v232_v63 = vpop.f32.mrf.mxu0  ;;  %v345_v62 = vpop.f32.mrf.mxu1 }
 0x10f   :  { %3840 = vst [vmem:[#allocation57_spill] sm:$0xff] %v3116_v61  ;;  %3841 = vst [vmem:[#allocation58_spill] sm:$0xff] %v3119_v0  ;;  %v3121_v9 = vadd.f32 %v232_v63, %v90_v5  ;;  %v3124_v60 = vadd.f32 %v345_v62, %v3064_v4  ;;  %v195_v63 = vadd.f32 %v3051_v38, %v86_v47 }
 0x110   :  { %v197_v62 = vadd.f32 %v3058_v8, %v90_v5 }
 0x111   :  { %3842 = vst [vmem:[#allocation59_spill] sm:$0xff] %v3121_v9  ;;  %3843 = vst [vmem:[#allocation60_spill] sm:$0xff] %v3124_v60 }
 0x112   :  { %v236_v11 = vpop.f32.mrf.mxu0  ;;  %v349_v2 = vpop.f32.mrf.mxu1 }
 0x113   :  { %v3126_v56 = vadd.f32 %v236_v11, %v86_v47  ;;  %v3129_v12 = vadd.f32 %v349_v2, %v3062_v29  ;;  %v308_v2 = vadd.f32 %v3053_v1, %v3062_v29  ;;  %v629_v29 = vpop.permute.xlu0 %628 }
 0x114   :  { %v238_v7 = vpop.f32.mrf.mxu0  ;;  %v351_v13 = vpop.f32.mrf.mxu1  ;;  %vm630_vm5 = vcmp.eq.s32.totalorder %v629_v29, 1 }
 0x115   :  { %3844 = vst [vmem:[#allocation61_spill] sm:$0xff] %v3126_v56  ;;  %3845 = vst [vmem:[#allocation62_spill] sm:$0xff] %v3129_v12  ;;  %v3131_v61 = vadd.f32 %v238_v7, %v90_v5  ;;  %v3134_v6 = vadd.f32 %v351_v13, %v3064_v4  ;;  %v310_v13 = vadd.f32 %v3060_v20, %v3064_v4 }
 0x117   :  { %3846 = vst [vmem:[#allocation63_spill] sm:$0xff] %v3131_v61  ;;  %3847 = vst [vmem:[#allocation64_spill] sm:$0xff] %v3134_v6  ;;  %v3416_v6 = vld [vmem:[#allocation5 + $0x8] sm:$0xff] }
 0x118   :  { %v526_v0 = vpop.f32.mrf.mxu0  ;;  %v597_v56 = vpop.f32.mrf.mxu1 }
 0x119   :  { %v602_v60 = vadd.f32 %v526_v0, %v195_v63  ;;  %v604_v7 = vadd.f32 %v597_v56, %v308_v2  ;;  %v388_v63 = vld [vmem:[#allocation11] sm:$0xff] }
 0x11a   :  { %v528_v9 = vpop.f32.mrf.mxu0  ;;  %v599_v61 = vpop.f32.mrf.mxu1 }
 0x11b   :  { %v606_v3 = vmul.f32 0.5, %v602_v60  ;;  %v603_v11 = vadd.f32 %v528_v9, %v197_v62  ;;  %v605_v38 = vadd.f32 %v599_v61, %v310_v13 }
 0x11d   :  { %2458 = vtanh.f32 %v606_v3  ;;  %v610_v12 = vmul.f32 0.5, %v603_v11  ;;  %v615_v47 = vmul.f32 0.5, %v605_v38 }
 0x11f   :  { %2460 = vtanh.f32 %v610_v12 }
 0x120   :  { %2462 = vtanh.f32 %v604_v7 }
 0x121   :  { %2464 = vtanh.f32 %v615_v47 }
 0x12a   :  { %v2459_v5 = vpop.eup %2458 }
 0x12b   :  { %v608_v8 = vmul.f32 0.5, %v2459_v5 }
 0x12c   :  { %v2461_v0 = vpop.eup %2460 }
 0x12d   :  { %v609_v60 = vadd.f32 0.5, %v608_v8  ;;  %v612_v9 = vmul.f32 0.5, %v2461_v0  ;;  %v2463_v3 = vpop.eup %2462 }
 0x12e   :  { %v2465_v4 = vpop.eup %2464 }
 0x12f   :  { %v613_v62 = vadd.f32 0.5, %v612_v9  ;;  %v620_v56 = vmul.f32 %v2463_v3, %v609_v60  ;;  %v617_v61 = vmul.f32 0.5, %v2465_v4 }
 0x131   :  { %v619_v1 = vmul.f32 %v613_v62, %v388_v63  ;;  %v618_v20 = vadd.f32 0.5, %v617_v61 }
 0x133   :  { %v621_v12 = vadd.f32 %v620_v56, %v619_v1  ;;  %v876_v1 = vpop.permute.xlu0 %875 }
 0x134   :  { %vm877_vm10 = vcmp.eq.s32.totalorder %v876_v1, 1  ;;  %v3392_v1 = vld [vmem:[#allocation5 + $0x48] sm:$0xff] }
 0x135   :  { %2466 = vtanh.f32 %v621_v12  ;;  %v3142_v11 = vsel %vm630_vm5, %v621_v12, %v388_v63 }
 0x142   :  { %v2467_v2 = vpop.eup %2466 }
 0x143   :  { %v623_v7 = vmul.f32 %v2467_v2, %v618_v20 }
 0x145   :  { %v631_v13 = vsel %vm630_vm5, %v623_v7, 0.0  ;;  %v3145_v38 = vsel %vm630_vm5, %v623_v7, %v2966_v10 }
 0x146   :  { %632 = vst [vmem:[#allocation8] sm:$0xff] %v631_v13  ;;  %771 = vmatmul.mubr.f32.vlgmr.msra.gmra.mxu0 %v3145_v38  ;;  %842 = vmatmul.mubr.f32.vlgmr.msra.gmra.mxu1 %v3145_v38 }
 0x147   :  { %955 = vmatpush1.msra.mxu0 %v2723_v14  ;;  %1026 = vmatpush1.msra.mxu1 %v2725_v15  ;;  %v3848_v14 = vld [vmem:[#allocation15_spill] sm:$0xff]  ;;  %v3849_v15 = vld [vmem:[#allocation16_spill] sm:$0xff] }
 0x148   :  { %956 = vmatprep.subr.mxu0 %v2729_v16  ;;  %1027 = vmatprep.subr.mxu1 %v2731_v17  ;;  %v3850_v16 = vld [vmem:[#allocation17_spill] sm:$0xff]  ;;  %v3851_v17 = vld [vmem:[#allocation18_spill] sm:$0xff] }
 0x149   :  { %957 = vmatpush1.msra.mxu0 %v2737_v18  ;;  %1028 = vmatpush1.msra.mxu1 %v2739_v19  ;;  %v3852_v18 = vld [vmem:[#allocation19_spill] sm:$0xff]  ;;  %v3853_v19 = vld [vmem:[#allocation20_spill] sm:$0xff] }
 0x14a   :  { %958 = vmatprep.subr.mxu0 %v2748_v21  ;;  %1029 = vmatprep.subr.mxu1 %v2750_v22  ;;  %v3854_v21 = vld [vmem:[#allocation21_spill] sm:$0xff]  ;;  %v3855_v22 = vld [vmem:[#allocation22_spill] sm:$0xff] }
 0x14b   :  { %959 = vmatpush1.msra.mxu0 %v2754_v23  ;;  %1030 = vmatpush1.msra.mxu1 %v2756_v24  ;;  %v3856_v23 = vld [vmem:[#allocation23_spill] sm:$0xff]  ;;  %v3857_v24 = vld [vmem:[#allocation24_spill] sm:$0xff] }
 0x14c   :  { %960 = vmatprep.subr.mxu0 %v2760_v25  ;;  %1031 = vmatprep.subr.mxu1 %v2762_v26  ;;  %v3858_v25 = vld [vmem:[#allocation25_spill] sm:$0xff]  ;;  %v3859_v26 = vld [vmem:[#allocation26_spill] sm:$0xff] }
 0x14d   :  { %961 = vmatpush1.msra.mxu0 %v2768_v27  ;;  %1032 = vmatpush1.msra.mxu1 %v2770_v28  ;;  %v3860_v27 = vld [vmem:[#allocation27_spill] sm:$0xff]  ;;  %v3861_v28 = vld [vmem:[#allocation28_spill] sm:$0xff]  ;;  %3886 = vst [vmem:[#allocation25_spill] sm:$0xff] %v3392_v1 }
 0x14e   :  { %962 = vmatprep.subr.mxu0 %v2779_v30  ;;  %1033 = vmatprep.subr.mxu1 %v2781_v31  ;;  %v3862_v30 = vld [vmem:[#allocation29_spill] sm:$0xff]  ;;  %v3863_v31 = vld [vmem:[#allocation30_spill] sm:$0xff] }
 0x14f   :  { %963 = vmatpush1.msra.mxu0 %v2785_v32  ;;  %1034 = vmatpush1.msra.mxu1 %v2787_v33  ;;  %v3864_v32 = vld [vmem:[#allocation31_spill] sm:$0xff]  ;;  %v3865_v33 = vld [vmem:[#allocation33_spill] sm:$0xff] }
 0x150   :  { %964 = vmatprep.subr.mxu0 %v2791_v34  ;;  %1035 = vmatprep.subr.mxu1 %v2793_v35  ;;  %v3866_v34 = vld [vmem:[#allocation34_spill] sm:$0xff]  ;;  %v3867_v35 = vld [vmem:[#allocation35_spill] sm:$0xff] }
 0x151   :  { %965 = vmatpush1.msra.mxu0 %v2799_v36  ;;  %1036 = vmatpush1.msra.mxu1 %v2801_v37  ;;  %v3868_v36 = vmov 0.0   ;;  %v3869_v37 = vld [vmem:[#allocation36_spill] sm:$0xff]  ;;  %3894 = vst [vmem:[#allocation34_spill] sm:$0xff] %v3416_v6 }
 0x152   :  { %966 = vmatprep.subr.mxu0 %v2810_v39  ;;  %1037 = vmatprep.subr.mxu1 %v2812_v40  ;;  %v3870_v39 = vld [vmem:[#allocation32_spill] sm:$0xff]  ;;  %v3871_v40 = vmov 0  }
 0x153   :  { %967 = vmatpush1.msra.mxu0 %v2816_v41  ;;  %1038 = vmatpush1.msra.mxu1 %v2818_v42  ;;  %vm1120_vm6 = vcmp.gt.s32.totalorder %v3870_v39, 2  ;;  %vm1368_vm7 = vcmp.gt.s32.totalorder %v3870_v39, 3  ;;  %vm1864_vm8 = vcmp.gt.s32.totalorder %v3870_v39, 5  ;;  %vm2360_vm9 = vcmp.gt.s32.totalorder %v3870_v39, 7  ;;  %v3300_v39 = vld [vmem:[#allocation5 + $0x140] sm:$0xff] }
 0x154   :  { %968 = vmatprep.subr.mxu0 %v2822_v43  ;;  %1039 = vmatprep.subr.mxu1 %v2824_v44  ;;  %v1121_v41 = vsel %vm1120_vm6, 1, %v3871_v40  ;;  %v1369_v42 = vsel %vm1368_vm7, 1, %v3871_v40  ;;  %v1865_v43 = vsel %vm1864_vm8, 1, %v3871_v40  ;;  %v2361_v44 = vsel %vm2360_vm9, 1, %v3871_v40  ;;  %v3304_v40 = vld [vmem:[#allocation5 + $0x150] sm:$0xff] }
 0x155   :  { %969 = vmatpush1.msra.mxu0 %v2830_v45  ;;  %1040 = vmatpush1.msra.mxu1 %v2832_v46  ;;  %v3872_v46 = vld [vmem:[#allocation37_spill] sm:$0xff] }
 0x156   :  { %970 = vmatprep.subr.mxu0 %v2841_v48  ;;  %1041 = vmatprep.subr.mxu1 %v2843_v49 }
 0x157   :  { %971 = vmatpush1.msra.mxu0 %v2847_v50  ;;  %1042 = vmatpush1.msra.mxu1 %v2849_v51 }
 0x158   :  { %972 = vmatprep.subr.mxu0 %v2853_v52  ;;  %1043 = vmatprep.subr.mxu1 %v2855_v53  ;;  %v3873_v52 = vld [vmem:[#allocation39_spill] sm:$0xff] }
 0x159   :  { %973 = vmatpush1.msra.mxu0 %v2861_v54  ;;  %1044 = vmatpush1.msra.mxu1 %v2863_v55  ;;  %v3874_v54 = vld [vmem:[#allocation38_spill] sm:$0xff] }
 0x15a   :  { %974 = vmatprep.subr.mxu0 %v2872_v57  ;;  %1045 = vmatprep.subr.mxu1 %v2874_v58 }
 0x15b   :  { %975 = vmatpush1.msra.mxu0 %v2878_v59  ;;  %1046 = vmatpush1.msra.mxu1 %v3848_v14  ;;  %v3875_v59 = vld [vmem:[#allocation40_spill] sm:$0xff] }
 0x15c   :  { %976 = vmatprep.subr.mxu0 %v3849_v15  ;;  %1047 = vmatprep.subr.mxu1 %v3850_v16  ;;  %v3238_v15 = vld [vmem:[#allocation5 + $0x1f8] sm:$0xff]  ;;  %v3242_v16 = vld [vmem:[#allocation5 + $0x1e0] sm:$0xff] }
 0x15d   :  { %977 = vmatpush1.msra.mxu0 %v3851_v17  ;;  %1048 = vmatpush1.msra.mxu1 %v3852_v18  ;;  %3877 = vst [vmem:[#allocation16_spill] sm:$0xff] %v3238_v15  ;;  %v3248_v17 = vld [vmem:[#allocation5 + $0x1c8] sm:$0xff]  ;;  %v3250_v18 = vld [vmem:[#allocation5 + $0x1d8] sm:$0xff] }
 0x15e   :  { %978 = vmatprep.subr.mxu0 %v3853_v19  ;;  %1049 = vmatprep.subr.mxu1 %v3854_v21  ;;  %v3254_v19 = vld [vmem:[#allocation5 + $0x1c0] sm:$0xff]  ;;  %v3256_v21 = vld [vmem:[#allocation5 + $0x1d0] sm:$0xff] }
 0x15f   :  { %979 = vmatpush1.msra.mxu0 %v3855_v22  ;;  %1050 = vmatpush1.msra.mxu1 %v3856_v23  ;;  %v3260_v22 = vld [vmem:[#allocation5 + $0x1a8] sm:$0xff]  ;;  %v3262_v23 = vld [vmem:[#allocation5 + $0x1b8] sm:$0xff] }
 0x160   :  { %980 = vmatprep.subr.mxu0 %v3857_v24  ;;  %1051 = vmatprep.subr.mxu1 %v3858_v25  ;;  %v3266_v24 = vld [vmem:[#allocation5 + $0x1a0] sm:$0xff]  ;;  %v3268_v25 = vld [vmem:[#allocation5 + $0x1b0] sm:$0xff] }
 0x161   :  { %981 = vmatpush1.msra.mxu0 %v3859_v26  ;;  %1052 = vmatpush1.msra.mxu1 %v3860_v27  ;;  %v3272_v26 = vld [vmem:[#allocation5 + $0x188] sm:$0xff]  ;;  %v3274_v27 = vld [vmem:[#allocation5 + $0x198] sm:$0xff] }
 0x162   :  { %982 = vmatprep.subr.mxu0 %v3861_v28  ;;  %1053 = vmatprep.subr.mxu1 %v3862_v30  ;;  %v3278_v28 = vld [vmem:[#allocation5 + $0x180] sm:$0xff]  ;;  %v3280_v30 = vld [vmem:[#allocation5 + $0x190] sm:$0xff] }
 0x163   :  { %983 = vmatpush1.msra.mxu0 %v3863_v31  ;;  %1054 = vmatpush1.msra.mxu1 %v3864_v32  ;;  %v3284_v31 = vld [vmem:[#allocation5 + $0x168] sm:$0xff]  ;;  %v3286_v32 = vld [vmem:[#allocation5 + $0x178] sm:$0xff] }
 0x164   :  { %984 = vmatprep.subr.mxu0 %v3865_v33  ;;  %1055 = vmatprep.subr.mxu1 %v3866_v34  ;;  %v3290_v33 = vld [vmem:[#allocation5 + $0x160] sm:$0xff]  ;;  %v3292_v34 = vld [vmem:[#allocation5 + $0x170] sm:$0xff] }
 0x165   :  { %985 = vmatpush1.msra.mxu0 %v3867_v35  ;;  %1018 = vmatprep.mubr.f32.mxu0 %v3868_v36  ;;  %v3296_v35 = vld [vmem:[#allocation5 + $0x148] sm:$0xff] }
 0x166   :  { %1056 = vmatpush1.msra.mxu1 %v3869_v37  ;;  %1089 = vmatprep.mubr.f32.mxu1 %v3868_v36  ;;  %v3298_v37 = vld [vmem:[#allocation5 + $0x158] sm:$0xff] }
 0x167   :  { %1123 = vperm.xlu1 %2457, %v1121_v41   ;;  %1273 = vmatprep.subr.mxu1 %v3238_v15  ;;  %v3306_v41 = vld [vmem:[#allocation5 + $0x128] sm:$0xff] }
 0x16b   :  { %1371 = vperm.xlu1 %2457, %v1369_v42   ;;  %v3308_v42 = vld [vmem:[#allocation5 + $0x138] sm:$0xff] }
 0x16f   :  { %1867 = vperm.xlu1 %2457, %v1865_v43   ;;  %v3314_v43 = vld [vmem:[#allocation5 + $0x120] sm:$0xff] }
 0x173   :  { %2363 = vperm.xlu1 %2457, %v2361_v44   ;;  %v3316_v44 = vld [vmem:[#allocation5 + $0x130] sm:$0xff] }
 0x206   :  { %v772_v45 = vpop.f32.mrf.mxu0  ;;  %v843_v49 = vpop.f32.mrf.mxu1 }
 0x207   :  { %v848_v48 = vadd.f32 %v772_v45, %v3872_v46  ;;  %v850_v55 = vadd.f32 %v843_v49, %v3874_v54  ;;  %v3320_v45 = vld [vmem:[#allocation5 + $0x108] sm:$0xff]  ;;  %v3322_v46 = vld [vmem:[#allocation5 + $0x118] sm:$0xff]  ;;  %v3328_v49 = vld [vmem:[#allocation5 + $0x110] sm:$0xff] }
 0x208   :  { %v774_v50 = vpop.f32.mrf.mxu0  ;;  %v845_v58 = vpop.f32.mrf.mxu1  ;;  %v3344_v54 = vld [vmem:[#allocation5 + $0xc8] sm:$0xff] }
 0x209   :  { %v852_v51 = vmul.f32 0.5, %v848_v48  ;;  %v849_v53 = vadd.f32 %v774_v50, %v3873_v52  ;;  %v851_v10 = vadd.f32 %v845_v58, %v3875_v59  ;;  %v3326_v48 = vld [vmem:[#allocation5 + $0x100] sm:$0xff]  ;;  %v3332_v50 = vld [vmem:[#allocation5 + $0xe8] sm:$0xff]  ;;  %v3352_v58 = vld [vmem:[#allocation5 + $0xd0] sm:$0xff] }
 0x20a   :  { %v3338_v52 = vld [vmem:[#allocation5 + $0xe0] sm:$0xff]  ;;  %v3356_v59 = vld [vmem:[#allocation5 + $0xa8] sm:$0xff] }
 0x20b   :  { %2468 = vtanh.f32 %v852_v51  ;;  %v856_v57 = vmul.f32 0.5, %v849_v53  ;;  %v861_v47 = vmul.f32 0.5, %v851_v10  ;;  %v3334_v51 = vld [vmem:[#allocation5 + $0xf8] sm:$0xff]  ;;  %v3340_v53 = vld [vmem:[#allocation5 + $0xf0] sm:$0xff] }
 0x20c   :  { %v3358_v10 = vld [vmem:[#allocation5 + $0xb8] sm:$0xff] }
 0x20d   :  { %2470 = vtanh.f32 %v856_v57  ;;  %v3350_v57 = vld [vmem:[#allocation5 + $0xc0] sm:$0xff] }
 0x20e   :  { %2472 = vtanh.f32 %v850_v55  ;;  %v3346_v55 = vld [vmem:[#allocation5 + $0xd8] sm:$0xff] }
 0x20f   :  { %2474 = vtanh.f32 %v861_v47  ;;  %v3362_v47 = vld [vmem:[#allocation5 + $0xa0] sm:$0xff] }
 0x218   :  { %v2469_v5 = vpop.eup %2468 }
 0x219   :  { %v854_v8 = vmul.f32 0.5, %v2469_v5  ;;  %v3364_v5 = vld [vmem:[#allocation5 + $0xb0] sm:$0xff] }
 0x21a   :  { %v2471_v0 = vpop.eup %2470 }
 0x21b   :  { %v855_v60 = vadd.f32 0.5, %v854_v8  ;;  %v858_v9 = vmul.f32 0.5, %v2471_v0  ;;  %v2473_v63 = vpop.eup %2472  ;;  %v3368_v8 = vld [vmem:[#allocation5 + $0x88] sm:$0xff]  ;;  %v3370_v0 = vld [vmem:[#allocation5 + $0x98] sm:$0xff] }
 0x21c   :  { %v2475_v4 = vpop.eup %2474  ;;  %3878 = vst [vmem:[#allocation17_spill] sm:$0xff] %v3368_v8  ;;  %3879 = vst [vmem:[#allocation18_spill] sm:$0xff] %v3370_v0 }
 0x21d   :  { %v859_v62 = vadd.f32 0.5, %v858_v9  ;;  %v866_v29 = vmul.f32 %v2473_v63, %v855_v60  ;;  %v863_v61 = vmul.f32 0.5, %v2475_v4  ;;  %v3374_v60 = vld [vmem:[#allocation5 + $0x80] sm:$0xff]  ;;  %v3376_v9 = vld [vmem:[#allocation5 + $0x90] sm:$0xff]  ;;  %v3380_v63 = vld [vmem:[#allocation5 + $0x68] sm:$0xff] }
 0x21e   :  { %3880 = vst [vmem:[#allocation19_spill] sm:$0xff] %v3374_v60  ;;  %3881 = vst [vmem:[#allocation20_spill] sm:$0xff] %v3376_v9  ;;  %v3398_v4 = vld [vmem:[#allocation5 + $0x40] sm:$0xff] }
 0x21f   :  { %v865_v3 = vmul.f32 %v859_v62, %v3142_v11  ;;  %v864_v20 = vadd.f32 0.5, %v863_v61  ;;  %3882 = vst [vmem:[#allocation21_spill] sm:$0xff] %v3380_v63  ;;  %v3382_v62 = vld [vmem:[#allocation5 + $0x78] sm:$0xff]  ;;  %3888 = vst [vmem:[#allocation27_spill] sm:$0xff] %v3398_v4  ;;  %v3400_v61 = vld [vmem:[#allocation5 + $0x50] sm:$0xff] }
 0x220   :  { %3883 = vst [vmem:[#allocation22_spill] sm:$0xff] %v3382_v62  ;;  %3889 = vst [vmem:[#allocation28_spill] sm:$0xff] %v3400_v61 }
 0x221   :  { %v867_v56 = vadd.f32 %v866_v29, %v865_v3  ;;  %v3386_v29 = vld [vmem:[#allocation5 + $0x60] sm:$0xff]  ;;  %v3388_v3 = vld [vmem:[#allocation5 + $0x70] sm:$0xff] }
 0x222   :  { %3884 = vst [vmem:[#allocation23_spill] sm:$0xff] %v3386_v29  ;;  %3885 = vst [vmem:[#allocation24_spill] sm:$0xff] %v3388_v3 }
 0x223   :  { %2476 = vtanh.f32 %v867_v56  ;;  %v3227_v12 = vsel %vm877_vm10, %v867_v56, %v3142_v11  ;;  %v3236_v11 = vld [vmem:[#allocation5 + $0x1e8] sm:$0xff]  ;;  %v3394_v56 = vld [vmem:[#allocation5 + $0x58] sm:$0xff] }
 0x224   :  { %3876 = vst [vmem:[#allocation15_spill] sm:$0xff] %v3236_v11  ;;  %1202 = vmatprep.subr.mxu0 %v3236_v11  ;;  %3887 = vst [vmem:[#allocation26_spill] sm:$0xff] %v3394_v56 }
 0x230   :  { %v2477_v2 = vpop.eup %2476 }
 0x231   :  { %v869_v7 = vmul.f32 %v2477_v2, %v864_v20  ;;  %v3404_v20 = vld [vmem:[#allocation5 + $0x28] sm:$0xff]  ;;  %v3406_v2 = vld [vmem:[#allocation5 + $0x38] sm:$0xff] }
 0x232   :  { %3890 = vst [vmem:[#allocation29_spill] sm:$0xff] %v3404_v20  ;;  %3891 = vst [vmem:[#allocation30_spill] sm:$0xff] %v3406_v2 }
 0x233   :  { %v878_v13 = vsel %vm877_vm10, %v869_v7, 0.0  ;;  %v3230_v14 = vsel %vm877_vm10, %v869_v7, %v3145_v38  ;;  %v3244_v38 = vld [vmem:[#allocation5 + $0x1f0] sm:$0xff]  ;;  %v3410_v7 = vld [vmem:[#allocation5 + $0x20] sm:$0xff] }
 0x234   :  { %880 = vst [vmem:[#allocation8 + $0x8] sm:$0xff] %v878_v13  ;;  %1019 = vmatmul.mubr.f32.vlgmr.msra.gmra.mxu0 %v3230_v14  ;;  %1090 = vmatmul.mubr.f32.vlgmr.msra.gmra.mxu1 %v3230_v14  ;;  %3892 = vst [vmem:[#allocation31_spill] sm:$0xff] %v3410_v7  ;;  %v3412_v13 = vld [vmem:[#allocation5 + $0x30] sm:$0xff] }
 0x235   :  { %1266 = vmatprep.mubr.f32.mxu0 %v3868_v36  ;;  %1337 = vmatprep.mubr.f32.mxu1 %v3868_v36  ;;  %3893 = vst [vmem:[#allocation33_spill] sm:$0xff] %v3412_v13  ;;  %v3418_v36 = vld [vmem:[#allocation5 + $0x18] sm:$0xff] }
 0x236   :  { %1203 = vmatpush1.msra.mxu0 %v3242_v16  ;;  %1274 = vmatpush1.msra.mxu1 %v3244_v38  ;;  %3895 = vst [vmem:[#allocation35_spill] sm:$0xff] %v3418_v36 }
 0x237   :  { %1204 = vmatprep.subr.mxu0 %v3248_v17  ;;  %1275 = vmatprep.subr.mxu1 %v3250_v18 }
 0x238   :  { %1205 = vmatpush1.msra.mxu0 %v3254_v19  ;;  %1276 = vmatpush1.msra.mxu1 %v3256_v21 }
 0x239   :  { %1206 = vmatprep.subr.mxu0 %v3260_v22  ;;  %1277 = vmatprep.subr.mxu1 %v3262_v23 }
 0x23a   :  { %1207 = vmatpush1.msra.mxu0 %v3266_v24  ;;  %1278 = vmatpush1.msra.mxu1 %v3268_v25 }
 0x23b   :  { %1208 = vmatprep.subr.mxu0 %v3272_v26  ;;  %1279 = vmatprep.subr.mxu1 %v3274_v27 }
 0x23c   :  { %1209 = vmatpush1.msra.mxu0 %v3278_v28  ;;  %1280 = vmatpush1.msra.mxu1 %v3280_v30 }
 0x23d   :  { %1210 = vmatprep.subr.mxu0 %v3284_v31  ;;  %1281 = vmatprep.subr.mxu1 %v3286_v32 }
 0x23e   :  { %1211 = vmatpush1.msra.mxu0 %v3290_v33  ;;  %1282 = vmatpush1.msra.mxu1 %v3292_v34 }
 0x23f   :  { %1212 = vmatprep.subr.mxu0 %v3296_v35  ;;  %1283 = vmatprep.subr.mxu1 %v3298_v37 }
 0x240   :  { %1213 = vmatpush1.msra.mxu0 %v3300_v39  ;;  %1284 = vmatpush1.msra.mxu1 %v3304_v40 }
 0x241   :  { %1214 = vmatprep.subr.mxu0 %v3306_v41  ;;  %1285 = vmatprep.subr.mxu1 %v3308_v42 }
 0x242   :  { %1215 = vmatpush1.msra.mxu0 %v3314_v43  ;;  %1286 = vmatpush1.msra.mxu1 %v3316_v44 }
 0x243   :  { %1216 = vmatprep.subr.mxu0 %v3320_v45  ;;  %1287 = vmatprep.subr.mxu1 %v3322_v46 }
 0x244   :  { %1217 = vmatpush1.msra.mxu0 %v3326_v48  ;;  %1288 = vmatpush1.msra.mxu1 %v3328_v49 }
 0x245   :  { %1218 = vmatprep.subr.mxu0 %v3332_v50  ;;  %1289 = vmatprep.subr.mxu1 %v3334_v51 }
 0x246   :  { %1219 = vmatpush1.msra.mxu0 %v3338_v52  ;;  %1290 = vmatpush1.msra.mxu1 %v3340_v53 }
 0x247   :  { %1220 = vmatprep.subr.mxu0 %v3344_v54  ;;  %1291 = vmatprep.subr.mxu1 %v3346_v55 }
 0x248   :  { %1221 = vmatpush1.msra.mxu0 %v3350_v57  ;;  %1292 = vmatpush1.msra.mxu1 %v3352_v58 }
 0x249   :  { %1222 = vmatprep.subr.mxu0 %v3356_v59  ;;  %1293 = vmatprep.subr.mxu1 %v3358_v10 }
 0x24a   :  { %1223 = vmatpush1.msra.mxu0 %v3362_v47  ;;  %1294 = vmatpush1.msra.mxu1 %v3364_v5 }
 0x24b   :  { %1224 = vmatprep.subr.mxu0 %v3368_v8  ;;  %1295 = vmatprep.subr.mxu1 %v3370_v0  ;;  %v1124_v8 = vpop.permute.xlu1 %1123 }
 0x24c   :  { %1225 = vmatpush1.msra.mxu0 %v3374_v60  ;;  %1296 = vmatpush1.msra.mxu1 %v3376_v9  ;;  %vm1125_vm11 = vcmp.eq.s32.totalorder %v1124_v8, 1  ;;  %v3904_v8 = vld [vmem:[#allocation19_spill] sm:$0xff] }
 0x24d   :  { %1226 = vmatprep.subr.mxu0 %v3380_v63  ;;  %1297 = vmatprep.subr.mxu1 %v3382_v62 }
 0x24e   :  { %1227 = vmatpush1.msra.mxu0 %v3386_v29  ;;  %1298 = vmatpush1.msra.mxu1 %v3388_v3  ;;  %v3900_v3 = vld [vmem:[#allocation42_spill] sm:$0xff] }
 0x24f   :  { %1228 = vmatprep.subr.mxu0 %v3392_v1  ;;  %1299 = vmatprep.subr.mxu1 %v3394_v56  ;;  %v3899_v1 = vld [vmem:[#allocation43_spill] sm:$0xff] }
 0x250   :  { %1229 = vmatpush1.msra.mxu0 %v3398_v4  ;;  %1300 = vmatpush1.msra.mxu1 %v3400_v61  ;;  %v3422_v61 = vld [vmem:[#allocation5] sm:$0xff] }
 0x251   :  { %1230 = vmatprep.subr.mxu0 %v3404_v20  ;;  %1301 = vmatprep.subr.mxu1 %v3406_v2  ;;  %3896 = vst [vmem:[#allocation36_spill] sm:$0xff] %v3422_v61  ;;  %v3424_v20 = vld [vmem:[#allocation5 + $0x10] sm:$0xff] }
 0x252   :  { %1231 = vmatpush1.msra.mxu0 %v3410_v7  ;;  %1302 = vmatpush1.msra.mxu1 %v3412_v13  ;;  %3897 = vst [vmem:[#allocation32_spill] sm:$0xff] %v3424_v20  ;;  %v3898_v7 = vld [vmem:[#allocation41_spill] sm:$0xff] }
 0x253   :  { %1232 = vmatprep.subr.mxu0 %v3416_v6  ;;  %1303 = vmatprep.subr.mxu1 %v3418_v36 }
 0x254   :  { %1233 = vmatpush1.msra.mxu0 %v3422_v61  ;;  %1304 = vmatpush1.msra.mxu1 %v3424_v20  ;;  %v3901_v20 = vld [vmem:[#allocation44_spill] sm:$0xff] }
 0x255   :  { %1450 = vmatprep.subr.mxu0 %v3236_v11  ;;  %1521 = vmatprep.subr.mxu1 %v3238_v15 }
 0x2f4   :  { %v1020_v13 = vpop.f32.mrf.mxu0  ;;  %v1091_v4 = vpop.f32.mrf.mxu1 }
 0x2f5   :  { %v1096_v2 = vadd.f32 %v1020_v13, %v3898_v7  ;;  %v1098_v29 = vadd.f32 %v1091_v4, %v3900_v3  ;;  %v3907_v4 = vld [vmem:[#allocation22_spill] sm:$0xff] }
 0x2f6   :  { %v1022_v56 = vpop.f32.mrf.mxu0  ;;  %v1093_v61 = vpop.f32.mrf.mxu1 }
 0x2f7   :  { %v1100_v6 = vmul.f32 0.5, %v1096_v2  ;;  %v1097_v36 = vadd.f32 %v1022_v56, %v3899_v1  ;;  %v1099_v63 = vadd.f32 %v1093_v61, %v3901_v20  ;;  %v3908_v61 = vld [vmem:[#allocation23_spill] sm:$0xff]  ;;  %v3909_v20 = vld [vmem:[#allocation24_spill] sm:$0xff] }
 0x2f9   :  { %2478 = vtanh.f32 %v1100_v6  ;;  %v1104_v62 = vmul.f32 0.5, %v1097_v36  ;;  %v1109_v11 = vmul.f32 0.5, %v1099_v63 }
 0x2fb   :  { %2480 = vtanh.f32 %v1104_v62 }
 0x2fc   :  { %2482 = vtanh.f32 %v1098_v29 }
 0x2fd   :  { %2484 = vtanh.f32 %v1109_v11 }
 0x306   :  { %v2479_v9 = vpop.eup %2478 }
 0x307   :  { %v1102_v15 = vmul.f32 0.5, %v2479_v9 }
 0x308   :  { %v2481_v60 = vpop.eup %2480 }
 0x309   :  { %v1103_v0 = vadd.f32 0.5, %v1102_v15  ;;  %v1106_v7 = vmul.f32 0.5, %v2481_v60  ;;  %v2483_v13 = vpop.eup %2482  ;;  %v3906_v60 = vld [vmem:[#allocation21_spill] sm:$0xff] }
 0x30a   :  { %v2485_v29 = vpop.eup %2484 }
 0x30b   :  { %v1107_v2 = vadd.f32 0.5, %v1106_v7  ;;  %v1114_v1 = vmul.f32 %v2483_v13, %v1103_v0  ;;  %v1111_v63 = vmul.f32 0.5, %v2485_v29  ;;  %v3905_v0 = vld [vmem:[#allocation20_spill] sm:$0xff]  ;;  %v3910_v7 = vld [vmem:[#allocation25_spill] sm:$0xff]  ;;  %v3911_v13 = vld [vmem:[#allocation26_spill] sm:$0xff] }
 0x30c   :  { %v3916_v29 = vld [vmem:[#allocation31_spill] sm:$0xff] }
 0x30d   :  { %v1113_v6 = vmul.f32 %v1107_v2, %v3227_v12  ;;  %v1112_v3 = vadd.f32 0.5, %v1111_v63  ;;  %v3912_v2 = vld [vmem:[#allocation27_spill] sm:$0xff]  ;;  %v3917_v63 = vld [vmem:[#allocation33_spill] sm:$0xff] }
 0x30f   :  { %v1115_v36 = vadd.f32 %v1114_v1, %v1113_v6  ;;  %v3913_v1 = vld [vmem:[#allocation28_spill] sm:$0xff]  ;;  %v3914_v6 = vld [vmem:[#allocation29_spill] sm:$0xff] }
 0x311   :  { %2486 = vtanh.f32 %v1115_v36  ;;  %v3436_v62 = vsel %vm1125_vm11, %v1115_v36, %v3227_v12  ;;  %v3902_v12 = vld [vmem:[#allocation17_spill] sm:$0xff]  ;;  %v3915_v36 = vld [vmem:[#allocation30_spill] sm:$0xff] }
 0x31e   :  { %v2487_v9 = vpop.eup %2486 }
 0x31f   :  { %v1117_v56 = vmul.f32 %v2487_v9, %v1112_v3  ;;  %v3918_v3 = vld [vmem:[#allocation34_spill] sm:$0xff]  ;;  %v3919_v9 = vld [vmem:[#allocation35_spill] sm:$0xff] }
 0x321   :  { %v1126_v15 = vsel %vm1125_vm11, %v1117_v56, 0.0  ;;  %v3439_v11 = vsel %vm1125_vm11, %v1117_v56, %v3230_v14  ;;  %v3903_v14 = vld [vmem:[#allocation18_spill] sm:$0xff]  ;;  %v3920_v56 = vld [vmem:[#allocation36_spill] sm:$0xff] }
 0x322   :  { %1128 = vst [vmem:[#allocation8 + $0x10] sm:$0xff] %v1126_v15  ;;  %1267 = vmatmul.mubr.f32.vlgmr.msra.gmra.mxu0 %v3439_v11  ;;  %1338 = vmatmul.mubr.f32.vlgmr.msra.gmra.mxu1 %v3439_v11  ;;  %v3921_v15 = vmov 0.0  }
 0x323   :  { %1451 = vmatpush1.msra.mxu0 %v3242_v16  ;;  %1522 = vmatpush1.msra.mxu1 %v3244_v38 }
 0x324   :  { %1452 = vmatprep.subr.mxu0 %v3248_v17  ;;  %1523 = vmatprep.subr.mxu1 %v3250_v18 }
 0x325   :  { %1453 = vmatpush1.msra.mxu0 %v3254_v19  ;;  %1524 = vmatpush1.msra.mxu1 %v3256_v21 }
 0x326   :  { %1454 = vmatprep.subr.mxu0 %v3260_v22  ;;  %1525 = vmatprep.subr.mxu1 %v3262_v23 }
 0x327   :  { %1455 = vmatpush1.msra.mxu0 %v3266_v24  ;;  %1526 = vmatpush1.msra.mxu1 %v3268_v25 }
 0x328   :  { %1456 = vmatprep.subr.mxu0 %v3272_v26  ;;  %1527 = vmatprep.subr.mxu1 %v3274_v27 }
 0x329   :  { %1457 = vmatpush1.msra.mxu0 %v3278_v28  ;;  %1528 = vmatpush1.msra.mxu1 %v3280_v30 }
 0x32a   :  { %1458 = vmatprep.subr.mxu0 %v3284_v31  ;;  %1529 = vmatprep.subr.mxu1 %v3286_v32 }
 0x32b   :  { %1459 = vmatpush1.msra.mxu0 %v3290_v33  ;;  %1530 = vmatpush1.msra.mxu1 %v3292_v34 }
 0x32c   :  { %1460 = vmatprep.subr.mxu0 %v3296_v35  ;;  %1531 = vmatprep.subr.mxu1 %v3298_v37 }
 0x32d   :  { %1461 = vmatpush1.msra.mxu0 %v3300_v39  ;;  %1532 = vmatpush1.msra.mxu1 %v3304_v40 }
 0x32e   :  { %1462 = vmatprep.subr.mxu0 %v3306_v41  ;;  %1533 = vmatprep.subr.mxu1 %v3308_v42 }
 0x32f   :  { %1463 = vmatpush1.msra.mxu0 %v3314_v43  ;;  %1534 = vmatpush1.msra.mxu1 %v3316_v44 }
 0x330   :  { %1464 = vmatprep.subr.mxu0 %v3320_v45  ;;  %1535 = vmatprep.subr.mxu1 %v3322_v46 }
 0x331   :  { %1465 = vmatpush1.msra.mxu0 %v3326_v48  ;;  %1536 = vmatpush1.msra.mxu1 %v3328_v49 }
 0x332   :  { %1466 = vmatprep.subr.mxu0 %v3332_v50  ;;  %1537 = vmatprep.subr.mxu1 %v3334_v51 }
 0x333   :  { %1467 = vmatpush1.msra.mxu0 %v3338_v52  ;;  %1538 = vmatpush1.msra.mxu1 %v3340_v53 }
 0x334   :  { %1468 = vmatprep.subr.mxu0 %v3344_v54  ;;  %1539 = vmatprep.subr.mxu1 %v3346_v55 }
 0x335   :  { %1469 = vmatpush1.msra.mxu0 %v3350_v57  ;;  %1540 = vmatpush1.msra.mxu1 %v3352_v58 }
 0x336   :  { %1470 = vmatprep.subr.mxu0 %v3356_v59  ;;  %1541 = vmatprep.subr.mxu1 %v3358_v10 }
 0x337   :  { %1471 = vmatpush1.msra.mxu0 %v3362_v47  ;;  %1542 = vmatpush1.msra.mxu1 %v3364_v5 }
 0x338   :  { %1472 = vmatprep.subr.mxu0 %v3902_v12  ;;  %1543 = vmatprep.subr.mxu1 %v3903_v14 }
 0x339   :  { %1473 = vmatpush1.msra.mxu0 %v3904_v8  ;;  %1544 = vmatpush1.msra.mxu1 %v3905_v0 }
 0x33a   :  { %1474 = vmatprep.subr.mxu0 %v3906_v60  ;;  %1545 = vmatprep.subr.mxu1 %v3907_v4 }
 0x33b   :  { %1475 = vmatpush1.msra.mxu0 %v3908_v61  ;;  %1546 = vmatpush1.msra.mxu1 %v3909_v20  ;;  %v3926_v20 = vld [vmem:[#allocation47_spill] sm:$0xff] }
 0x33c   :  { %1476 = vmatprep.subr.mxu0 %v3910_v7  ;;  %1547 = vmatprep.subr.mxu1 %v3911_v13  ;;  %v3922_v13 = vld [vmem:[#allocation32_spill] sm:$0xff] }
 0x33d   :  { %1477 = vmatpush1.msra.mxu0 %v3912_v2  ;;  %1548 = vmatpush1.msra.mxu1 %v3913_v1  ;;  %v3923_v1 = vld [vmem:[#allocation15_spill] sm:$0xff] }
 0x33e   :  { %1478 = vmatprep.subr.mxu0 %v3914_v6  ;;  %1549 = vmatprep.subr.mxu1 %v3915_v36  ;;  %v3924_v6 = vld [vmem:[#allocation16_spill] sm:$0xff] }
 0x33f   :  { %1479 = vmatpush1.msra.mxu0 %v3916_v29  ;;  %1550 = vmatpush1.msra.mxu1 %v3917_v63  ;;  %v3925_v29 = vld [vmem:[#allocation45_spill] sm:$0xff] }
 0x340   :  { %1480 = vmatprep.subr.mxu0 %v3918_v3  ;;  %1551 = vmatprep.subr.mxu1 %v3919_v9 }
 0x341   :  { %1481 = vmatpush1.msra.mxu0 %v3920_v56  ;;  %1514 = vmatprep.mubr.f32.mxu0 %v3921_v15  ;;  %v3927_v56 = vld [vmem:[#allocation46_spill] sm:$0xff] }
 0x342   :  { %1552 = vmatpush1.msra.mxu1 %v3922_v13  ;;  %1585 = vmatprep.mubr.f32.mxu1 %v3921_v15  ;;  %v3928_v15 = vld [vmem:[#allocation48_spill] sm:$0xff] }
 0x343   :  { %1698 = vmatprep.subr.mxu0 %v3923_v1  ;;  %1769 = vmatprep.subr.mxu1 %v3924_v6 }
 0x3e2   :  { %v1268_v36 = vpop.f32.mrf.mxu0  ;;  %v1339_v63 = vpop.f32.mrf.mxu1 }
 0x3e3   :  { %v1344_v2 = vadd.f32 %v1268_v36, %v3925_v29  ;;  %v1346_v61 = vadd.f32 %v1339_v63, %v3927_v56  ;;  %v3935_v56 = vld [vmem:[#allocation23_spill] sm:$0xff] }
 0x3e4   :  { %v1270_v7 = vpop.f32.mrf.mxu0  ;;  %v1341_v13 = vpop.f32.mrf.mxu1 }
 0x3e5   :  { %v1348_v3 = vmul.f32 0.5, %v1344_v2  ;;  %v1345_v9 = vadd.f32 %v1270_v7, %v3926_v20  ;;  %v1347_v60 = vadd.f32 %v1341_v13, %v3928_v15  ;;  %v1372_v7 = vpop.permute.xlu1 %1371  ;;  %v3936_v15 = vld [vmem:[#allocation24_spill] sm:$0xff] }
 0x3e6   :  { %vm1373_vm12 = vcmp.eq.s32.totalorder %v1372_v7, 1  ;;  %v3941_v7 = vld [vmem:[#allocation29_spill] sm:$0xff] }
 0x3e7   :  { %2488 = vtanh.f32 %v1348_v3  ;;  %v1352_v4 = vmul.f32 0.5, %v1345_v9  ;;  %v1357_v1 = vmul.f32 0.5, %v1347_v60  ;;  %v3934_v9 = vld [vmem:[#allocation22_spill] sm:$0xff] }
 0x3e9   :  { %2490 = vtanh.f32 %v1352_v4 }
 0x3ea   :  { %2492 = vtanh.f32 %v1346_v61 }
 0x3eb   :  { %2494 = vtanh.f32 %v1357_v1  ;;  %v3933_v1 = vld [vmem:[#allocation21_spill] sm:$0xff] }
 0x3f4   :  { %v2489_v0 = vpop.eup %2488 }
 0x3f5   :  { %v1350_v6 = vmul.f32 0.5, %v2489_v0 }
 0x3f6   :  { %v2491_v8 = vpop.eup %2490 }
 0x3f7   :  { %v1351_v14 = vadd.f32 0.5, %v1350_v6  ;;  %v1354_v36 = vmul.f32 0.5, %v2491_v8  ;;  %v2493_v29 = vpop.eup %2492 }
 0x3f8   :  { %v2495_v61 = vpop.eup %2494 }
 0x3f9   :  { %v1355_v2 = vadd.f32 0.5, %v1354_v36  ;;  %v1362_v12 = vmul.f32 %v2493_v29, %v1351_v14  ;;  %v1359_v60 = vmul.f32 0.5, %v2495_v61  ;;  %v3932_v14 = vld [vmem:[#allocation20_spill] sm:$0xff]  ;;  %v3937_v36 = vld [vmem:[#allocation25_spill] sm:$0xff]  ;;  %v3938_v29 = vld [vmem:[#allocation26_spill] sm:$0xff] }
 0x3fa   :  { %v3943_v61 = vld [vmem:[#allocation31_spill] sm:$0xff] }
 0x3fb   :  { %v1361_v20 = vmul.f32 %v1355_v2, %v3436_v62  ;;  %v1360_v13 = vadd.f32 0.5, %v1359_v60  ;;  %v3939_v2 = vld [vmem:[#allocation27_spill] sm:$0xff]  ;;  %v3944_v60 = vld [vmem:[#allocation33_spill] sm:$0xff] }
 0x3fd   :  { %v1363_v63 = vadd.f32 %v1362_v12, %v1361_v20  ;;  %v3931_v12 = vld [vmem:[#allocation19_spill] sm:$0xff]  ;;  %v3940_v20 = vld [vmem:[#allocation28_spill] sm:$0xff] }
 0x3ff   :  { %2496 = vtanh.f32 %v1363_v63  ;;  %v3515_v4 = vsel %vm1373_vm12, %v1363_v63, %v3436_v62  ;;  %v3929_v62 = vld [vmem:[#allocation17_spill] sm:$0xff]  ;;  %v3942_v63 = vld [vmem:[#allocation30_spill] sm:$0xff] }
 0x40c   :  { %v2497_v0 = vpop.eup %2496 }
 0x40d   :  { %v1365_v3 = vmul.f32 %v2497_v0, %v1360_v13  ;;  %v3945_v13 = vld [vmem:[#allocation34_spill] sm:$0xff]  ;;  %v3946_v0 = vld [vmem:[#allocation35_spill] sm:$0xff] }
 0x40f   :  { %v1374_v6 = vsel %vm1373_vm12, %v1365_v3, 0.0  ;;  %v3518_v8 = vsel %vm1373_vm12, %v1365_v3, %v3439_v11  ;;  %v3930_v11 = vld [vmem:[#allocation18_spill] sm:$0xff]  ;;  %v3947_v3 = vld [vmem:[#allocation36_spill] sm:$0xff] }
 0x410   :  { %1376 = vst [vmem:[#allocation8 + $0x18] sm:$0xff] %v1374_v6  ;;  %1515 = vmatmul.mubr.f32.vlgmr.msra.gmra.mxu0 %v3518_v8  ;;  %1586 = vmatmul.mubr.f32.vlgmr.msra.gmra.mxu1 %v3518_v8  ;;  %v3948_v6 = vmov 0.0  }
 0x411   :  { %1699 = vmatpush1.msra.mxu0 %v3242_v16  ;;  %1770 = vmatpush1.msra.mxu1 %v3244_v38 }
 0x412   :  { %1700 = vmatprep.subr.mxu0 %v3248_v17  ;;  %1771 = vmatprep.subr.mxu1 %v3250_v18 }
 0x413   :  { %1701 = vmatpush1.msra.mxu0 %v3254_v19  ;;  %1772 = vmatpush1.msra.mxu1 %v3256_v21 }
 0x414   :  { %1702 = vmatprep.subr.mxu0 %v3260_v22  ;;  %1773 = vmatprep.subr.mxu1 %v3262_v23 }
 0x415   :  { %1703 = vmatpush1.msra.mxu0 %v3266_v24  ;;  %1774 = vmatpush1.msra.mxu1 %v3268_v25 }
 0x416   :  { %1704 = vmatprep.subr.mxu0 %v3272_v26  ;;  %1775 = vmatprep.subr.mxu1 %v3274_v27 }
 0x417   :  { %1705 = vmatpush1.msra.mxu0 %v3278_v28  ;;  %1776 = vmatpush1.msra.mxu1 %v3280_v30 }
 0x418   :  { %1706 = vmatprep.subr.mxu0 %v3284_v31  ;;  %1777 = vmatprep.subr.mxu1 %v3286_v32 }
 0x419   :  { %1707 = vmatpush1.msra.mxu0 %v3290_v33  ;;  %1778 = vmatpush1.msra.mxu1 %v3292_v34 }
 0x41a   :  { %1708 = vmatprep.subr.mxu0 %v3296_v35  ;;  %1779 = vmatprep.subr.mxu1 %v3298_v37 }
 0x41b   :  { %1709 = vmatpush1.msra.mxu0 %v3300_v39  ;;  %1780 = vmatpush1.msra.mxu1 %v3304_v40 }
 0x41c   :  { %1710 = vmatprep.subr.mxu0 %v3306_v41  ;;  %1781 = vmatprep.subr.mxu1 %v3308_v42 }
 0x41d   :  { %1711 = vmatpush1.msra.mxu0 %v3314_v43  ;;  %1782 = vmatpush1.msra.mxu1 %v3316_v44 }
 0x41e   :  { %1712 = vmatprep.subr.mxu0 %v3320_v45  ;;  %1783 = vmatprep.subr.mxu1 %v3322_v46 }
 0x41f   :  { %1713 = vmatpush1.msra.mxu0 %v3326_v48  ;;  %1784 = vmatpush1.msra.mxu1 %v3328_v49 }
 0x420   :  { %1714 = vmatprep.subr.mxu0 %v3332_v50  ;;  %1785 = vmatprep.subr.mxu1 %v3334_v51 }
 0x421   :  { %1715 = vmatpush1.msra.mxu0 %v3338_v52  ;;  %1786 = vmatpush1.msra.mxu1 %v3340_v53 }
 0x422   :  { %1716 = vmatprep.subr.mxu0 %v3344_v54  ;;  %1787 = vmatprep.subr.mxu1 %v3346_v55 }
 0x423   :  { %1717 = vmatpush1.msra.mxu0 %v3350_v57  ;;  %1788 = vmatpush1.msra.mxu1 %v3352_v58 }
 0x424   :  { %1718 = vmatprep.subr.mxu0 %v3356_v59  ;;  %1789 = vmatprep.subr.mxu1 %v3358_v10 }
 0x425   :  { %1719 = vmatpush1.msra.mxu0 %v3362_v47  ;;  %1790 = vmatpush1.msra.mxu1 %v3364_v5 }
 0x426   :  { %1720 = vmatprep.subr.mxu0 %v3929_v62  ;;  %1791 = vmatprep.subr.mxu1 %v3930_v11 }
 0x427   :  { %1721 = vmatpush1.msra.mxu0 %v3931_v12  ;;  %1792 = vmatpush1.msra.mxu1 %v3932_v14 }
 0x428   :  { %1722 = vmatprep.subr.mxu0 %v3933_v1  ;;  %1793 = vmatprep.subr.mxu1 %v3934_v9 }
 0x429   :  { %1723 = vmatpush1.msra.mxu0 %v3935_v56  ;;  %1794 = vmatpush1.msra.mxu1 %v3936_v15  ;;  %v3953_v15 = vld [vmem:[#allocation51_spill] sm:$0xff] }
 0x42a   :  { %1724 = vmatprep.subr.mxu0 %v3937_v36  ;;  %1795 = vmatprep.subr.mxu1 %v3938_v29  ;;  %v3949_v29 = vld [vmem:[#allocation32_spill] sm:$0xff] }
 0x42b   :  { %1725 = vmatpush1.msra.mxu0 %v3939_v2  ;;  %1796 = vmatpush1.msra.mxu1 %v3940_v20  ;;  %v3950_v20 = vld [vmem:[#allocation15_spill] sm:$0xff] }
 0x42c   :  { %1726 = vmatprep.subr.mxu0 %v3941_v7  ;;  %1797 = vmatprep.subr.mxu1 %v3942_v63  ;;  %v3951_v7 = vld [vmem:[#allocation16_spill] sm:$0xff] }
 0x42d   :  { %1727 = vmatpush1.msra.mxu0 %v3943_v61  ;;  %1798 = vmatpush1.msra.mxu1 %v3944_v60  ;;  %v3952_v61 = vld [vmem:[#allocation49_spill] sm:$0xff] }
 0x42e   :  { %1728 = vmatprep.subr.mxu0 %v3945_v13  ;;  %1799 = vmatprep.subr.mxu1 %v3946_v0 }
 0x42f   :  { %1729 = vmatpush1.msra.mxu0 %v3947_v3  ;;  %1762 = vmatprep.mubr.f32.mxu0 %v3948_v6  ;;  %v3954_v3 = vld [vmem:[#allocation50_spill] sm:$0xff] }
 0x430   :  { %1800 = vmatpush1.msra.mxu1 %v3949_v29  ;;  %1833 = vmatprep.mubr.f32.mxu1 %v3948_v6  ;;  %v3955_v6 = vld [vmem:[#allocation52_spill] sm:$0xff] }
 0x431   :  { %1946 = vmatprep.subr.mxu0 %v3950_v20  ;;  %2017 = vmatprep.subr.mxu1 %v3951_v7 }
 0x4d0   :  { %v1516_v63 = vpop.f32.mrf.mxu0  ;;  %v1587_v60 = vpop.f32.mrf.mxu1 }
 0x4d1   :  { %v1592_v2 = vadd.f32 %v1516_v63, %v3952_v61  ;;  %v1594_v56 = vadd.f32 %v1587_v60, %v3954_v3 }
 0x4d2   :  { %v1518_v36 = vpop.f32.mrf.mxu0  ;;  %v1589_v29 = vpop.f32.mrf.mxu1 }
 0x4d3   :  { %v1596_v13 = vmul.f32 0.5, %v1592_v2  ;;  %v1593_v0 = vadd.f32 %v1518_v36, %v3953_v15  ;;  %v1595_v1 = vadd.f32 %v1589_v29, %v3955_v6  ;;  %v1620_v36 = vpop.permute.xlu0 %1619 }
 0x4d4   :  { %vm1621_vm13 = vcmp.eq.s32.totalorder %v1620_v36, 1 }
 0x4d5   :  { %2498 = vtanh.f32 %v1596_v13  ;;  %v1600_v9 = vmul.f32 0.5, %v1593_v0  ;;  %v1605_v20 = vmul.f32 0.5, %v1595_v1 }
 0x4d7   :  { %2500 = vtanh.f32 %v1600_v9 }
 0x4d8   :  { %2502 = vtanh.f32 %v1594_v56 }
 0x4d9   :  { %2504 = vtanh.f32 %v1605_v20 }
 0x4e2   :  { %v2499_v14 = vpop.eup %2498 }
 0x4e3   :  { %v1598_v7 = vmul.f32 0.5, %v2499_v14 }
 0x4e4   :  { %v2501_v12 = vpop.eup %2500 }
 0x4e5   :  { %v1599_v11 = vadd.f32 0.5, %v1598_v7  ;;  %v1602_v63 = vmul.f32 0.5, %v2501_v12  ;;  %v2503_v61 = vpop.eup %2502 }
 0x4e6   :  { %v2505_v56 = vpop.eup %2504 }
 0x4e7   :  { %v1603_v2 = vadd.f32 0.5, %v1602_v63  ;;  %v1610_v62 = vmul.f32 %v2503_v61, %v1599_v11  ;;  %v1607_v1 = vmul.f32 0.5, %v2505_v56  ;;  %v1868_v11 = vpop.permute.xlu1 %1867  ;;  %v2190_v56 = vld [vmem:[#allocation5 + $0x1e0] sm:$0xff] }
 0x4e8   :  { %vm1869_vm14 = vcmp.eq.s32.totalorder %v1868_v11, 1  ;;  %v2138_v11 = vld [vmem:[#allocation5 + $0x40] sm:$0xff] }
 0x4e9   :  { %v1609_v15 = vmul.f32 %v1603_v2, %v3515_v4  ;;  %v1608_v29 = vadd.f32 0.5, %v1607_v1  ;;  %v2192_v1 = vld [vmem:[#allocation5 + $0x1f0] sm:$0xff] }
 0x4eb   :  { %v1611_v60 = vadd.f32 %v1610_v62, %v1609_v15 }
 0x4ed   :  { %2506 = vtanh.f32 %v1611_v60  ;;  %v3594_v9 = vsel %vm1621_vm13, %v1611_v60, %v3515_v4  ;;  %v2191_v60 = vld [vmem:[#allocation5 + $0x1e8] sm:$0xff] }
 0x4fa   :  { %v2507_v14 = vpop.eup %2506 }
 0x4fb   :  { %v1613_v13 = vmul.f32 %v2507_v14, %v1608_v29  ;;  %v2187_v29 = vld [vmem:[#allocation5 + $0x1c8] sm:$0xff]  ;;  %v2189_v14 = vld [vmem:[#allocation5 + $0x1d8] sm:$0xff] }
 0x4fd   :  { %v1622_v0 = vsel %vm1621_vm13, %v1613_v13, 0.0  ;;  %v3597_v12 = vsel %vm1621_vm13, %v1613_v13, %v3518_v8  ;;  %v2186_v13 = vld [vmem:[#allocation5 + $0x1c0] sm:$0xff] }
 0x4fe   :  { %1624 = vst [vmem:[#allocation8 + $0x20] sm:$0xff] %v1622_v0  ;;  %1763 = vmatmul.mubr.f32.vlgmr.msra.gmra.mxu0 %v3597_v12  ;;  %1834 = vmatmul.mubr.f32.vlgmr.msra.gmra.mxu1 %v3597_v12  ;;  %v2188_v0 = vld [vmem:[#allocation5 + $0x1d0] sm:$0xff] }
 0x4ff   :  { %1947 = vmatpush1.msra.mxu0 %v3242_v16  ;;  %2018 = vmatpush1.msra.mxu1 %v3244_v38  ;;  %v3956_v16 = vld [vmem:[#allocation17_spill] sm:$0xff]  ;;  %v3957_v38 = vld [vmem:[#allocation18_spill] sm:$0xff] }
 0x500   :  { %1948 = vmatprep.subr.mxu0 %v3248_v17  ;;  %2019 = vmatprep.subr.mxu1 %v3250_v18  ;;  %v3958_v17 = vld [vmem:[#allocation19_spill] sm:$0xff]  ;;  %v3959_v18 = vld [vmem:[#allocation20_spill] sm:$0xff] }
 0x501   :  { %1949 = vmatpush1.msra.mxu0 %v3254_v19  ;;  %2020 = vmatpush1.msra.mxu1 %v3256_v21  ;;  %v3960_v19 = vld [vmem:[#allocation21_spill] sm:$0xff]  ;;  %v3961_v21 = vld [vmem:[#allocation22_spill] sm:$0xff] }
 0x502   :  { %1950 = vmatprep.subr.mxu0 %v3260_v22  ;;  %2021 = vmatprep.subr.mxu1 %v3262_v23  ;;  %v3962_v22 = vld [vmem:[#allocation23_spill] sm:$0xff]  ;;  %v3963_v23 = vld [vmem:[#allocation24_spill] sm:$0xff] }
 0x503   :  { %1951 = vmatpush1.msra.mxu0 %v3266_v24  ;;  %2022 = vmatpush1.msra.mxu1 %v3268_v25  ;;  %v3964_v24 = vld [vmem:[#allocation25_spill] sm:$0xff]  ;;  %v3965_v25 = vld [vmem:[#allocation26_spill] sm:$0xff] }
 0x504   :  { %1952 = vmatprep.subr.mxu0 %v3272_v26  ;;  %2023 = vmatprep.subr.mxu1 %v3274_v27  ;;  %v3966_v26 = vld [vmem:[#allocation27_spill] sm:$0xff]  ;;  %v3967_v27 = vld [vmem:[#allocation28_spill] sm:$0xff] }
 0x505   :  { %1953 = vmatpush1.msra.mxu0 %v3278_v28  ;;  %2024 = vmatpush1.msra.mxu1 %v3280_v30  ;;  %v3968_v28 = vld [vmem:[#allocation29_spill] sm:$0xff]  ;;  %v3969_v30 = vld [vmem:[#allocation30_spill] sm:$0xff] }
 0x506   :  { %1954 = vmatprep.subr.mxu0 %v3284_v31  ;;  %2025 = vmatprep.subr.mxu1 %v3286_v32  ;;  %v3970_v31 = vld [vmem:[#allocation31_spill] sm:$0xff]  ;;  %v3971_v32 = vld [vmem:[#allocation33_spill] sm:$0xff] }
 0x507   :  { %1955 = vmatpush1.msra.mxu0 %v3290_v33  ;;  %2026 = vmatpush1.msra.mxu1 %v3292_v34  ;;  %v3972_v33 = vld [vmem:[#allocation34_spill] sm:$0xff]  ;;  %v3973_v34 = vld [vmem:[#allocation35_spill] sm:$0xff] }
 0x508   :  { %1956 = vmatprep.subr.mxu0 %v3296_v35  ;;  %2027 = vmatprep.subr.mxu1 %v3298_v37  ;;  %v3974_v35 = vld [vmem:[#allocation36_spill] sm:$0xff]  ;;  %v3975_v37 = vmov 0.0  }
 0x509   :  { %1957 = vmatpush1.msra.mxu0 %v3300_v39  ;;  %2028 = vmatpush1.msra.mxu1 %v3304_v40  ;;  %v3976_v39 = vld [vmem:[#allocation32_spill] sm:$0xff] }
 0x50a   :  { %1958 = vmatprep.subr.mxu0 %v3306_v41  ;;  %2029 = vmatprep.subr.mxu1 %v3308_v42  ;;  %v3977_v41 = vld [vmem:[#allocation53_spill] sm:$0xff] }
 0x50b   :  { %1959 = vmatpush1.msra.mxu0 %v3314_v43  ;;  %2030 = vmatpush1.msra.mxu1 %v3316_v44 }
 0x50c   :  { %1960 = vmatprep.subr.mxu0 %v3320_v45  ;;  %2031 = vmatprep.subr.mxu1 %v3322_v46  ;;  %v3978_v46 = vld [vmem:[#allocation55_spill] sm:$0xff] }
 0x50d   :  { %1961 = vmatpush1.msra.mxu0 %v3326_v48  ;;  %2032 = vmatpush1.msra.mxu1 %v3328_v49  ;;  %v3979_v49 = vld [vmem:[#allocation54_spill] sm:$0xff] }
 0x50e   :  { %1962 = vmatprep.subr.mxu0 %v3332_v50  ;;  %2033 = vmatprep.subr.mxu1 %v3334_v51 }
 0x50f   :  { %1963 = vmatpush1.msra.mxu0 %v3338_v52  ;;  %2034 = vmatpush1.msra.mxu1 %v3340_v53  ;;  %v3980_v53 = vld [vmem:[#allocation56_spill] sm:$0xff] }
 0x510   :  { %1964 = vmatprep.subr.mxu0 %v3344_v54  ;;  %2035 = vmatprep.subr.mxu1 %v3346_v55 }
 0x511   :  { %1965 = vmatpush1.msra.mxu0 %v3350_v57  ;;  %2036 = vmatpush1.msra.mxu1 %v3352_v58 }
 0x512   :  { %1966 = vmatprep.subr.mxu0 %v3356_v59  ;;  %2037 = vmatprep.subr.mxu1 %v3358_v10 }
 0x513   :  { %1967 = vmatpush1.msra.mxu0 %v3362_v47  ;;  %2038 = vmatpush1.msra.mxu1 %v3364_v5 }
 0x514   :  { %1968 = vmatprep.subr.mxu0 %v3956_v16  ;;  %2039 = vmatprep.subr.mxu1 %v3957_v38  ;;  %v2185_v16 = vld [vmem:[#allocation5 + $0x1b8] sm:$0xff]  ;;  %v2182_v38 = vld [vmem:[#allocation5 + $0x1a0] sm:$0xff] }
 0x515   :  { %1969 = vmatpush1.msra.mxu0 %v3958_v17  ;;  %2040 = vmatpush1.msra.mxu1 %v3959_v18  ;;  %v2184_v17 = vld [vmem:[#allocation5 + $0x1b0] sm:$0xff]  ;;  %v2179_v18 = vld [vmem:[#allocation5 + $0x188] sm:$0xff] }
 0x516   :  { %1970 = vmatprep.subr.mxu0 %v3960_v19  ;;  %2041 = vmatprep.subr.mxu1 %v3961_v21  ;;  %v2181_v19 = vld [vmem:[#allocation5 + $0x198] sm:$0xff]  ;;  %v2178_v21 = vld [vmem:[#allocation5 + $0x180] sm:$0xff] }
 0x517   :  { %1971 = vmatpush1.msra.mxu0 %v3962_v22  ;;  %2042 = vmatpush1.msra.mxu1 %v3963_v23  ;;  %v2180_v22 = vld [vmem:[#allocation5 + $0x190] sm:$0xff]  ;;  %v2175_v23 = vld [vmem:[#allocation5 + $0x168] sm:$0xff] }
 0x518   :  { %1972 = vmatprep.subr.mxu0 %v3964_v24  ;;  %2043 = vmatprep.subr.mxu1 %v3965_v25  ;;  %v2177_v24 = vld [vmem:[#allocation5 + $0x178] sm:$0xff]  ;;  %v2174_v25 = vld [vmem:[#allocation5 + $0x160] sm:$0xff] }
 0x519   :  { %1973 = vmatpush1.msra.mxu0 %v3966_v26  ;;  %2044 = vmatpush1.msra.mxu1 %v3967_v27  ;;  %v2176_v26 = vld [vmem:[#allocation5 + $0x170] sm:$0xff]  ;;  %v2171_v27 = vld [vmem:[#allocation5 + $0x148] sm:$0xff] }
 0x51a   :  { %1974 = vmatprep.subr.mxu0 %v3968_v28  ;;  %2045 = vmatprep.subr.mxu1 %v3969_v30  ;;  %v2173_v28 = vld [vmem:[#allocation5 + $0x158] sm:$0xff]  ;;  %v2170_v30 = vld [vmem:[#allocation5 + $0x140] sm:$0xff] }
 0x51b   :  { %1975 = vmatpush1.msra.mxu0 %v3970_v31  ;;  %2046 = vmatpush1.msra.mxu1 %v3971_v32  ;;  %v2172_v31 = vld [vmem:[#allocation5 + $0x150] sm:$0xff]  ;;  %v2167_v32 = vld [vmem:[#allocation5 + $0x128] sm:$0xff] }
 0x51c   :  { %1976 = vmatprep.subr.mxu0 %v3972_v33  ;;  %2047 = vmatprep.subr.mxu1 %v3973_v34  ;;  %v2169_v33 = vld [vmem:[#allocation5 + $0x138] sm:$0xff]  ;;  %v2166_v34 = vld [vmem:[#allocation5 + $0x120] sm:$0xff] }
 0x51d   :  { %1977 = vmatpush1.msra.mxu0 %v3974_v35  ;;  %2010 = vmatprep.mubr.f32.mxu0 %v3975_v37  ;;  %v2168_v35 = vld [vmem:[#allocation5 + $0x130] sm:$0xff] }
 0x51e   :  { %2048 = vmatpush1.msra.mxu1 %v3976_v39  ;;  %2081 = vmatprep.mubr.f32.mxu1 %v3975_v37  ;;  %v2165_v39 = vld [vmem:[#allocation5 + $0x118] sm:$0xff] }
 0x51f   :  { %2194 = vmatprep.subr.mxu0 %v2191_v60  ;;  %v2130_v60 = vld [vmem:[#allocation5] sm:$0xff] }
 0x5be   :  { %v1764_v40 = vpop.f32.mrf.mxu0  ;;  %v1835_v43 = vpop.f32.mrf.mxu1 }
 0x5bf   :  { %v1840_v42 = vadd.f32 %v1764_v40, %v3977_v41  ;;  %v1842_v50 = vadd.f32 %v1835_v43, %v3979_v49  ;;  %v2162_v40 = vld [vmem:[#allocation5 + $0x100] sm:$0xff]  ;;  %v2164_v41 = vld [vmem:[#allocation5 + $0x110] sm:$0xff]  ;;  %v2161_v43 = vld [vmem:[#allocation5 + $0xf8] sm:$0xff] }
 0x5c0   :  { %v1766_v44 = vpop.f32.mrf.mxu0  ;;  %v1837_v52 = vpop.f32.mrf.mxu1  ;;  %v2154_v49 = vld [vmem:[#allocation5 + $0xc0] sm:$0xff] }
 0x5c1   :  { %v1844_v45 = vmul.f32 0.5, %v1840_v42  ;;  %v1841_v48 = vadd.f32 %v1766_v44, %v3978_v46  ;;  %v1843_v54 = vadd.f32 %v1837_v52, %v3980_v53  ;;  %v2159_v42 = vld [vmem:[#allocation5 + $0xe8] sm:$0xff]  ;;  %v2158_v44 = vld [vmem:[#allocation5 + $0xe0] sm:$0xff]  ;;  %v2153_v52 = vld [vmem:[#allocation5 + $0xb8] sm:$0xff] }
 0x5c2   :  { %v2155_v46 = vld [vmem:[#allocation5 + $0xc8] sm:$0xff]  ;;  %v2150_v53 = vld [vmem:[#allocation5 + $0xa0] sm:$0xff] }
 0x5c3   :  { %2508 = vtanh.f32 %v1844_v45  ;;  %v1848_v51 = vmul.f32 0.5, %v1841_v48  ;;  %v1853_v55 = vmul.f32 0.5, %v1843_v54  ;;  %v2160_v45 = vld [vmem:[#allocation5 + $0xf0] sm:$0xff]  ;;  %v2157_v48 = vld [vmem:[#allocation5 + $0xd8] sm:$0xff] }
 0x5c4   :  { %v2152_v54 = vld [vmem:[#allocation5 + $0xb0] sm:$0xff] }
 0x5c5   :  { %2510 = vtanh.f32 %v1848_v51  ;;  %v2151_v51 = vld [vmem:[#allocation5 + $0xa8] sm:$0xff] }
 0x5c6   :  { %2512 = vtanh.f32 %v1842_v50  ;;  %v2156_v50 = vld [vmem:[#allocation5 + $0xd0] sm:$0xff] }
 0x5c7   :  { %2514 = vtanh.f32 %v1853_v55  ;;  %v2147_v55 = vld [vmem:[#allocation5 + $0x88] sm:$0xff] }
 0x5d0   :  { %v2509_v57 = vpop.eup %2508 }
 0x5d1   :  { %v1846_v58 = vmul.f32 0.5, %v2509_v57  ;;  %v2149_v57 = vld [vmem:[#allocation5 + $0x98] sm:$0xff] }
 0x5d2   :  { %v2511_v59 = vpop.eup %2510 }
 0x5d3   :  { %v1847_v10 = vadd.f32 0.5, %v1846_v58  ;;  %v1850_v47 = vmul.f32 0.5, %v2511_v59  ;;  %v2513_v5 = vpop.eup %2512  ;;  %v2146_v58 = vld [vmem:[#allocation5 + $0x80] sm:$0xff]  ;;  %v2148_v59 = vld [vmem:[#allocation5 + $0x90] sm:$0xff] }
 0x5d4   :  { %v2515_v20 = vpop.eup %2514 }
 0x5d5   :  { %v1851_v4 = vadd.f32 0.5, %v1850_v47  ;;  %v1858_v8 = vmul.f32 %v2513_v5, %v1847_v10  ;;  %v1855_v7 = vmul.f32 0.5, %v2515_v20  ;;  %v2143_v10 = vld [vmem:[#allocation5 + $0x68] sm:$0xff]  ;;  %v2145_v47 = vld [vmem:[#allocation5 + $0x78] sm:$0xff]  ;;  %v2142_v5 = vld [vmem:[#allocation5 + $0x60] sm:$0xff] }
 0x5d6   :  { %v2135_v20 = vld [vmem:[#allocation5 + $0x28] sm:$0xff] }
 0x5d7   :  { %v1857_v62 = vmul.f32 %v1851_v4, %v3594_v9  ;;  %v1856_v63 = vadd.f32 0.5, %v1855_v7  ;;  %v2144_v4 = vld [vmem:[#allocation5 + $0x70] sm:$0xff]  ;;  %v2137_v7 = vld [vmem:[#allocation5 + $0x38] sm:$0xff] }
 0x5d9   :  { %v1859_v3 = vadd.f32 %v1858_v8, %v1857_v62  ;;  %v2139_v8 = vld [vmem:[#allocation5 + $0x48] sm:$0xff]  ;;  %v2141_v62 = vld [vmem:[#allocation5 + $0x58] sm:$0xff] }
 0x5db   :  { %2516 = vtanh.f32 %v1859_v3  ;;  %v3671_v6 = vsel %vm1869_vm14, %v1859_v3, %v3594_v9  ;;  %v2193_v9 = vld [vmem:[#allocation5 + $0x1f8] sm:$0xff]  ;;  %v2140_v3 = vld [vmem:[#allocation5 + $0x50] sm:$0xff] }
 0x5dc   :  { %2265 = vmatprep.subr.mxu1 %v2193_v9  ;;  %v2132_v9 = vld [vmem:[#allocation5 + $0x10] sm:$0xff] }
 0x5e8   :  { %v2517_v61 = vpop.eup %2516 }
 0x5e9   :  { %v1861_v2 = vmul.f32 %v2517_v61, %v1856_v63  ;;  %v2134_v63 = vld [vmem:[#allocation5 + $0x20] sm:$0xff]  ;;  %v2136_v61 = vld [vmem:[#allocation5 + $0x30] sm:$0xff] }
 0x5eb   :  { %v1870_v15 = vsel %vm1869_vm14, %v1861_v2, 0.0  ;;  %v3674_v36 = vsel %vm1869_vm14, %v1861_v2, %v3597_v12  ;;  %v2183_v12 = vld [vmem:[#allocation5 + $0x1a8] sm:$0xff] }
 0x5ec   :  { %1872 = vst [vmem:[#allocation8 + $0x28] sm:$0xff] %v1870_v15  ;;  %2011 = vmatmul.mubr.f32.vlgmr.msra.gmra.mxu0 %v3674_v36  ;;  %2082 = vmatmul.mubr.f32.vlgmr.msra.gmra.mxu1 %v3674_v36  ;;  %v2131_v2 = vld [vmem:[#allocation5 + $0x8] sm:$0xff]  ;;  %v2133_v15 = vld [vmem:[#allocation5 + $0x18] sm:$0xff] }
 0x5ed   :  { %2258 = vmatprep.mubr.f32.mxu0 %v3975_v37  ;;  %2329 = vmatprep.mubr.f32.mxu1 %v3975_v37  ;;  %v2163_v37 = vld [vmem:[#allocation5 + $0x108] sm:$0xff] }
 0x5ee   :  { %2195 = vmatpush1.msra.mxu0 %v2190_v56  ;;  %2266 = vmatpush1.msra.mxu1 %v2192_v1  ;;  %v3981_v1 = vld [vmem:[#allocation57_spill] sm:$0xff] }
 0x5ef   :  { %2196 = vmatprep.subr.mxu0 %v2187_v29  ;;  %2267 = vmatprep.subr.mxu1 %v2189_v14 }
 0x5f0   :  { %2197 = vmatpush1.msra.mxu0 %v2186_v13  ;;  %2268 = vmatpush1.msra.mxu1 %v2188_v0 }
 0x5f1   :  { %2198 = vmatprep.subr.mxu0 %v2183_v12  ;;  %2269 = vmatprep.subr.mxu1 %v2185_v16  ;;  %v3982_v12 = vld [vmem:[#allocation59_spill] sm:$0xff] }
 0x5f2   :  { %2199 = vmatpush1.msra.mxu0 %v2182_v38  ;;  %2270 = vmatpush1.msra.mxu1 %v2184_v17  ;;  %v3983_v38 = vld [vmem:[#allocation58_spill] sm:$0xff] }
 0x5f3   :  { %2200 = vmatprep.subr.mxu0 %v2179_v18  ;;  %2271 = vmatprep.subr.mxu1 %v2181_v19 }
 0x5f4   :  { %2201 = vmatpush1.msra.mxu0 %v2178_v21  ;;  %2272 = vmatpush1.msra.mxu1 %v2180_v22  ;;  %v3984_v21 = vld [vmem:[#allocation60_spill] sm:$0xff] }
 0x5f5   :  { %2202 = vmatprep.subr.mxu0 %v2175_v23  ;;  %2273 = vmatprep.subr.mxu1 %v2177_v24 }
 0x5f6   :  { %2203 = vmatpush1.msra.mxu0 %v2174_v25  ;;  %2274 = vmatpush1.msra.mxu1 %v2176_v26 }
 0x5f7   :  { %2204 = vmatprep.subr.mxu0 %v2171_v27  ;;  %2275 = vmatprep.subr.mxu1 %v2173_v28 }
 0x5f8   :  { %2205 = vmatpush1.msra.mxu0 %v2170_v30  ;;  %2276 = vmatpush1.msra.mxu1 %v2172_v31 }
 0x5f9   :  { %2206 = vmatprep.subr.mxu0 %v2167_v32  ;;  %2277 = vmatprep.subr.mxu1 %v2169_v33  ;;  %v2116_v33 = vpop.permute.xlu0 %2115 }
 0x5fa   :  { %2207 = vmatpush1.msra.mxu0 %v2166_v34  ;;  %2278 = vmatpush1.msra.mxu1 %v2168_v35  ;;  %vm2117_vm15 = vcmp.eq.s32.totalorder %v2116_v33, 1 }
 0x5fb   :  { %2208 = vmatprep.subr.mxu0 %v2163_v37  ;;  %2279 = vmatprep.subr.mxu1 %v2165_v39 }
 0x5fc   :  { %2209 = vmatpush1.msra.mxu0 %v2162_v40  ;;  %2280 = vmatpush1.msra.mxu1 %v2164_v41 }
 0x5fd   :  { %2210 = vmatprep.subr.mxu0 %v2159_v42  ;;  %2281 = vmatprep.subr.mxu1 %v2161_v43 }
 0x5fe   :  { %2211 = vmatpush1.msra.mxu0 %v2158_v44  ;;  %2282 = vmatpush1.msra.mxu1 %v2160_v45 }
 0x5ff   :  { %2212 = vmatprep.subr.mxu0 %v2155_v46  ;;  %2283 = vmatprep.subr.mxu1 %v2157_v48  ;;  %v3985_v48 = vld [vmem:[#allocation61_spill] sm:$0xff] }
 0x600   :  { %2213 = vmatpush1.msra.mxu0 %v2154_v49  ;;  %2284 = vmatpush1.msra.mxu1 %v2156_v50 }
 0x601   :  { %2214 = vmatprep.subr.mxu0 %v2151_v51  ;;  %2285 = vmatprep.subr.mxu1 %v2153_v52 }
 0x602   :  { %2215 = vmatpush1.msra.mxu0 %v2150_v53  ;;  %2286 = vmatpush1.msra.mxu1 %v2152_v54  ;;  %v3986_v53 = vld [vmem:[#allocation63_spill] sm:$0xff] }
 0x603   :  { %2216 = vmatprep.subr.mxu0 %v2147_v55  ;;  %2287 = vmatprep.subr.mxu1 %v2149_v57 }
 0x604   :  { %2217 = vmatpush1.msra.mxu0 %v2146_v58  ;;  %2288 = vmatpush1.msra.mxu1 %v2148_v59  ;;  %v3988_v59 = vld [vmem:[#allocation64_spill] sm:$0xff] }
 0x605   :  { %2218 = vmatprep.subr.mxu0 %v2143_v10  ;;  %2289 = vmatprep.subr.mxu1 %v2145_v47 }
 0x606   :  { %2219 = vmatpush1.msra.mxu0 %v2142_v5  ;;  %2290 = vmatpush1.msra.mxu1 %v2144_v4 }
 0x607   :  { %2220 = vmatprep.subr.mxu0 %v2139_v8  ;;  %2291 = vmatprep.subr.mxu1 %v2141_v62 }
 0x608   :  { %2221 = vmatpush1.msra.mxu0 %v2138_v11  ;;  %2292 = vmatpush1.msra.mxu1 %v2140_v3 }
 0x609   :  { %2222 = vmatprep.subr.mxu0 %v2135_v20  ;;  %2293 = vmatprep.subr.mxu1 %v2137_v7  ;;  %v2364_v7 = vpop.permute.xlu1 %2363 }
 0x60a   :  { %2223 = vmatpush1.msra.mxu0 %v2134_v63  ;;  %2294 = vmatpush1.msra.mxu1 %v2136_v61  ;;  %vm2365_vm0 = vcmp.eq.s32.totalorder %v2364_v7, 1 }
 0x60b   :  { %2224 = vmatprep.subr.mxu0 %v2131_v2  ;;  %2295 = vmatprep.subr.mxu1 %v2133_v15 }
 0x60c   :  { %2225 = vmatpush1.msra.mxu0 %v2130_v60  ;;  %2296 = vmatpush1.msra.mxu1 %v2132_v9 }
 0x6ac   :  { %v2012_v56 = vpop.f32.mrf.mxu0  ;;  %v2083_v14 = vpop.f32.mrf.mxu1 }
 0x6ad   :  { %v2088_v29 = vadd.f32 %v2012_v56, %v3981_v1  ;;  %v2090_v17 = vadd.f32 %v2083_v14, %v3983_v38 }
 0x6ae   :  { %v2014_v13 = vpop.f32.mrf.mxu0  ;;  %v2085_v19 = vpop.f32.mrf.mxu1 }
 0x6af   :  { %v2092_v0 = vmul.f32 0.5, %v2088_v29  ;;  %v2089_v16 = vadd.f32 %v2014_v13, %v3982_v12  ;;  %v2091_v22 = vadd.f32 %v2085_v19, %v3984_v21 }
 0x6b1   :  { %2518 = vtanh.f32 %v2092_v0  ;;  %v2096_v18 = vmul.f32 0.5, %v2089_v16  ;;  %v2101_v23 = vmul.f32 0.5, %v2091_v22 }
 0x6b3   :  { %2520 = vtanh.f32 %v2096_v18 }
 0x6b4   :  { %2522 = vtanh.f32 %v2090_v17 }
 0x6b5   :  { %2524 = vtanh.f32 %v2101_v23 }
 0x6be   :  { %v2519_v24 = vpop.eup %2518 }
 0x6bf   :  { %v2094_v25 = vmul.f32 0.5, %v2519_v24 }
 0x6c0   :  { %v2521_v26 = vpop.eup %2520 }
 0x6c1   :  { %v2095_v27 = vadd.f32 0.5, %v2094_v25  ;;  %v2098_v28 = vmul.f32 0.5, %v2521_v26  ;;  %v2523_v30 = vpop.eup %2522 }
 0x6c2   :  { %v2525_v39 = vpop.eup %2524 }
 0x6c3   :  { %v2099_v31 = vadd.f32 0.5, %v2098_v28  ;;  %v2106_v32 = vmul.f32 %v2523_v30, %v2095_v27  ;;  %v2103_v40 = vmul.f32 0.5, %v2525_v39 }
 0x6c5   :  { %v2105_v34 = vmul.f32 %v2099_v31, %v3671_v6  ;;  %v2104_v41 = vadd.f32 0.5, %v2103_v40 }
 0x6c7   :  { %v2107_v35 = vadd.f32 %v2106_v32, %v2105_v34 }
 0x6c9   :  { %2526 = vtanh.f32 %v2107_v35  ;;  %v2122_v37 = vsel %vm2117_vm15, %v2107_v35, %v3671_v6  ;;  %v3987_v6 = vld [vmem:[#allocation62_spill] sm:$0xff] }
 0x6d6   :  { %v2527_v42 = vpop.eup %2526 }
 0x6d7   :  { %v2109_v43 = vmul.f32 %v2527_v42, %v2104_v41 }
 0x6d9   :  { %v2118_v44 = vsel %vm2117_vm15, %v2109_v43, 0.0  ;;  %v2121_v45 = vsel %vm2117_vm15, %v2109_v43, %v3674_v36 }
 0x6da   :  { %2120 = vst [vmem:[#allocation8 + $0x30] sm:$0xff] %v2118_v44  ;;  %2259 = vmatmul.mubr.f32.vlgmr.msra.gmra.mxu0 %v2121_v45  ;;  %2330 = vmatmul.mubr.f32.vlgmr.msra.gmra.mxu1 %v2121_v45 }
 0x79a   :  { %v2260_v46 = vpop.f32.mrf.mxu0  ;;  %v2331_v50 = vpop.f32.mrf.mxu1 }
 0x79b   :  { %v2336_v49 = vadd.f32 %v2260_v46, %v3985_v48  ;;  %v2338_v55 = vadd.f32 %v2331_v50, %v3987_v6 }
 0x79c   :  { %v2262_v51 = vpop.f32.mrf.mxu0  ;;  %v2333_v58 = vpop.f32.mrf.mxu1 }
 0x79d   :  { %v2340_v52 = vmul.f32 0.5, %v2336_v49  ;;  %v2337_v54 = vadd.f32 %v2262_v51, %v3986_v53  ;;  %v2339_v36 = vadd.f32 %v2333_v58, %v3988_v59 }
 0x79f   :  { %2528 = vtanh.f32 %v2340_v52  ;;  %v2344_v57 = vmul.f32 0.5, %v2337_v54  ;;  %v2349_v10 = vmul.f32 0.5, %v2339_v36 }
 0x7a1   :  { %2530 = vtanh.f32 %v2344_v57 }
 0x7a2   :  { %2532 = vtanh.f32 %v2338_v55 }
 0x7a3   :  { %2534 = vtanh.f32 %v2349_v10 }
 0x7ac   :  { %v2529_v47 = vpop.eup %2528 }
 0x7ad   :  { %v2342_v5 = vmul.f32 0.5, %v2529_v47 }
 0x7ae   :  { %v2531_v4 = vpop.eup %2530 }
 0x7af   :  { %v2343_v8 = vadd.f32 0.5, %v2342_v5  ;;  %v2346_v62 = vmul.f32 0.5, %v2531_v4  ;;  %v2533_v11 = vpop.eup %2532 }
 0x7b0   :  { %v2535_v15 = vpop.eup %2534 }
 0x7b1   :  { %v2347_v3 = vadd.f32 0.5, %v2346_v62  ;;  %v2354_v20 = vmul.f32 %v2533_v11, %v2343_v8  ;;  %v2351_v60 = vmul.f32 0.5, %v2535_v15 }
 0x7b3   :  { %v2353_v63 = vmul.f32 %v2347_v3, %v2122_v37  ;;  %v2352_v9 = vadd.f32 0.5, %v2351_v60 }
 0x7b5   :  { %v2355_v61 = vadd.f32 %v2354_v20, %v2353_v63 }
 0x7b7   :  { %2536 = vtanh.f32 %v2355_v61  ;;  %v2370_v2 = vsel %vm2365_vm0, %v2355_v61, %v2122_v37 }
 0x7b8   :  { %2372 = vst [vmem:[#allocation11] sm:$0xff] %v2370_v2 }
 0x7c4   :  { %v2537_v56 = vpop.eup %2536 }
 0x7c5   :  { %v2357_v1 = vmul.f32 %v2537_v56, %v2352_v9 }
 0x7c7   :  { %v2366_v29 = vsel %vm2365_vm0, %v2357_v1, 0.0  ;;  %v2369_v14 = vsel %vm2365_vm0, %v2357_v1, %v2121_v45 }
 0x7c8   :  { %2368 = vst [vmem:[#allocation8 + $0x38] sm:$0xff] %v2366_v29  ;;  %2371 = vst [vmem:[#allocation9] sm:$0xff] %v2369_v14 }
 0x7c9 PF:  { %s2631_s4 = smov [#allocation9]   ;;  %s2632_s24 = smov [#allocation8]  }
 0x7ca   :  { %s2391_s23 = sshll.u32 %s2631_s4, 4  ;;  %s2378_s25 = sshll.u32 %s2632_s24, 4  ;;  %s2392_s23 = int_to_ptr.vmem [resolvable:$true] %s2391_s23  ;;  %s2379_s25 = int_to_ptr.vmem [resolvable:$true] %s2378_s25 }
 0x7cb   :  { %s2558_s26 = scalar_lea.vmem %s2392_s23, 128  ;;  %p2563_p8 = scmp.lt.s32.totalorder %s2392_s23, %s2392_s23 }
 0x7cc   :  { %p2559_p7 = scmp.ne.s32.totalorder %s2392_s23, %s2558_s26  ;;  %p2564_p9 = scmp.lt.s32.totalorder %s2558_s26, %s2558_s26 }
 0x7ce   :  { %p2565_p10 = por %p2564_p9, %p2563_p8 }
 0x7d0   :  { %p2566_p11 = pnand %p2565_p10, %p2559_p7 }
 0x7d2   :  { %2569 = shalt.err (!%p2566_p11)
}
 0x7d3   :  { %2394 = dma.vmem_to_hbm [thread:$0]  %s2392_s23, 128, %s3707_s7, [#allocation10]  }
 0x7d4   :  { %s2578_s29 = scalar_lea.vmem %s2379_s25, 1024  ;;  %p2583_p13 = scmp.lt.s32.totalorder %s2379_s25, %s2379_s25 }
 0x7d5   :  { %p2579_p12 = scmp.ne.s32.totalorder %s2379_s25, %s2578_s29  ;;  %p2584_p0 = scmp.lt.s32.totalorder %s2578_s29, %s2578_s29 }
 0x7d7   :  { %p2585_p1 = por %p2584_p0, %p2583_p13 }
 0x7d9   :  { %p2586_p2 = pnand %p2585_p1, %p2579_p12 }
 0x7db   :  { %2589 = shalt.err (!%p2586_p2)
}
 0x7dc   :  { %s2633_s30 = smov 128   ;;  %s2634_s9 = smov 8  }
 0x7dd   :  { %2384 = dma.vmem_to_hbm [thread:$0]  %s2379_s25, 1024, %s3706_s6, [#allocation7], %s2633_s30, %s2633_s30, %s2634_s9  }
 0x7de   :  { %s2635_s11 = smov [#allocation11]  }
 0x7df   :  { %s2401_s12 = sshll.u32 %s2635_s11, 4  ;;  %s2402_s12 = int_to_ptr.vmem [resolvable:$true] %s2401_s12 }
 0x7e0   :  { %s2598_s13 = scalar_lea.vmem %s2402_s12, 128  ;;  %p2603_p4 = scmp.lt.s32.totalorder %s2402_s12, %s2402_s12 }
 0x7e1   :  { %p2599_p3 = scmp.ne.s32.totalorder %s2402_s12, %s2598_s13  ;;  %p2604_p5 = scmp.lt.s32.totalorder %s2598_s13, %s2598_s13 }
 0x7e3   :  { %p2605_p6 = por %p2604_p5, %p2603_p4 }
 0x7e5   :  { %p2606_p7 = pnand %p2605_p6, %p2599_p3 }
 0x7e7   :  { %2609 = shalt.err (!%p2606_p7)
}
 0x7e8   :  { %2404 = dma.vmem_to_hbm [thread:$0]  %s2402_s12, 128, %s3708_s8, [#allocation10]  }
 0x7e9   :  { %2620 = dma.done.wait [#allocation7], 1024  }
 0x7ea   :  { %2621 = vsyncadd [#allocation7], 4294966272 }
 0x7eb   :  { %2622 = dma.done.wait [#allocation10], 256  }
 0x7ec   :  { %2623 = vsyncadd [#allocation10], 4294967040 }
 0x7ed   :  { %2414 = vsyncpa [#allocation6], 1 }
 0x7ee   :  { %2415 = vsyncpa [#allocation7], 1 }
 0x7ef   :  { %2416 = vsyncpa [#allocation10], 1 }

// kernel: tpu_custom_call.1
= control target key start
LH: loop header
LB: loop body
LE: loop exit
PB: predicated region body
PF: predicated region fallthrough
CT: control target
= control target key end

     0   :  { %15 = vsyncpa [#allocation6], 0  ;;  %s3700_s0 = inlined_call_operand.<no memory space> [shape: s32[1], index: 0, kind: input, shape index: {}]   ;;  %s3701_s1 = inlined_call_operand.vmem [shape: f32[1,64,16], index: 1, kind: input, shape index: {}]   ;;  %s3702_s2 = inlined_call_operand.vmem [shape: f32[16,512], index: 2, kind: input, shape index: {}]   ;;  %s3703_s3 = inlined_call_operand.hbm [shape: f32[128,512], index: 3, kind: input, shape index: {}]   ;;  %s3704_s4 = inlined_call_operand.vmem [shape: f32[1,512], index: 4, kind: input, shape index: {}]   ;;  %s3705_s5 = inlined_call_operand.vmem [shape: s32[8,1], index: 5, kind: input, shape index: {}]   ;;  %s3706_s6 = inlined_call_operand.hbm [shape: f32[1,64,128], index: 6, kind: output, shape index: {0}]   ;;  %s3707_s7 = inlined_call_operand.hbm [shape: f32[8,128], index: 7, kind: output, shape index: {1}]   ;;  %s3708_s8 = inlined_call_operand.hbm [shape: f32[8,128], index: 8, kind: output, shape index: {2}]  }
   0x1   :  { %16 = vsyncpa [#allocation7], 0 }
   0x2   :  { %17 = vsyncpa [#allocation10], 0  ;;  %s2624_s27 = smov [#allocation5]  }
   0x3   :  { %s27_s28 = sshll.u32 %s2624_s27, 4  ;;  %s28_s28 = int_to_ptr.vmem [resolvable:$true] %s27_s28 }
   0x4   :  { %s2546_s29 = scalar_lea.vmem %s28_s28, 8192  ;;  %p2551_p1 = scmp.lt.s32.totalorder %s28_s28, %s28_s28 }
   0x5   :  { %p2547_p0 = scmp.ne.s32.totalorder %s28_s28, %s2546_s29  ;;  %p2552_p2 = scmp.lt.s32.totalorder %s2546_s29, %s2546_s29 }
   0x7   :  { %p2553_p3 = por %p2552_p2, %p2551_p1 }
   0x9   :  { %p2554_p4 = pnand %p2553_p3, %p2547_p0 }
   0xb   :  { %2557 = shalt.err (!%p2554_p4)
}
   0xc   :  { %s2625_s30 = smov 512   ;;  %s2626_s9 = smov 32  }
   0xd   :  { %33 = dma.hbm_to_vmem [thread:$0]  %s3703_s3, 8192, %s28_s28, [#allocation6], %s2625_s30, %s2625_s30, %s2626_s9  }
   0xe   :  { %2618 = dma.done.wait [#allocation6], 8192  }
   0xf   :  { %2619 = vsyncadd [#allocation6], 4294959104  ;;  %v2627_v0 = vmov 0.0   ;;  %p2425_p5 = scmp.gt.s32.totalorder %s3700_s0, 0 }
  0x10   :  { %46 = vst [vmem:[#allocation9] sm:$0xff] %v2627_v0  ;;  %47 = vst [vmem:[#allocation11] sm:$0xff] %v2627_v0 }
  0x11   :  { %52 = sbr.rel (%p2425_p5) target bundleno = 27 (0x1b), region = 33 }
  0x16   :  { %v2628_v1 = vmov 0.0  }
  0x17   :  { %53 = vst [vmem:[#allocation8] sm:$0xff] %v2628_v1  ;;  %54 = vst [vmem:[#allocation8 + $0x8] sm:$0xff] %v2628_v1 }
  0x18   :  { %55 = vst [vmem:[#allocation8 + $0x10] sm:$0xff] %v2628_v1  ;;  %56 = vst [vmem:[#allocation8 + $0x18] sm:$0xff] %v2628_v1 }
  0x19   :  { %57 = vst [vmem:[#allocation8 + $0x20] sm:$0xff] %v2628_v1  ;;  %58 = vst [vmem:[#allocation8 + $0x28] sm:$0xff] %v2628_v1 }
  0x1a   :  { %59 = vst [vmem:[#allocation8 + $0x30] sm:$0xff] %v2628_v1  ;;  %60 = vst [vmem:[#allocation8 + $0x38] sm:$0xff] %v2628_v1 }
  0x1b PF:  { %p2427_p6 = scmp.le.s32.totalorder %s3700_s0, 0 }
  0x1d   :  { %64 = sbr.rel (%p2427_p6) target bundleno = 1993 (0x7c9), region = 37 }
  0x22   :  { %v78_v2 = vld [vmem:[%s3702_s2 + $0x28] sm:$0xff]  ;;  %v80_v3 = vld [vmem:[%s3702_s2 + $0x38] sm:$0xff]  ;;  %v77_v4 = vld [vmem:[%s3702_s2 + $0x20] sm:$0xff]  ;;  %vm103_vm0 = vcmask 130048   ;;  %v3709_v11 = vmov 0.0  }
  0x23   :  { %156 = vmatprep.subr.mxu0 %v78_v2  ;;  %269 = vmatprep.subr.mxu1 %v80_v3  ;;  %v79_v5 = vld [vmem:[%s3702_s2 + $0x30] sm:$0xff]  ;;  %v74_v6 = vld [vmem:[%s3702_s2 + $0x8] sm:$0xff]  ;;  %v76_v7 = vld [vmem:[%s3702_s2 + $0x18] sm:$0xff] }
  0x24   :  { %157 = vmatpush1.msra.mxu0 %v77_v4  ;;  %270 = vmatpush1.msra.mxu1 %v79_v5  ;;  %v73_v8 = vld [vmem:[%s3702_s2] sm:$0xff]  ;;  %v75_v9 = vld [vmem:[%s3702_s2 + $0x10] sm:$0xff]  ;;  %v2718_v12 = vld [vmem:[#allocation5 + $0x1e8] sm:$0xff] }
  0x25   :  { %158 = vmatprep.subr.mxu0 %v74_v6  ;;  %271 = vmatprep.subr.mxu1 %v76_v7  ;;  %v65_v10 = vld [vmem:[%s3701_s1] sm:$0xff]  ;;  %v2720_v13 = vld [vmem:[#allocation5 + $0x1f8] sm:$0xff]  ;;  %v2725_v15 = vld [vmem:[#allocation5 + $0x1f0] sm:$0xff] }
  0x26   :  { %159 = vmatpush1.msra.mxu0 %v73_v8  ;;  %192 = vmatprep.mubr.f32.mxu0 %v3709_v11  ;;  %v2723_v14 = vld [vmem:[#allocation5 + $0x1e0] sm:$0xff]  ;;  %v2729_v16 = vld [vmem:[#allocation5 + $0x1c8] sm:$0xff]  ;;  %v2731_v17 = vld [vmem:[#allocation5 + $0x1d8] sm:$0xff] }
  0x27   :  { %272 = vmatpush1.msra.mxu1 %v75_v9  ;;  %305 = vmatprep.mubr.f32.mxu1 %v3709_v11  ;;  %v2737_v18 = vld [vmem:[#allocation5 + $0x1c0] sm:$0xff]  ;;  %v2739_v19 = vld [vmem:[#allocation5 + $0x1d0] sm:$0xff]  ;;  %v66_v20 = vld [vmem:[%s3701_s1 + $0x8] sm:$0xff] }
  0x28   :  { %2428 = vmatmul.mubr.msk.f32.vlgmr.msra.gmra.mxu0 %vm103_vm0, %v65_v10  ;;  %2436 = vmatmul.mubr.msk.f32.vlgmr.msra.gmra.mxu1 %vm103_vm0, %v65_v10  ;;  %v2748_v21 = vld [vmem:[#allocation5 + $0x1a8] sm:$0xff]  ;;  %v2750_v22 = vld [vmem:[#allocation5 + $0x1b8] sm:$0xff]  ;;  %v2754_v23 = vld [vmem:[#allocation5 + $0x1a0] sm:$0xff] }
  0x29   :  { %460 = vmatprep.subr.mxu0 %v2718_v12  ;;  %531 = vmatprep.subr.mxu1 %v2720_v13  ;;  %v2756_v24 = vld [vmem:[#allocation5 + $0x1b0] sm:$0xff]  ;;  %v2760_v25 = vld [vmem:[#allocation5 + $0x188] sm:$0xff]  ;;  %v2762_v26 = vld [vmem:[#allocation5 + $0x198] sm:$0xff] }
  0x2a   :  { %461 = vmatpush1.msra.mxu0 %v2723_v14  ;;  %532 = vmatpush1.msra.mxu1 %v2725_v15  ;;  %v2768_v27 = vld [vmem:[#allocation5 + $0x180] sm:$0xff]  ;;  %v2770_v28 = vld [vmem:[#allocation5 + $0x190] sm:$0xff]  ;;  %v2779_v30 = vld [vmem:[#allocation5 + $0x168] sm:$0xff] }
  0x2b   :  { %462 = vmatprep.subr.mxu0 %v2729_v16  ;;  %533 = vmatprep.subr.mxu1 %v2731_v17  ;;  %v67_v29 = vld [vmem:[%s3701_s1 + $0x10] sm:$0xff]  ;;  %v2781_v31 = vld [vmem:[#allocation5 + $0x178] sm:$0xff]  ;;  %v2785_v32 = vld [vmem:[#allocation5 + $0x160] sm:$0xff] }
  0x2c   :  { %198 = vmatprep.mubr.f32.mxu0 %v3709_v11  ;;  %311 = vmatprep.mubr.f32.mxu1 %v3709_v11  ;;  %v2787_v33 = vld [vmem:[#allocation5 + $0x170] sm:$0xff]  ;;  %v2791_v34 = vld [vmem:[#allocation5 + $0x148] sm:$0xff]  ;;  %v2793_v35 = vld [vmem:[#allocation5 + $0x158] sm:$0xff] }
  0x2d   :  { %463 = vmatpush1.msra.mxu0 %v2737_v18  ;;  %534 = vmatpush1.msra.mxu1 %v2739_v19  ;;  %v2799_v36 = vld [vmem:[#allocation5 + $0x140] sm:$0xff]  ;;  %v2801_v37 = vld [vmem:[#allocation5 + $0x150] sm:$0xff]  ;;  %v68_v38 = vld [vmem:[%s3701_s1 + $0x18] sm:$0xff] }
  0x2e   :  { %2429 = vmatmul.mubr.msk.f32.gmra.mxu0 %vm103_vm0, %v66_v20  ;;  %2437 = vmatmul.mubr.msk.f32.gmra.mxu1 %vm103_vm0, %v66_v20  ;;  %v2810_v39 = vld [vmem:[#allocation5 + $0x128] sm:$0xff]  ;;  %v2812_v40 = vld [vmem:[#allocation5 + $0x138] sm:$0xff]  ;;  %v2816_v41 = vld [vmem:[#allocation5 + $0x120] sm:$0xff] }
  0x2f   :  { %464 = vmatprep.subr.mxu0 %v2748_v21  ;;  %535 = vmatprep.subr.mxu1 %v2750_v22  ;;  %v2818_v42 = vld [vmem:[#allocation5 + $0x130] sm:$0xff]  ;;  %v2822_v43 = vld [vmem:[#allocation5 + $0x108] sm:$0xff]  ;;  %v2824_v44 = vld [vmem:[#allocation5 + $0x118] sm:$0xff] }
  0x30   :  { %465 = vmatpush1.msra.mxu0 %v2754_v23  ;;  %536 = vmatpush1.msra.mxu1 %v2756_v24  ;;  %v2830_v45 = vld [vmem:[#allocation5 + $0x100] sm:$0xff]  ;;  %v2832_v46 = vld [vmem:[#allocation5 + $0x110] sm:$0xff]  ;;  %v2841_v48 = vld [vmem:[#allocation5 + $0xe8] sm:$0xff] }
  0x31   :  { %466 = vmatprep.subr.mxu0 %v2760_v25  ;;  %537 = vmatprep.subr.mxu1 %v2762_v26  ;;  %v69_v47 = vld [vmem:[%s3701_s1 + $0x20] sm:$0xff]  ;;  %v2843_v49 = vld [vmem:[#allocation5 + $0xf8] sm:$0xff]  ;;  %v2849_v51 = vld [vmem:[#allocation5 + $0xf0] sm:$0xff] }
  0x32   :  { %204 = vmatprep.mubr.f32.mxu0 %v3709_v11  ;;  %317 = vmatprep.mubr.f32.mxu1 %v3709_v11  ;;  %v2847_v50 = vld [vmem:[#allocation5 + $0xe0] sm:$0xff]  ;;  %v2853_v52 = vld [vmem:[#allocation5 + $0xc8] sm:$0xff]  ;;  %v2855_v53 = vld [vmem:[#allocation5 + $0xd8] sm:$0xff] }
  0x33   :  { %467 = vmatpush1.msra.mxu0 %v2768_v27  ;;  %538 = vmatpush1.msra.mxu1 %v2770_v28  ;;  %v2861_v54 = vld [vmem:[#allocation5 + $0xc0] sm:$0xff]  ;;  %v2863_v55 = vld [vmem:[#allocation5 + $0xd0] sm:$0xff]  ;;  %v70_v56 = vld [vmem:[%s3701_s1 + $0x28] sm:$0xff] }
  0x34   :  { %2430 = vmatmul.mubr.msk.f32.gmra.mxu0 %vm103_vm0, %v67_v29  ;;  %2438 = vmatmul.mubr.msk.f32.gmra.mxu1 %vm103_vm0, %v67_v29  ;;  %v2872_v57 = vld [vmem:[#allocation5 + $0xa8] sm:$0xff]  ;;  %v2874_v58 = vld [vmem:[#allocation5 + $0xb8] sm:$0xff]  ;;  %v2878_v59 = vld [vmem:[#allocation5 + $0xa0] sm:$0xff] }
  0x35   :  { %468 = vmatprep.subr.mxu0 %v2779_v30  ;;  %539 = vmatprep.subr.mxu1 %v2781_v31  ;;  %v2880_v60 = vld [vmem:[#allocation5 + $0xb0] sm:$0xff]  ;;  %v2884_v61 = vld [vmem:[#allocation5 + $0x88] sm:$0xff]  ;;  %v2886_v62 = vld [vmem:[#allocation5 + $0x98] sm:$0xff] }
  0x36   :  { %469 = vmatpush1.msra.mxu0 %v2785_v32  ;;  %540 = vmatpush1.msra.mxu1 %v2787_v33  ;;  %3790 = vst [vmem:[#allocation15_spill] sm:$0xff] %v2880_v60  ;;  %3791 = vst [vmem:[#allocation16_spill] sm:$0xff] %v2884_v61  ;;  %v2892_v63 = vld [vmem:[#allocation5 + $0x80] sm:$0xff]  ;;  %v2894_v0 = vld [vmem:[#allocation5 + $0x90] sm:$0xff] }
  0x37   :  { %470 = vmatprep.subr.mxu0 %v2791_v34  ;;  %541 = vmatprep.subr.mxu1 %v2793_v35  ;;  %3792 = vst [vmem:[#allocation17_spill] sm:$0xff] %v2886_v62  ;;  %3793 = vst [vmem:[#allocation18_spill] sm:$0xff] %v2892_v63  ;;  %v71_v1 = vld [vmem:[%s3701_s1 + $0x30] sm:$0xff]  ;;  %v2903_v2 = vld [vmem:[#allocation5 + $0x68] sm:$0xff] }
  0x38   :  { %210 = vmatprep.mubr.f32.mxu0 %v3709_v11  ;;  %323 = vmatprep.mubr.f32.mxu1 %v3709_v11  ;;  %3794 = vst [vmem:[#allocation19_spill] sm:$0xff] %v2894_v0  ;;  %3795 = vst [vmem:[#allocation20_spill] sm:$0xff] %v2903_v2  ;;  %v2905_v3 = vld [vmem:[#allocation5 + $0x78] sm:$0xff]  ;;  %v2909_v4 = vld [vmem:[#allocation5 + $0x60] sm:$0xff] }
  0x39   :  { %471 = vmatpush1.msra.mxu0 %v2799_v36  ;;  %542 = vmatpush1.msra.mxu1 %v2801_v37  ;;  %3796 = vst [vmem:[#allocation21_spill] sm:$0xff] %v2905_v3  ;;  %3797 = vst [vmem:[#allocation22_spill] sm:$0xff] %v2909_v4  ;;  %v2911_v5 = vld [vmem:[#allocation5 + $0x70] sm:$0xff]  ;;  %v2915_v6 = vld [vmem:[#allocation5 + $0x48] sm:$0xff] }
  0x3a   :  { %2431 = vmatmul.mubr.msk.f32.gmra.mxu0 %vm103_vm0, %v68_v38  ;;  %2439 = vmatmul.mubr.msk.f32.gmra.mxu1 %vm103_vm0, %v68_v38  ;;  %3798 = vst [vmem:[#allocation23_spill] sm:$0xff] %v2911_v5  ;;  %3799 = vst [vmem:[#allocation24_spill] sm:$0xff] %v2915_v6  ;;  %v2917_v7 = vld [vmem:[#allocation5 + $0x58] sm:$0xff]  ;;  %v2923_v8 = vld [vmem:[#allocation5 + $0x40] sm:$0xff] }
  0x3b   :  { %472 = vmatprep.subr.mxu0 %v2810_v39  ;;  %543 = vmatprep.subr.mxu1 %v2812_v40  ;;  %3800 = vst [vmem:[#allocation25_spill] sm:$0xff] %v2917_v7  ;;  %3801 = vst [vmem:[#allocation26_spill] sm:$0xff] %v2923_v8  ;;  %v2925_v9 = vld [vmem:[#allocation5 + $0x50] sm:$0xff]  ;;  %v72_v10 = vld [vmem:[%s3701_s1 + $0x38] sm:$0xff] }
  0x3c   :  { %473 = vmatpush1.msra.mxu0 %v2816_v41  ;;  %544 = vmatpush1.msra.mxu1 %v2818_v42  ;;  %3802 = vst [vmem:[#allocation27_spill] sm:$0xff] %v2925_v9  ;;  %v2934_v20 = vld [vmem:[#allocation5 + $0x28] sm:$0xff]  ;;  %v2936_v29 = vld [vmem:[#allocation5 + $0x38] sm:$0xff]  ;;  %v2940_v38 = vld [vmem:[#allocation5 + $0x20] sm:$0xff] }
  0x3d   :  { %474 = vmatprep.subr.mxu0 %v2822_v43  ;;  %545 = vmatprep.subr.mxu1 %v2824_v44  ;;  %3803 = vst [vmem:[#allocation28_spill] sm:$0xff] %v2934_v20  ;;  %3804 = vst [vmem:[#allocation29_spill] sm:$0xff] %v2936_v29 }
  0x3e   :  { %216 = vmatprep.mubr.f32.mxu0 %v3709_v11  ;;  %329 = vmatprep.mubr.f32.mxu1 %v3709_v11  ;;  %3805 = vst [vmem:[#allocation30_spill] sm:$0xff] %v2940_v38 }
  0x3f   :  { %475 = vmatpush1.msra.mxu0 %v2830_v45  ;;  %546 = vmatpush1.msra.mxu1 %v2832_v46 }
  0x40   :  { %2432 = vmatmul.mubr.msk.f32.gmra.mxu0 %vm103_vm0, %v69_v47  ;;  %2440 = vmatmul.mubr.msk.f32.gmra.mxu1 %vm103_vm0, %v69_v47  ;;  %v2942_v47 = vld [vmem:[#allocation5 + $0x30] sm:$0xff] }
  0x41   :  { %476 = vmatprep.subr.mxu0 %v2841_v48  ;;  %547 = vmatprep.subr.mxu1 %v2843_v49  ;;  %3806 = vst [vmem:[#allocation31_spill] sm:$0xff] %v2942_v47 }
  0x42   :  { %477 = vmatpush1.msra.mxu0 %v2847_v50  ;;  %548 = vmatpush1.msra.mxu1 %v2849_v51 }
  0x43   :  { %478 = vmatprep.subr.mxu0 %v2853_v52  ;;  %549 = vmatprep.subr.mxu1 %v2855_v53 }
  0x44   :  { %222 = vmatprep.mubr.f32.mxu0 %v3709_v11  ;;  %335 = vmatprep.mubr.f32.mxu1 %v3709_v11 }
  0x45   :  { %479 = vmatpush1.msra.mxu0 %v2861_v54  ;;  %550 = vmatpush1.msra.mxu1 %v2863_v55 }
  0x46   :  { %2433 = vmatmul.mubr.msk.f32.gmra.mxu0 %vm103_vm0, %v70_v56  ;;  %2441 = vmatmul.mubr.msk.f32.gmra.mxu1 %vm103_vm0, %v70_v56  ;;  %v2947_v56 = vld [vmem:[%s3705_s5] sm:$0xff] }
  0x47   :  { %480 = vmatprep.subr.mxu0 %v2872_v57  ;;  %551 = vmatprep.subr.mxu1 %v2874_v58  ;;  %3807 = vst [vmem:[#allocation32_spill] sm:$0xff] %v2947_v56  ;;  %vm625_vm1 = vcmp.gt.s32.totalorder %v2947_v56, 0  ;;  %vm872_vm2 = vcmp.gt.s32.totalorder %v2947_v56, 1  ;;  %vm1616_vm3 = vcmp.gt.s32.totalorder %v2947_v56, 4  ;;  %vm2112_vm4 = vcmp.gt.s32.totalorder %v2947_v56, 6  ;;  %v3816_v56 = vld [vmem:[#allocation30_spill] sm:$0xff] }
  0x48   :  { %481 = vmatpush1.msra.mxu0 %v2878_v59  ;;  %552 = vmatpush1.msra.mxu1 %v2880_v60 }
  0x49   :  { %482 = vmatprep.subr.mxu0 %v2884_v61  ;;  %553 = vmatprep.subr.mxu1 %v2886_v62 }
  0x4a   :  { %228 = vmatprep.mubr.f32.mxu0 %v3709_v11  ;;  %341 = vmatprep.mubr.f32.mxu1 %v3709_v11 }
  0x4b   :  { %483 = vmatpush1.msra.mxu0 %v2892_v63  ;;  %554 = vmatpush1.msra.mxu1 %v2894_v0 }
  0x4c   :  { %2434 = vmatmul.mubr.msk.f32.gmra.mxu0 %vm103_vm0, %v71_v1  ;;  %2442 = vmatmul.mubr.msk.f32.gmra.mxu1 %vm103_vm0, %v71_v1  ;;  %v2951_v1 = vld [vmem:[#allocation5 + $0x8] sm:$0xff] }
  0x4d   :  { %484 = vmatprep.subr.mxu0 %v2903_v2  ;;  %555 = vmatprep.subr.mxu1 %v2905_v3  ;;  %3808 = vst [vmem:[#allocation33_spill] sm:$0xff] %v2951_v1 }
  0x4e   :  { %485 = vmatpush1.msra.mxu0 %v2909_v4  ;;  %556 = vmatpush1.msra.mxu1 %v2911_v5 }
  0x4f   :  { %486 = vmatprep.subr.mxu0 %v2915_v6  ;;  %557 = vmatprep.subr.mxu1 %v2917_v7 }
  0x50   :  { %234 = vmatprep.mubr.f32.mxu0 %v3709_v11  ;;  %347 = vmatprep.mubr.f32.mxu1 %v3709_v11  ;;  %v2953_v11 = vld [vmem:[#allocation5 + $0x18] sm:$0xff] }
  0x51   :  { %487 = vmatpush1.msra.mxu0 %v2923_v8  ;;  %558 = vmatpush1.msra.mxu1 %v2925_v9  ;;  %3809 = vst [vmem:[#allocation34_spill] sm:$0xff] %v2953_v11  ;;  %v2957_v9 = vld [vmem:[#allocation5] sm:$0xff]  ;;  %v2961_v8 = vld [vmem:[#allocation5 + $0x10] sm:$0xff] }
  0x52   :  { %2435 = vmatmul.mubr.msk.f32.gmra.mxu0 %vm103_vm0, %v72_v10  ;;  %2443 = vmatmul.mubr.msk.f32.gmra.mxu1 %vm103_vm0, %v72_v10  ;;  %3810 = vst [vmem:[#allocation35_spill] sm:$0xff] %v2957_v9  ;;  %3811 = vst [vmem:[#allocation36_spill] sm:$0xff] %v2961_v8  ;;  %v2966_v10 = vld [vmem:[#allocation9] sm:$0xff] }
  0x53   :  { %488 = vmatprep.subr.mxu0 %v2934_v20  ;;  %559 = vmatprep.subr.mxu1 %v2936_v29  ;;  %v3812_v20 = vmov 0.0  }
  0x54   :  { %489 = vmatpush1.msra.mxu0 %v2940_v38  ;;  %560 = vmatpush1.msra.mxu1 %v2942_v47  ;;  %v3723_v38 = vmov 0  }
  0x55   :  { %490 = vmatprep.subr.mxu0 %v2951_v1  ;;  %561 = vmatprep.subr.mxu1 %v2953_v11  ;;  %v626_v47 = vsel %vm625_vm1, 1, %v3723_v38 }
  0x56   :  { %491 = vmatpush1.msra.mxu0 %v2957_v9  ;;  %524 = vmatprep.mubr.f32.mxu0 %v3812_v20 }
  0x57   :  { %562 = vmatpush1.msra.mxu1 %v2961_v8  ;;  %595 = vmatprep.mubr.f32.mxu1 %v3812_v20  ;;  %v873_v8 = vsel %vm872_vm2, 1, %v3723_v38 }
  0x58   :  { %525 = vmatmul.mubr.f32.vlgmr.msra.gmra.mxu0 %v2966_v10  ;;  %596 = vmatmul.mubr.f32.vlgmr.msra.gmra.mxu1 %v2966_v10 }
  0x59   :  { %2456 = vset.pattern.permute.xlu0 %v3723_v38  ;;  %706 = vmatprep.subr.mxu0 %v2718_v12 }
  0x5a   :  { %628 = vperm.xlu0 %2456, %v626_v47   ;;  %777 = vmatprep.subr.mxu1 %v2720_v13  ;;  %v1617_v47 = vsel %vm1616_vm3, 1, %v3723_v38 }
  0x5b   :  { %707 = vmatpush1.msra.mxu0 %v2723_v14  ;;  %778 = vmatpush1.msra.mxu1 %v2725_v15 }
  0x5c   :  { %708 = vmatprep.subr.mxu0 %v2729_v16  ;;  %779 = vmatprep.subr.mxu1 %v2731_v17 }
  0x5d   :  { %709 = vmatpush1.msra.mxu0 %v2737_v18  ;;  %780 = vmatpush1.msra.mxu1 %v2739_v19 }
  0x5e   :  { %875 = vperm.xlu0 %2456, %v873_v8   ;;  %710 = vmatprep.subr.mxu0 %v2748_v21  ;;  %v2113_v8 = vsel %vm2112_vm4, 1, %v3723_v38  ;;  %v3815_v38 = vld [vmem:[#allocation28_spill] sm:$0xff] }
  0x5f   :  { %781 = vmatprep.subr.mxu1 %v2750_v22  ;;  %711 = vmatpush1.msra.mxu0 %v2754_v23 }
  0x60   :  { %782 = vmatpush1.msra.mxu1 %v2756_v24  ;;  %712 = vmatprep.subr.mxu0 %v2760_v25 }
  0x61   :  { %783 = vmatprep.subr.mxu1 %v2762_v26  ;;  %713 = vmatpush1.msra.mxu0 %v2768_v27 }
  0x62   :  { %1619 = vperm.xlu0 %2456, %v1617_v47   ;;  %784 = vmatpush1.msra.mxu1 %v2770_v28  ;;  %v3813_v47 = vld [vmem:[#allocation26_spill] sm:$0xff] }
  0x63   :  { %714 = vmatprep.subr.mxu0 %v2779_v30  ;;  %785 = vmatprep.subr.mxu1 %v2781_v31 }
  0x64   :  { %715 = vmatpush1.msra.mxu0 %v2785_v32  ;;  %786 = vmatpush1.msra.mxu1 %v2787_v33 }
  0x65   :  { %716 = vmatprep.subr.mxu0 %v2791_v34  ;;  %787 = vmatprep.subr.mxu1 %v2793_v35 }
  0x66   :  { %2115 = vperm.xlu0 %2456, %v2113_v8   ;;  %717 = vmatpush1.msra.mxu0 %v2799_v36  ;;  %v3814_v8 = vld [vmem:[#allocation27_spill] sm:$0xff] }
  0x67   :  { %788 = vmatpush1.msra.mxu1 %v2801_v37  ;;  %718 = vmatprep.subr.mxu0 %v2810_v39 }
  0x68   :  { %789 = vmatprep.subr.mxu1 %v2812_v40  ;;  %719 = vmatpush1.msra.mxu0 %v2816_v41 }
  0x69   :  { %790 = vmatpush1.msra.mxu1 %v2818_v42  ;;  %720 = vmatprep.subr.mxu0 %v2822_v43 }
  0x6a   :  { %791 = vmatprep.subr.mxu1 %v2824_v44  ;;  %721 = vmatpush1.msra.mxu0 %v2830_v45 }
  0x6b   :  { %792 = vmatpush1.msra.mxu1 %v2832_v46  ;;  %722 = vmatprep.subr.mxu0 %v2841_v48 }
  0x6c   :  { %793 = vmatprep.subr.mxu1 %v2843_v49  ;;  %723 = vmatpush1.msra.mxu0 %v2847_v50 }
  0x6d   :  { %794 = vmatpush1.msra.mxu1 %v2849_v51  ;;  %724 = vmatprep.subr.mxu0 %v2853_v52 }
  0x6e   :  { %795 = vmatprep.subr.mxu1 %v2855_v53  ;;  %725 = vmatpush1.msra.mxu0 %v2861_v54 }
  0x6f   :  { %796 = vmatpush1.msra.mxu1 %v2863_v55  ;;  %726 = vmatprep.subr.mxu0 %v2872_v57 }
  0x70   :  { %797 = vmatprep.subr.mxu1 %v2874_v58  ;;  %727 = vmatpush1.msra.mxu0 %v2878_v59 }
  0x71   :  { %798 = vmatpush1.msra.mxu1 %v2880_v60  ;;  %728 = vmatprep.subr.mxu0 %v2884_v61 }
  0x72   :  { %799 = vmatprep.subr.mxu1 %v2886_v62  ;;  %729 = vmatpush1.msra.mxu0 %v2892_v63 }
  0x73   :  { %800 = vmatpush1.msra.mxu1 %v2894_v0  ;;  %730 = vmatprep.subr.mxu0 %v2903_v2  ;;  %v3817_v2 = vld [vmem:[#allocation31_spill] sm:$0xff] }
  0x74   :  { %801 = vmatprep.subr.mxu1 %v2905_v3  ;;  %731 = vmatpush1.msra.mxu0 %v2909_v4 }
  0x75   :  { %802 = vmatpush1.msra.mxu1 %v2911_v5  ;;  %732 = vmatprep.subr.mxu0 %v2915_v6 }
  0x76   :  { %803 = vmatprep.subr.mxu1 %v2917_v7  ;;  %733 = vmatpush1.msra.mxu0 %v3813_v47  ;;  %v3818_v7 = vld [vmem:[#allocation36_spill] sm:$0xff] }
  0x77   :  { %804 = vmatpush1.msra.mxu1 %v3814_v8  ;;  %734 = vmatprep.subr.mxu0 %v3815_v38 }
  0x78   :  { %805 = vmatprep.subr.mxu1 %v2936_v29  ;;  %735 = vmatpush1.msra.mxu0 %v3816_v56  ;;  %v3819_v29 = vmov 0   ;;  %v83_v56 = vlaneseq }
  0x79   :  { %806 = vmatpush1.msra.mxu1 %v3817_v2  ;;  %736 = vmatprep.subr.mxu0 %v2951_v1 }
  0x7a   :  { %807 = vmatprep.subr.mxu1 %v2953_v11  ;;  %737 = vmatpush1.msra.mxu0 %v2957_v9  ;;  %v84_v2 = vshrl.u32 %v83_v56, 7 }
  0x7b   :  { %770 = vmatprep.mubr.f32.mxu0 %v3812_v20  ;;  %808 = vmatpush1.msra.mxu1 %v3818_v7  ;;  %v81_v7 = vld [vmem:[%s3704_s4] sm:$0xf] }
  0x7c   :  { %841 = vmatprep.mubr.f32.mxu1 %v3812_v20  ;;  %954 = vmatprep.subr.mxu0 %v2718_v12  ;;  %v85_v11 = vsub.s32 0, %v84_v2  ;;  %v93_v9 = vsub.s32 2, %v84_v2  ;;  %v89_v12 = vsub.s32 1, %v84_v2 }
  0x7d   :  { %1025 = vmatprep.subr.mxu1 %v2720_v13  ;;  %2457 = vset.pattern.permute.xlu1 %v3819_v29  ;;  %v97_v13 = vsub.s32 3, %v84_v2 }
  0x7e   :  { %v86_v47 = vrot.slane %v81_v7, %v85_v11  ;;  %v3062_v29 = vrot.slane %v81_v7, %v93_v9  ;;  %v90_v5 = vrot.slane %v81_v7, %v89_v12 }
  0x7f   :  { %v3064_v4 = vrot.slane %v81_v7, %v97_v13 }
  0xe8   :  { %v3051_v38 = vpop.f32.mrf.mxu0  ;;  %v3053_v1 = vpop.f32.mrf.mxu1 }
  0xea   :  { %v3058_v8 = vpop.f32.mrf.mxu0  ;;  %v3060_v20 = vpop.f32.mrf.mxu1 }
  0xee   :  { %v200_v56 = vpop.f32.mrf.mxu0  ;;  %v313_v6 = vpop.f32.mrf.mxu1 }
  0xef   :  { %v3066_v3 = vadd.f32 %v200_v56, %v86_v47  ;;  %v3069_v0 = vadd.f32 %v313_v6, %v3062_v29 }
  0xf0   :  { %v202_v63 = vpop.f32.mrf.mxu0  ;;  %v315_v62 = vpop.f32.mrf.mxu1 }
  0xf1   :  { %3820 = vst [vmem:[#allocation37_spill] sm:$0xff] %v3066_v3  ;;  %3821 = vst [vmem:[#allocation38_spill] sm:$0xff] %v3069_v0  ;;  %v3071_v61 = vadd.f32 %v202_v63, %v90_v5  ;;  %v3074_v60 = vadd.f32 %v315_v62, %v3064_v4 }
  0xf3   :  { %3822 = vst [vmem:[#allocation39_spill] sm:$0xff] %v3071_v61  ;;  %3823 = vst [vmem:[#allocation40_spill] sm:$0xff] %v3074_v60 }
  0xf4   :  { %v206_v11 = vpop.f32.mrf.mxu0  ;;  %v319_v2 = vpop.f32.mrf.mxu1 }
  0xf5   :  { %v3076_v9 = vadd.f32 %v206_v11, %v86_v47  ;;  %v3079_v12 = vadd.f32 %v319_v2, %v3062_v29 }
  0xf6   :  { %v208_v7 = vpop.f32.mrf.mxu0  ;;  %v321_v13 = vpop.f32.mrf.mxu1 }
  0xf7   :  { %3824 = vst [vmem:[#allocation41_spill] sm:$0xff] %v3076_v9  ;;  %3825 = vst [vmem:[#allocation42_spill] sm:$0xff] %v3079_v12  ;;  %v3081_v56 = vadd.f32 %v208_v7, %v90_v5  ;;  %v3084_v6 = vadd.f32 %v321_v13, %v3064_v4 }
  0xf9   :  { %3826 = vst [vmem:[#allocation43_spill] sm:$0xff] %v3081_v56  ;;  %3827 = vst [vmem:[#allocation44_spill] sm:$0xff] %v3084_v6 }
  0xfa   :  { %v212_v0 = vpop.f32.mrf.mxu0  ;;  %v325_v63 = vpop.f32.mrf.mxu1 }
  0xfb   :  { %v3086_v61 = vadd.f32 %v212_v0, %v86_v47  ;;  %v3089_v62 = vadd.f32 %v325_v63, %v3062_v29 }
  0xfc   :  { %v214_v60 = vpop.f32.mrf.mxu0  ;;  %v327_v11 = vpop.f32.mrf.mxu1 }
  0xfd   :  { %3828 = vst [vmem:[#allocation45_spill] sm:$0xff] %v3086_v61  ;;  %3829 = vst [vmem:[#allocation46_spill] sm:$0xff] %v3089_v62  ;;  %v3091_v9 = vadd.f32 %v214_v60, %v90_v5  ;;  %v3094_v2 = vadd.f32 %v327_v11, %v3064_v4 }
  0xff   :  { %3830 = vst [vmem:[#allocation47_spill] sm:$0xff] %v3091_v9  ;;  %3831 = vst [vmem:[#allocation48_spill] sm:$0xff] %v3094_v2 }
 0x100   :  { %v218_v12 = vpop.f32.mrf.mxu0  ;;  %v331_v7 = vpop.f32.mrf.mxu1 }
 0x101   :  { %v3096_v56 = vadd.f32 %v218_v12, %v86_v47  ;;  %v3099_v13 = vadd.f32 %v331_v7, %v3062_v29 }
 0x102   :  { %v220_v6 = vpop.f32.mrf.mxu0  ;;  %v333_v0 = vpop.f32.mrf.mxu1 }
 0x103   :  { %3832 = vst [vmem:[#allocation49_spill] sm:$0xff] %v3096_v56  ;;  %3833 = vst [vmem:[#allocation50_spill] sm:$0xff] %v3099_v13  ;;  %v3101_v61 = vadd.f32 %v220_v6, %v90_v5  ;;  %v3104_v63 = vadd.f32 %v333_v0, %v3064_v4 }
 0x105   :  { %3834 = vst [vmem:[#allocation51_spill] sm:$0xff] %v3101_v61  ;;  %3835 = vst [vmem:[#allocation52_spill] sm:$0xff] %v3104_v63 }
 0x106   :  { %v224_v62 = vpop.f32.mrf.mxu0  ;;  %v337_v60 = vpop.f32.mrf.mxu1 }
 0x107   :  { %v3106_v9 = vadd.f32 %v224_v62, %v86_v47  ;;  %v3109_v11 = vadd.f32 %v337_v60, %v3062_v29 }
 0x108   :  { %v226_v2 = vpop.f32.mrf.mxu0  ;;  %v339_v12 = vpop.f32.mrf.mxu1 }
 0x109   :  { %3836 = vst [vmem:[#allocation53_spill] sm:$0xff] %v3106_v9  ;;  %3837 = vst [vmem:[#allocation54_spill] sm:$0xff] %v3109_v11  ;;  %v3111_v56 = vadd.f32 %v226_v2, %v90_v5  ;;  %v3114_v7 = vadd.f32 %v339_v12, %v3064_v4 }
 0x10b   :  { %3838 = vst [vmem:[#allocation55_spill] sm:$0xff] %v3111_v56  ;;  %3839 = vst [vmem:[#allocation56_spill] sm:$0xff] %v3114_v7 }
 0x10c   :  { %v230_v13 = vpop.f32.mrf.mxu0  ;;  %v343_v6 = vpop.f32.mrf.mxu1 }
 0x10d   :  { %v3116_v61 = vadd.f32 %v230_v13, %v86_v47  ;;  %v3119_v0 = vadd.f32 %v343_v6, %v3062_v29 }
 0x10e   :  { %v232_v63 = vpop.f32.mrf.mxu0  ;;  %v345_v62 = vpop.f32.mrf.mxu1 }
 0x10f   :  { %3840 = vst [vmem:[#allocation57_spill] sm:$0xff] %v3116_v61  ;;  %3841 = vst [vmem:[#allocation58_spill] sm:$0xff] %v3119_v0  ;;  %v3121_v9 = vadd.f32 %v232_v63, %v90_v5  ;;  %v3124_v60 = vadd.f32 %v345_v62, %v3064_v4  ;;  %v195_v63 = vadd.f32 %v3051_v38, %v86_v47 }
 0x110   :  { %v197_v62 = vadd.f32 %v3058_v8, %v90_v5 }
 0x111   :  { %3842 = vst [vmem:[#allocation59_spill] sm:$0xff] %v3121_v9  ;;  %3843 = vst [vmem:[#allocation60_spill] sm:$0xff] %v3124_v60 }
 0x112   :  { %v236_v11 = vpop.f32.mrf.mxu0  ;;  %v349_v2 = vpop.f32.mrf.mxu1 }
 0x113   :  { %v3126_v56 = vadd.f32 %v236_v11, %v86_v47  ;;  %v3129_v12 = vadd.f32 %v349_v2, %v3062_v29  ;;  %v308_v2 = vadd.f32 %v3053_v1, %v3062_v29  ;;  %v629_v29 = vpop.permute.xlu0 %628 }
 0x114   :  { %v238_v7 = vpop.f32.mrf.mxu0  ;;  %v351_v13 = vpop.f32.mrf.mxu1  ;;  %vm630_vm5 = vcmp.eq.s32.totalorder %v629_v29, 1 }
 0x115   :  { %3844 = vst [vmem:[#allocation61_spill] sm:$0xff] %v3126_v56  ;;  %3845 = vst [vmem:[#allocation62_spill] sm:$0xff] %v3129_v12  ;;  %v3131_v61 = vadd.f32 %v238_v7, %v90_v5  ;;  %v3134_v6 = vadd.f32 %v351_v13, %v3064_v4  ;;  %v310_v13 = vadd.f32 %v3060_v20, %v3064_v4 }
 0x117   :  { %3846 = vst [vmem:[#allocation63_spill] sm:$0xff] %v3131_v61  ;;  %3847 = vst [vmem:[#allocation64_spill] sm:$0xff] %v3134_v6  ;;  %v3416_v6 = vld [vmem:[#allocation5 + $0x8] sm:$0xff] }
 0x118   :  { %v526_v0 = vpop.f32.mrf.mxu0  ;;  %v597_v56 = vpop.f32.mrf.mxu1 }
 0x119   :  { %v602_v60 = vadd.f32 %v526_v0, %v195_v63  ;;  %v604_v7 = vadd.f32 %v597_v56, %v308_v2  ;;  %v388_v63 = vld [vmem:[#allocation11] sm:$0xff] }
 0x11a   :  { %v528_v9 = vpop.f32.mrf.mxu0  ;;  %v599_v61 = vpop.f32.mrf.mxu1 }
 0x11b   :  { %v606_v3 = vmul.f32 0.5, %v602_v60  ;;  %v603_v11 = vadd.f32 %v528_v9, %v197_v62  ;;  %v605_v38 = vadd.f32 %v599_v61, %v310_v13 }
 0x11d   :  { %2458 = vtanh.f32 %v606_v3  ;;  %v610_v12 = vmul.f32 0.5, %v603_v11  ;;  %v615_v47 = vmul.f32 0.5, %v605_v38 }
 0x11f   :  { %2460 = vtanh.f32 %v610_v12 }
 0x120   :  { %2462 = vtanh.f32 %v604_v7 }
 0x121   :  { %2464 = vtanh.f32 %v615_v47 }
 0x12a   :  { %v2459_v5 = vpop.eup %2458 }
 0x12b   :  { %v608_v8 = vmul.f32 0.5, %v2459_v5 }
 0x12c   :  { %v2461_v0 = vpop.eup %2460 }
 0x12d   :  { %v609_v60 = vadd.f32 0.5, %v608_v8  ;;  %v612_v9 = vmul.f32 0.5, %v2461_v0  ;;  %v2463_v3 = vpop.eup %2462 }
 0x12e   :  { %v2465_v4 = vpop.eup %2464 }
 0x12f   :  { %v613_v62 = vadd.f32 0.5, %v612_v9  ;;  %v620_v56 = vmul.f32 %v2463_v3, %v609_v60  ;;  %v617_v61 = vmul.f32 0.5, %v2465_v4 }
 0x131   :  { %v619_v1 = vmul.f32 %v613_v62, %v388_v63  ;;  %v618_v20 = vadd.f32 0.5, %v617_v61 }
 0x133   :  { %v621_v12 = vadd.f32 %v620_v56, %v619_v1  ;;  %v876_v1 = vpop.permute.xlu0 %875 }
 0x134   :  { %vm877_vm10 = vcmp.eq.s32.totalorder %v876_v1, 1  ;;  %v3392_v1 = vld [vmem:[#allocation5 + $0x48] sm:$0xff] }
 0x135   :  { %2466 = vtanh.f32 %v621_v12  ;;  %v3142_v11 = vsel %vm630_vm5, %v621_v12, %v388_v63 }
 0x142   :  { %v2467_v2 = vpop.eup %2466 }
 0x143   :  { %v623_v7 = vmul.f32 %v2467_v2, %v618_v20 }
 0x145   :  { %v631_v13 = vsel %vm630_vm5, %v623_v7, 0.0  ;;  %v3145_v38 = vsel %vm630_vm5, %v623_v7, %v2966_v10 }
 0x146   :  { %632 = vst [vmem:[#allocation8] sm:$0xff] %v631_v13  ;;  %771 = vmatmul.mubr.f32.vlgmr.msra.gmra.mxu0 %v3145_v38  ;;  %842 = vmatmul.mubr.f32.vlgmr.msra.gmra.mxu1 %v3145_v38 }
 0x147   :  { %955 = vmatpush1.msra.mxu0 %v2723_v14  ;;  %1026 = vmatpush1.msra.mxu1 %v2725_v15  ;;  %v3848_v14 = vld [vmem:[#allocation15_spill] sm:$0xff]  ;;  %v3849_v15 = vld [vmem:[#allocation16_spill] sm:$0xff] }
 0x148   :  { %956 = vmatprep.subr.mxu0 %v2729_v16  ;;  %1027 = vmatprep.subr.mxu1 %v2731_v17  ;;  %v3850_v16 = vld [vmem:[#allocation17_spill] sm:$0xff]  ;;  %v3851_v17 = vld [vmem:[#allocation18_spill] sm:$0xff] }
 0x149   :  { %957 = vmatpush1.msra.mxu0 %v2737_v18  ;;  %1028 = vmatpush1.msra.mxu1 %v2739_v19  ;;  %v3852_v18 = vld [vmem:[#allocation19_spill] sm:$0xff]  ;;  %v3853_v19 = vld [vmem:[#allocation20_spill] sm:$0xff] }
 0x14a   :  { %958 = vmatprep.subr.mxu0 %v2748_v21  ;;  %1029 = vmatprep.subr.mxu1 %v2750_v22  ;;  %v3854_v21 = vld [vmem:[#allocation21_spill] sm:$0xff]  ;;  %v3855_v22 = vld [vmem:[#allocation22_spill] sm:$0xff] }
 0x14b   :  { %959 = vmatpush1.msra.mxu0 %v2754_v23  ;;  %1030 = vmatpush1.msra.mxu1 %v2756_v24  ;;  %v3856_v23 = vld [vmem:[#allocation23_spill] sm:$0xff]  ;;  %v3857_v24 = vld [vmem:[#allocation24_spill] sm:$0xff] }
 0x14c   :  { %960 = vmatprep.subr.mxu0 %v2760_v25  ;;  %1031 = vmatprep.subr.mxu1 %v2762_v26  ;;  %v3858_v25 = vld [vmem:[#allocation25_spill] sm:$0xff]  ;;  %v3859_v26 = vld [vmem:[#allocation26_spill] sm:$0xff] }
 0x14d   :  { %961 = vmatpush1.msra.mxu0 %v2768_v27  ;;  %1032 = vmatpush1.msra.mxu1 %v2770_v28  ;;  %v3860_v27 = vld [vmem:[#allocation27_spill] sm:$0xff]  ;;  %v3861_v28 = vld [vmem:[#allocation28_spill] sm:$0xff]  ;;  %3886 = vst [vmem:[#allocation25_spill] sm:$0xff] %v3392_v1 }
 0x14e   :  { %962 = vmatprep.subr.mxu0 %v2779_v30  ;;  %1033 = vmatprep.subr.mxu1 %v2781_v31  ;;  %v3862_v30 = vld [vmem:[#allocation29_spill] sm:$0xff]  ;;  %v3863_v31 = vld [vmem:[#allocation30_spill] sm:$0xff] }
 0x14f   :  { %963 = vmatpush1.msra.mxu0 %v2785_v32  ;;  %1034 = vmatpush1.msra.mxu1 %v2787_v33  ;;  %v3864_v32 = vld [vmem:[#allocation31_spill] sm:$0xff]  ;;  %v3865_v33 = vld [vmem:[#allocation33_spill] sm:$0xff] }
 0x150   :  { %964 = vmatprep.subr.mxu0 %v2791_v34  ;;  %1035 = vmatprep.subr.mxu1 %v2793_v35  ;;  %v3866_v34 = vld [vmem:[#allocation34_spill] sm:$0xff]  ;;  %v3867_v35 = vld [vmem:[#allocation35_spill] sm:$0xff] }
 0x151   :  { %965 = vmatpush1.msra.mxu0 %v2799_v36  ;;  %1036 = vmatpush1.msra.mxu1 %v2801_v37  ;;  %v3868_v36 = vmov 0.0   ;;  %v3869_v37 = vld [vmem:[#allocation36_spill] sm:$0xff]  ;;  %3894 = vst [vmem:[#allocation34_spill] sm:$0xff] %v3416_v6 }
 0x152   :  { %966 = vmatprep.subr.mxu0 %v2810_v39  ;;  %1037 = vmatprep.subr.mxu1 %v2812_v40  ;;  %v3870_v39 = vld [vmem:[#allocation32_spill] sm:$0xff]  ;;  %v3871_v40 = vmov 0  }
 0x153   :  { %967 = vmatpush1.msra.mxu0 %v2816_v41  ;;  %1038 = vmatpush1.msra.mxu1 %v2818_v42  ;;  %vm1120_vm6 = vcmp.gt.s32.totalorder %v3870_v39, 2  ;;  %vm1368_vm7 = vcmp.gt.s32.totalorder %v3870_v39, 3  ;;  %vm1864_vm8 = vcmp.gt.s32.totalorder %v3870_v39, 5  ;;  %vm2360_vm9 = vcmp.gt.s32.totalorder %v3870_v39, 7  ;;  %v3300_v39 = vld [vmem:[#allocation5 + $0x140] sm:$0xff] }
 0x154   :  { %968 = vmatprep.subr.mxu0 %v2822_v43  ;;  %1039 = vmatprep.subr.mxu1 %v2824_v44  ;;  %v1121_v41 = vsel %vm1120_vm6, 1, %v3871_v40  ;;  %v1369_v42 = vsel %vm1368_vm7, 1, %v3871_v40  ;;  %v1865_v43 = vsel %vm1864_vm8, 1, %v3871_v40  ;;  %v2361_v44 = vsel %vm2360_vm9, 1, %v3871_v40  ;;  %v3304_v40 = vld [vmem:[#allocation5 + $0x150] sm:$0xff] }
 0x155   :  { %969 = vmatpush1.msra.mxu0 %v2830_v45  ;;  %1040 = vmatpush1.msra.mxu1 %v2832_v46  ;;  %v3872_v46 = vld [vmem:[#allocation37_spill] sm:$0xff] }
 0x156   :  { %970 = vmatprep.subr.mxu0 %v2841_v48  ;;  %1041 = vmatprep.subr.mxu1 %v2843_v49 }
 0x157   :  { %971 = vmatpush1.msra.mxu0 %v2847_v50  ;;  %1042 = vmatpush1.msra.mxu1 %v2849_v51 }
 0x158   :  { %972 = vmatprep.subr.mxu0 %v2853_v52  ;;  %1043 = vmatprep.subr.mxu1 %v2855_v53  ;;  %v3873_v52 = vld [vmem:[#allocation39_spill] sm:$0xff] }
 0x159   :  { %973 = vmatpush1.msra.mxu0 %v2861_v54  ;;  %1044 = vmatpush1.msra.mxu1 %v2863_v55  ;;  %v3874_v54 = vld [vmem:[#allocation38_spill] sm:$0xff] }
 0x15a   :  { %974 = vmatprep.subr.mxu0 %v2872_v57  ;;  %1045 = vmatprep.subr.mxu1 %v2874_v58 }
 0x15b   :  { %975 = vmatpush1.msra.mxu0 %v2878_v59  ;;  %1046 = vmatpush1.msra.mxu1 %v3848_v14  ;;  %v3875_v59 = vld [vmem:[#allocation40_spill] sm:$0xff] }
 0x15c   :  { %976 = vmatprep.subr.mxu0 %v3849_v15  ;;  %1047 = vmatprep.subr.mxu1 %v3850_v16  ;;  %v3238_v15 = vld [vmem:[#allocation5 + $0x1f8] sm:$0xff]  ;;  %v3242_v16 = vld [vmem:[#allocation5 + $0x1e0] sm:$0xff] }
 0x15d   :  { %977 = vmatpush1.msra.mxu0 %v3851_v17  ;;  %1048 = vmatpush1.msra.mxu1 %v3852_v18  ;;  %3877 = vst [vmem:[#allocation16_spill] sm:$0xff] %v3238_v15  ;;  %v3248_v17 = vld [vmem:[#allocation5 + $0x1c8] sm:$0xff]  ;;  %v3250_v18 = vld [vmem:[#allocation5 + $0x1d8] sm:$0xff] }
 0x15e   :  { %978 = vmatprep.subr.mxu0 %v3853_v19  ;;  %1049 = vmatprep.subr.mxu1 %v3854_v21  ;;  %v3254_v19 = vld [vmem:[#allocation5 + $0x1c0] sm:$0xff]  ;;  %v3256_v21 = vld [vmem:[#allocation5 + $0x1d0] sm:$0xff] }
 0x15f   :  { %979 = vmatpush1.msra.mxu0 %v3855_v22  ;;  %1050 = vmatpush1.msra.mxu1 %v3856_v23  ;;  %v3260_v22 = vld [vmem:[#allocation5 + $0x1a8] sm:$0xff]  ;;  %v3262_v23 = vld [vmem:[#allocation5 + $0x1b8] sm:$0xff] }
 0x160   :  { %980 = vmatprep.subr.mxu0 %v3857_v24  ;;  %1051 = vmatprep.subr.mxu1 %v3858_v25  ;;  %v3266_v24 = vld [vmem:[#allocation5 + $0x1a0] sm:$0xff]  ;;  %v3268_v25 = vld [vmem:[#allocation5 + $0x1b0] sm:$0xff] }
 0x161   :  { %981 = vmatpush1.msra.mxu0 %v3859_v26  ;;  %1052 = vmatpush1.msra.mxu1 %v3860_v27  ;;  %v3272_v26 = vld [vmem:[#allocation5 + $0x188] sm:$0xff]  ;;  %v3274_v27 = vld [vmem:[#allocation5 + $0x198] sm:$0xff] }
 0x162   :  { %982 = vmatprep.subr.mxu0 %v3861_v28  ;;  %1053 = vmatprep.subr.mxu1 %v3862_v30  ;;  %v3278_v28 = vld [vmem:[#allocation5 + $0x180] sm:$0xff]  ;;  %v3280_v30 = vld [vmem:[#allocation5 + $0x190] sm:$0xff] }
 0x163   :  { %983 = vmatpush1.msra.mxu0 %v3863_v31  ;;  %1054 = vmatpush1.msra.mxu1 %v3864_v32  ;;  %v3284_v31 = vld [vmem:[#allocation5 + $0x168] sm:$0xff]  ;;  %v3286_v32 = vld [vmem:[#allocation5 + $0x178] sm:$0xff] }
 0x164   :  { %984 = vmatprep.subr.mxu0 %v3865_v33  ;;  %1055 = vmatprep.subr.mxu1 %v3866_v34  ;;  %v3290_v33 = vld [vmem:[#allocation5 + $0x160] sm:$0xff]  ;;  %v3292_v34 = vld [vmem:[#allocation5 + $0x170] sm:$0xff] }
 0x165   :  { %985 = vmatpush1.msra.mxu0 %v3867_v35  ;;  %1018 = vmatprep.mubr.f32.mxu0 %v3868_v36  ;;  %v3296_v35 = vld [vmem:[#allocation5 + $0x148] sm:$0xff] }
 0x166   :  { %1056 = vmatpush1.msra.mxu1 %v3869_v37  ;;  %1089 = vmatprep.mubr.f32.mxu1 %v3868_v36  ;;  %v3298_v37 = vld [vmem:[#allocation5 + $0x158] sm:$0xff] }
 0x167   :  { %1123 = vperm.xlu1 %2457, %v1121_v41   ;;  %1273 = vmatprep.subr.mxu1 %v3238_v15  ;;  %v3306_v41 = vld [vmem:[#allocation5 + $0x128] sm:$0xff] }
 0x16b   :  { %1371 = vperm.xlu1 %2457, %v1369_v42   ;;  %v3308_v42 = vld [vmem:[#allocation5 + $0x138] sm:$0xff] }
 0x16f   :  { %1867 = vperm.xlu1 %2457, %v1865_v43   ;;  %v3314_v43 = vld [vmem:[#allocation5 + $0x120] sm:$0xff] }
 0x173   :  { %2363 = vperm.xlu1 %2457, %v2361_v44   ;;  %v3316_v44 = vld [vmem:[#allocation5 + $0x130] sm:$0xff] }
 0x206   :  { %v772_v45 = vpop.f32.mrf.mxu0  ;;  %v843_v49 = vpop.f32.mrf.mxu1 }
 0x207   :  { %v848_v48 = vadd.f32 %v772_v45, %v3872_v46  ;;  %v850_v55 = vadd.f32 %v843_v49, %v3874_v54  ;;  %v3320_v45 = vld [vmem:[#allocation5 + $0x108] sm:$0xff]  ;;  %v3322_v46 = vld [vmem:[#allocation5 + $0x118] sm:$0xff]  ;;  %v3328_v49 = vld [vmem:[#allocation5 + $0x110] sm:$0xff] }
 0x208   :  { %v774_v50 = vpop.f32.mrf.mxu0  ;;  %v845_v58 = vpop.f32.mrf.mxu1  ;;  %v3344_v54 = vld [vmem:[#allocation5 + $0xc8] sm:$0xff] }
 0x209   :  { %v852_v51 = vmul.f32 0.5, %v848_v48  ;;  %v849_v53 = vadd.f32 %v774_v50, %v3873_v52  ;;  %v851_v10 = vadd.f32 %v845_v58, %v3875_v59  ;;  %v3326_v48 = vld [vmem:[#allocation5 + $0x100] sm:$0xff]  ;;  %v3332_v50 = vld [vmem:[#allocation5 + $0xe8] sm:$0xff]  ;;  %v3352_v58 = vld [vmem:[#allocation5 + $0xd0] sm:$0xff] }
 0x20a   :  { %v3338_v52 = vld [vmem:[#allocation5 + $0xe0] sm:$0xff]  ;;  %v3356_v59 = vld [vmem:[#allocation5 + $0xa8] sm:$0xff] }
 0x20b   :  { %2468 = vtanh.f32 %v852_v51  ;;  %v856_v57 = vmul.f32 0.5, %v849_v53  ;;  %v861_v47 = vmul.f32 0.5, %v851_v10  ;;  %v3334_v51 = vld [vmem:[#allocation5 + $0xf8] sm:$0xff]  ;;  %v3340_v53 = vld [vmem:[#allocation5 + $0xf0] sm:$0xff] }
 0x20c   :  { %v3358_v10 = vld [vmem:[#allocation5 + $0xb8] sm:$0xff] }
 0x20d   :  { %2470 = vtanh.f32 %v856_v57  ;;  %v3350_v57 = vld [vmem:[#allocation5 + $0xc0] sm:$0xff] }
 0x20e   :  { %2472 = vtanh.f32 %v850_v55  ;;  %v3346_v55 = vld [vmem:[#allocation5 + $0xd8] sm:$0xff] }
 0x20f   :  { %2474 = vtanh.f32 %v861_v47  ;;  %v3362_v47 = vld [vmem:[#allocation5 + $0xa0] sm:$0xff] }
 0x218   :  { %v2469_v5 = vpop.eup %2468 }
 0x219   :  { %v854_v8 = vmul.f32 0.5, %v2469_v5  ;;  %v3364_v5 = vld [vmem:[#allocation5 + $0xb0] sm:$0xff] }
 0x21a   :  { %v2471_v0 = vpop.eup %2470 }
 0x21b   :  { %v855_v60 = vadd.f32 0.5, %v854_v8  ;;  %v858_v9 = vmul.f32 0.5, %v2471_v0  ;;  %v2473_v63 = vpop.eup %2472  ;;  %v3368_v8 = vld [vmem:[#allocation5 + $0x88] sm:$0xff]  ;;  %v3370_v0 = vld [vmem:[#allocation5 + $0x98] sm:$0xff] }
 0x21c   :  { %v2475_v4 = vpop.eup %2474  ;;  %3878 = vst [vmem:[#allocation17_spill] sm:$0xff] %v3368_v8  ;;  %3879 = vst [vmem:[#allocation18_spill] sm:$0xff] %v3370_v0 }
 0x21d   :  { %v859_v62 = vadd.f32 0.5, %v858_v9  ;;  %v866_v29 = vmul.f32 %v2473_v63, %v855_v60  ;;  %v863_v61 = vmul.f32 0.5, %v2475_v4  ;;  %v3374_v60 = vld [vmem:[#allocation5 + $0x80] sm:$0xff]  ;;  %v3376_v9 = vld [vmem:[#allocation5 + $0x90] sm:$0xff]  ;;  %v3380_v63 = vld [vmem:[#allocation5 + $0x68] sm:$0xff] }
 0x21e   :  { %3880 = vst [vmem:[#allocation19_spill] sm:$0xff] %v3374_v60  ;;  %3881 = vst [vmem:[#allocation20_spill] sm:$0xff] %v3376_v9  ;;  %v3398_v4 = vld [vmem:[#allocation5 + $0x40] sm:$0xff] }
 0x21f   :  { %v865_v3 = vmul.f32 %v859_v62, %v3142_v11  ;;  %v864_v20 = vadd.f32 0.5, %v863_v61  ;;  %3882 = vst [vmem:[#allocation21_spill] sm:$0xff] %v3380_v63  ;;  %v3382_v62 = vld [vmem:[#allocation5 + $0x78] sm:$0xff]  ;;  %3888 = vst [vmem:[#allocation27_spill] sm:$0xff] %v3398_v4  ;;  %v3400_v61 = vld [vmem:[#allocation5 + $0x50] sm:$0xff] }
 0x220   :  { %3883 = vst [vmem:[#allocation22_spill] sm:$0xff] %v3382_v62  ;;  %3889 = vst [vmem:[#allocation28_spill] sm:$0xff] %v3400_v61 }
 0x221   :  { %v867_v56 = vadd.f32 %v866_v29, %v865_v3  ;;  %v3386_v29 = vld [vmem:[#allocation5 + $0x60] sm:$0xff]  ;;  %v3388_v3 = vld [vmem:[#allocation5 + $0x70] sm:$0xff] }
 0x222   :  { %3884 = vst [vmem:[#allocation23_spill] sm:$0xff] %v3386_v29  ;;  %3885 = vst [vmem:[#allocation24_spill] sm:$0xff] %v3388_v3 }
 0x223   :  { %2476 = vtanh.f32 %v867_v56  ;;  %v3227_v12 = vsel %vm877_vm10, %v867_v56, %v3142_v11  ;;  %v3236_v11 = vld [vmem:[#allocation5 + $0x1e8] sm:$0xff]  ;;  %v3394_v56 = vld [vmem:[#allocation5 + $0x58] sm:$0xff] }
 0x224   :  { %3876 = vst [vmem:[#allocation15_spill] sm:$0xff] %v3236_v11  ;;  %1202 = vmatprep.subr.mxu0 %v3236_v11  ;;  %3887 = vst [vmem:[#allocation26_spill] sm:$0xff] %v3394_v56 }
 0x230   :  { %v2477_v2 = vpop.eup %2476 }
 0x231   :  { %v869_v7 = vmul.f32 %v2477_v2, %v864_v20  ;;  %v3404_v20 = vld [vmem:[#allocation5 + $0x28] sm:$0xff]  ;;  %v3406_v2 = vld [vmem:[#allocation5 + $0x38] sm:$0xff] }
 0x232   :  { %3890 = vst [vmem:[#allocation29_spill] sm:$0xff] %v3404_v20  ;;  %3891 = vst [vmem:[#allocation30_spill] sm:$0xff] %v3406_v2 }
 0x233   :  { %v878_v13 = vsel %vm877_vm10, %v869_v7, 0.0  ;;  %v3230_v14 = vsel %vm877_vm10, %v869_v7, %v3145_v38  ;;  %v3244_v38 = vld [vmem:[#allocation5 + $0x1f0] sm:$0xff]  ;;  %v3410_v7 = vld [vmem:[#allocation5 + $0x20] sm:$0xff] }
 0x234   :  { %880 = vst [vmem:[#allocation8 + $0x8] sm:$0xff] %v878_v13  ;;  %1019 = vmatmul.mubr.f32.vlgmr.msra.gmra.mxu0 %v3230_v14  ;;  %1090 = vmatmul.mubr.f32.vlgmr.msra.gmra.mxu1 %v3230_v14  ;;  %3892 = vst [vmem:[#allocation31_spill] sm:$0xff] %v3410_v7  ;;  %v3412_v13 = vld [vmem:[#allocation5 + $0x30] sm:$0xff] }
 0x235   :  { %1266 = vmatprep.mubr.f32.mxu0 %v3868_v36  ;;  %1337 = vmatprep.mubr.f32.mxu1 %v3868_v36  ;;  %3893 = vst [vmem:[#allocation33_spill] sm:$0xff] %v3412_v13  ;;  %v3418_v36 = vld [vmem:[#allocation5 + $0x18] sm:$0xff] }
 0x236   :  { %1203 = vmatpush1.msra.mxu0 %v3242_v16  ;;  %1274 = vmatpush1.msra.mxu1 %v3244_v38  ;;  %3895 = vst [vmem:[#allocation35_spill] sm:$0xff] %v3418_v36 }
 0x237   :  { %1204 = vmatprep.subr.mxu0 %v3248_v17  ;;  %1275 = vmatprep.subr.mxu1 %v3250_v18 }
 0x238   :  { %1205 = vmatpush1.msra.mxu0 %v3254_v19  ;;  %1276 = vmatpush1.msra.mxu1 %v3256_v21 }
 0x239   :  { %1206 = vmatprep.subr.mxu0 %v3260_v22  ;;  %1277 = vmatprep.subr.mxu1 %v3262_v23 }
 0x23a   :  { %1207 = vmatpush1.msra.mxu0 %v3266_v24  ;;  %1278 = vmatpush1.msra.mxu1 %v3268_v25 }
 0x23b   :  { %1208 = vmatprep.subr.mxu0 %v3272_v26  ;;  %1279 = vmatprep.subr.mxu1 %v3274_v27 }
 0x23c   :  { %1209 = vmatpush1.msra.mxu0 %v3278_v28  ;;  %1280 = vmatpush1.msra.mxu1 %v3280_v30 }
 0x23d   :  { %1210 = vmatprep.subr.mxu0 %v3284_v31  ;;  %1281 = vmatprep.subr.mxu1 %v3286_v32 }
 0x23e   :  { %1211 = vmatpush1.msra.mxu0 %v3290_v33  ;;  %1282 = vmatpush1.msra.mxu1 %v3292_v34 }
 0x23f   :  { %1212 = vmatprep.subr.mxu0 %v3296_v35  ;;  %1283 = vmatprep.subr.mxu1 %v3298_v37 }
 0x240   :  { %1213 = vmatpush1.msra.mxu0 %v3300_v39  ;;  %1284 = vmatpush1.msra.mxu1 %v3304_v40 }
 0x241   :  { %1214 = vmatprep.subr.mxu0 %v3306_v41  ;;  %1285 = vmatprep.subr.mxu1 %v3308_v42 }
 0x242   :  { %1215 = vmatpush1.msra.mxu0 %v3314_v43  ;;  %1286 = vmatpush1.msra.mxu1 %v3316_v44 }
 0x243   :  { %1216 = vmatprep.subr.mxu0 %v3320_v45  ;;  %1287 = vmatprep.subr.mxu1 %v3322_v46 }
 0x244   :  { %1217 = vmatpush1.msra.mxu0 %v3326_v48  ;;  %1288 = vmatpush1.msra.mxu1 %v3328_v49 }
 0x245   :  { %1218 = vmatprep.subr.mxu0 %v3332_v50  ;;  %1289 = vmatprep.subr.mxu1 %v3334_v51 }
 0x246   :  { %1219 = vmatpush1.msra.mxu0 %v3338_v52  ;;  %1290 = vmatpush1.msra.mxu1 %v3340_v53 }
 0x247   :  { %1220 = vmatprep.subr.mxu0 %v3344_v54  ;;  %1291 = vmatprep.subr.mxu1 %v3346_v55 }
 0x248   :  { %1221 = vmatpush1.msra.mxu0 %v3350_v57  ;;  %1292 = vmatpush1.msra.mxu1 %v3352_v58 }
 0x249   :  { %1222 = vmatprep.subr.mxu0 %v3356_v59  ;;  %1293 = vmatprep.subr.mxu1 %v3358_v10 }
 0x24a   :  { %1223 = vmatpush1.msra.mxu0 %v3362_v47  ;;  %1294 = vmatpush1.msra.mxu1 %v3364_v5 }
 0x24b   :  { %1224 = vmatprep.subr.mxu0 %v3368_v8  ;;  %1295 = vmatprep.subr.mxu1 %v3370_v0  ;;  %v1124_v8 = vpop.permute.xlu1 %1123 }
 0x24c   :  { %1225 = vmatpush1.msra.mxu0 %v3374_v60  ;;  %1296 = vmatpush1.msra.mxu1 %v3376_v9  ;;  %vm1125_vm11 = vcmp.eq.s32.totalorder %v1124_v8, 1  ;;  %v3904_v8 = vld [vmem:[#allocation19_spill] sm:$0xff] }
 0x24d   :  { %1226 = vmatprep.subr.mxu0 %v3380_v63  ;;  %1297 = vmatprep.subr.mxu1 %v3382_v62 }
 0x24e   :  { %1227 = vmatpush1.msra.mxu0 %v3386_v29  ;;  %1298 = vmatpush1.msra.mxu1 %v3388_v3  ;;  %v3900_v3 = vld [vmem:[#allocation42_spill] sm:$0xff] }
 0x24f   :  { %1228 = vmatprep.subr.mxu0 %v3392_v1  ;;  %1299 = vmatprep.subr.mxu1 %v3394_v56  ;;  %v3899_v1 = vld [vmem:[#allocation43_spill] sm:$0xff] }
 0x250   :  { %1229 = vmatpush1.msra.mxu0 %v3398_v4  ;;  %1300 = vmatpush1.msra.mxu1 %v3400_v61  ;;  %v3422_v61 = vld [vmem:[#allocation5] sm:$0xff] }
 0x251   :  { %1230 = vmatprep.subr.mxu0 %v3404_v20  ;;  %1301 = vmatprep.subr.mxu1 %v3406_v2  ;;  %3896 = vst [vmem:[#allocation36_spill] sm:$0xff] %v3422_v61  ;;  %v3424_v20 = vld [vmem:[#allocation5 + $0x10] sm:$0xff] }
 0x252   :  { %1231 = vmatpush1.msra.mxu0 %v3410_v7  ;;  %1302 = vmatpush1.msra.mxu1 %v3412_v13  ;;  %3897 = vst [vmem:[#allocation32_spill] sm:$0xff] %v3424_v20  ;;  %v3898_v7 = vld [vmem:[#allocation41_spill] sm:$0xff] }
 0x253   :  { %1232 = vmatprep.subr.mxu0 %v3416_v6  ;;  %1303 = vmatprep.subr.mxu1 %v3418_v36 }
 0x254   :  { %1233 = vmatpush1.msra.mxu0 %v3422_v61  ;;  %1304 = vmatpush1.msra.mxu1 %v3424_v20  ;;  %v3901_v20 = vld [vmem:[#allocation44_spill] sm:$0xff] }
 0x255   :  { %1450 = vmatprep.subr.mxu0 %v3236_v11  ;;  %1521 = vmatprep.subr.mxu1 %v3238_v15 }
 0x2f4   :  { %v1020_v13 = vpop.f32.mrf.mxu0  ;;  %v1091_v4 = vpop.f32.mrf.mxu1 }
 0x2f5   :  { %v1096_v2 = vadd.f32 %v1020_v13, %v3898_v7  ;;  %v1098_v29 = vadd.f32 %v1091_v4, %v3900_v3  ;;  %v3907_v4 = vld [vmem:[#allocation22_spill] sm:$0xff] }
 0x2f6   :  { %v1022_v56 = vpop.f32.mrf.mxu0  ;;  %v1093_v61 = vpop.f32.mrf.mxu1 }
 0x2f7   :  { %v1100_v6 = vmul.f32 0.5, %v1096_v2  ;;  %v1097_v36 = vadd.f32 %v1022_v56, %v3899_v1  ;;  %v1099_v63 = vadd.f32 %v1093_v61, %v3901_v20  ;;  %v3908_v61 = vld [vmem:[#allocation23_spill] sm:$0xff]  ;;  %v3909_v20 = vld [vmem:[#allocation24_spill] sm:$0xff] }
 0x2f9   :  { %2478 = vtanh.f32 %v1100_v6  ;;  %v1104_v62 = vmul.f32 0.5, %v1097_v36  ;;  %v1109_v11 = vmul.f32 0.5, %v1099_v63 }
 0x2fb   :  { %2480 = vtanh.f32 %v1104_v62 }
 0x2fc   :  { %2482 = vtanh.f32 %v1098_v29 }
 0x2fd   :  { %2484 = vtanh.f32 %v1109_v11 }
 0x306   :  { %v2479_v9 = vpop.eup %2478 }
 0x307   :  { %v1102_v15 = vmul.f32 0.5, %v2479_v9 }
 0x308   :  { %v2481_v60 = vpop.eup %2480 }
 0x309   :  { %v1103_v0 = vadd.f32 0.5, %v1102_v15  ;;  %v1106_v7 = vmul.f32 0.5, %v2481_v60  ;;  %v2483_v13 = vpop.eup %2482  ;;  %v3906_v60 = vld [vmem:[#allocation21_spill] sm:$0xff] }
 0x30a   :  { %v2485_v29 = vpop.eup %2484 }
 0x30b   :  { %v1107_v2 = vadd.f32 0.5, %v1106_v7  ;;  %v1114_v1 = vmul.f32 %v2483_v13, %v1103_v0  ;;  %v1111_v63 = vmul.f32 0.5, %v2485_v29  ;;  %v3905_v0 = vld [vmem:[#allocation20_spill] sm:$0xff]  ;;  %v3910_v7 = vld [vmem:[#allocation25_spill] sm:$0xff]  ;;  %v3911_v13 = vld [vmem:[#allocation26_spill] sm:$0xff] }
 0x30c   :  { %v3916_v29 = vld [vmem:[#allocation31_spill] sm:$0xff] }
 0x30d   :  { %v1113_v6 = vmul.f32 %v1107_v2, %v3227_v12  ;;  %v1112_v3 = vadd.f32 0.5, %v1111_v63  ;;  %v3912_v2 = vld [vmem:[#allocation27_spill] sm:$0xff]  ;;  %v3917_v63 = vld [vmem:[#allocation33_spill] sm:$0xff] }
 0x30f   :  { %v1115_v36 = vadd.f32 %v1114_v1, %v1113_v6  ;;  %v3913_v1 = vld [vmem:[#allocation28_spill] sm:$0xff]  ;;  %v3914_v6 = vld [vmem:[#allocation29_spill] sm:$0xff] }
 0x311   :  { %2486 = vtanh.f32 %v1115_v36  ;;  %v3436_v62 = vsel %vm1125_vm11, %v1115_v36, %v3227_v12  ;;  %v3902_v12 = vld [vmem:[#allocation17_spill] sm:$0xff]  ;;  %v3915_v36 = vld [vmem:[#allocation30_spill] sm:$0xff] }
 0x31e   :  { %v2487_v9 = vpop.eup %2486 }
 0x31f   :  { %v1117_v56 = vmul.f32 %v2487_v9, %v1112_v3  ;;  %v3918_v3 = vld [vmem:[#allocation34_spill] sm:$0xff]  ;;  %v3919_v9 = vld [vmem:[#allocation35_spill] sm:$0xff] }
 0x321   :  { %v1126_v15 = vsel %vm1125_vm11, %v1117_v56, 0.0  ;;  %v3439_v11 = vsel %vm1125_vm11, %v1117_v56, %v3230_v14  ;;  %v3903_v14 = vld [vmem:[#allocation18_spill] sm:$0xff]  ;;  %v3920_v56 = vld [vmem:[#allocation36_spill] sm:$0xff] }
 0x322   :  { %1128 = vst [vmem:[#allocation8 + $0x10] sm:$0xff] %v1126_v15  ;;  %1267 = vmatmul.mubr.f32.vlgmr.msra.gmra.mxu0 %v3439_v11  ;;  %1338 = vmatmul.mubr.f32.vlgmr.msra.gmra.mxu1 %v3439_v11  ;;  %v3921_v15 = vmov 0.0  }
 0x323   :  { %1451 = vmatpush1.msra.mxu0 %v3242_v16  ;;  %1522 = vmatpush1.msra.mxu1 %v3244_v38 }
 0x324   :  { %1452 = vmatprep.subr.mxu0 %v3248_v17  ;;  %1523 = vmatprep.subr.mxu1 %v3250_v18 }
 0x325   :  { %1453 = vmatpush1.msra.mxu0 %v3254_v19  ;;  %1524 = vmatpush1.msra.mxu1 %v3256_v21 }
 0x326   :  { %1454 = vmatprep.subr.mxu0 %v3260_v22  ;;  %1525 = vmatprep.subr.mxu1 %v3262_v23 }
 0x327   :  { %1455 = vmatpush1.msra.mxu0 %v3266_v24  ;;  %1526 = vmatpush1.msra.mxu1 %v3268_v25 }
 0x328   :  { %1456 = vmatprep.subr.mxu0 %v3272_v26  ;;  %1527 = vmatprep.subr.mxu1 %v3274_v27 }
 0x329   :  { %1457 = vmatpush1.msra.mxu0 %v3278_v28  ;;  %1528 = vmatpush1.msra.mxu1 %v3280_v30 }
 0x32a   :  { %1458 = vmatprep.subr.mxu0 %v3284_v31  ;;  %1529 = vmatprep.subr.mxu1 %v3286_v32 }
 0x32b   :  { %1459 = vmatpush1.msra.mxu0 %v3290_v33  ;;  %1530 = vmatpush1.msra.mxu1 %v3292_v34 }
 0x32c   :  { %1460 = vmatprep.subr.mxu0 %v3296_v35  ;;  %1531 = vmatprep.subr.mxu1 %v3298_v37 }
 0x32d   :  { %1461 = vmatpush1.msra.mxu0 %v3300_v39  ;;  %1532 = vmatpush1.msra.mxu1 %v3304_v40 }
 0x32e   :  { %1462 = vmatprep.subr.mxu0 %v3306_v41  ;;  %1533 = vmatprep.subr.mxu1 %v3308_v42 }
 0x32f   :  { %1463 = vmatpush1.msra.mxu0 %v3314_v43  ;;  %1534 = vmatpush1.msra.mxu1 %v3316_v44 }
 0x330   :  { %1464 = vmatprep.subr.mxu0 %v3320_v45  ;;  %1535 = vmatprep.subr.mxu1 %v3322_v46 }
 0x331   :  { %1465 = vmatpush1.msra.mxu0 %v3326_v48  ;;  %1536 = vmatpush1.msra.mxu1 %v3328_v49 }
 0x332   :  { %1466 = vmatprep.subr.mxu0 %v3332_v50  ;;  %1537 = vmatprep.subr.mxu1 %v3334_v51 }
 0x333   :  { %1467 = vmatpush1.msra.mxu0 %v3338_v52  ;;  %1538 = vmatpush1.msra.mxu1 %v3340_v53 }
 0x334   :  { %1468 = vmatprep.subr.mxu0 %v3344_v54  ;;  %1539 = vmatprep.subr.mxu1 %v3346_v55 }
 0x335   :  { %1469 = vmatpush1.msra.mxu0 %v3350_v57  ;;  %1540 = vmatpush1.msra.mxu1 %v3352_v58 }
 0x336   :  { %1470 = vmatprep.subr.mxu0 %v3356_v59  ;;  %1541 = vmatprep.subr.mxu1 %v3358_v10 }
 0x337   :  { %1471 = vmatpush1.msra.mxu0 %v3362_v47  ;;  %1542 = vmatpush1.msra.mxu1 %v3364_v5 }
 0x338   :  { %1472 = vmatprep.subr.mxu0 %v3902_v12  ;;  %1543 = vmatprep.subr.mxu1 %v3903_v14 }
 0x339   :  { %1473 = vmatpush1.msra.mxu0 %v3904_v8  ;;  %1544 = vmatpush1.msra.mxu1 %v3905_v0 }
 0x33a   :  { %1474 = vmatprep.subr.mxu0 %v3906_v60  ;;  %1545 = vmatprep.subr.mxu1 %v3907_v4 }
 0x33b   :  { %1475 = vmatpush1.msra.mxu0 %v3908_v61  ;;  %1546 = vmatpush1.msra.mxu1 %v3909_v20  ;;  %v3926_v20 = vld [vmem:[#allocation47_spill] sm:$0xff] }
 0x33c   :  { %1476 = vmatprep.subr.mxu0 %v3910_v7  ;;  %1547 = vmatprep.subr.mxu1 %v3911_v13  ;;  %v3922_v13 = vld [vmem:[#allocation32_spill] sm:$0xff] }
 0x33d   :  { %1477 = vmatpush1.msra.mxu0 %v3912_v2  ;;  %1548 = vmatpush1.msra.mxu1 %v3913_v1  ;;  %v3923_v1 = vld [vmem:[#allocation15_spill] sm:$0xff] }
 0x33e   :  { %1478 = vmatprep.subr.mxu0 %v3914_v6  ;;  %1549 = vmatprep.subr.mxu1 %v3915_v36  ;;  %v3924_v6 = vld [vmem:[#allocation16_spill] sm:$0xff] }
 0x33f   :  { %1479 = vmatpush1.msra.mxu0 %v3916_v29  ;;  %1550 = vmatpush1.msra.mxu1 %v3917_v63  ;;  %v3925_v29 = vld [vmem:[#allocation45_spill] sm:$0xff] }
 0x340   :  { %1480 = vmatprep.subr.mxu0 %v3918_v3  ;;  %1551 = vmatprep.subr.mxu1 %v3919_v9 }
 0x341   :  { %1481 = vmatpush1.msra.mxu0 %v3920_v56  ;;  %1514 = vmatprep.mubr.f32.mxu0 %v3921_v15  ;;  %v3927_v56 = vld [vmem:[#allocation46_spill] sm:$0xff] }
 0x342   :  { %1552 = vmatpush1.msra.mxu1 %v3922_v13  ;;  %1585 = vmatprep.mubr.f32.mxu1 %v3921_v15  ;;  %v3928_v15 = vld [vmem:[#allocation48_spill] sm:$0xff] }
 0x343   :  { %1698 = vmatprep.subr.mxu0 %v3923_v1  ;;  %1769 = vmatprep.subr.mxu1 %v3924_v6 }
 0x3e2   :  { %v1268_v36 = vpop.f32.mrf.mxu0  ;;  %v1339_v63 = vpop.f32.mrf.mxu1 }
 0x3e3   :  { %v1344_v2 = vadd.f32 %v1268_v36, %v3925_v29  ;;  %v1346_v61 = vadd.f32 %v1339_v63, %v3927_v56  ;;  %v3935_v56 = vld [vmem:[#allocation23_spill] sm:$0xff] }
 0x3e4   :  { %v1270_v7 = vpop.f32.mrf.mxu0  ;;  %v1341_v13 = vpop.f32.mrf.mxu1 }
 0x3e5   :  { %v1348_v3 = vmul.f32 0.5, %v1344_v2  ;;  %v1345_v9 = vadd.f32 %v1270_v7, %v3926_v20  ;;  %v1347_v60 = vadd.f32 %v1341_v13, %v3928_v15  ;;  %v1372_v7 = vpop.permute.xlu1 %1371  ;;  %v3936_v15 = vld [vmem:[#allocation24_spill] sm:$0xff] }
 0x3e6   :  { %vm1373_vm12 = vcmp.eq.s32.totalorder %v1372_v7, 1  ;;  %v3941_v7 = vld [vmem:[#allocation29_spill] sm:$0xff] }
 0x3e7   :  { %2488 = vtanh.f32 %v1348_v3  ;;  %v1352_v4 = vmul.f32 0.5, %v1345_v9  ;;  %v1357_v1 = vmul.f32 0.5, %v1347_v60  ;;  %v3934_v9 = vld [vmem:[#allocation22_spill] sm:$0xff] }
 0x3e9   :  { %2490 = vtanh.f32 %v1352_v4 }
 0x3ea   :  { %2492 = vtanh.f32 %v1346_v61 }
 0x3eb   :  { %2494 = vtanh.f32 %v1357_v1  ;;  %v3933_v1 = vld [vmem:[#allocation21_spill] sm:$0xff] }
 0x3f4   :  { %v2489_v0 = vpop.eup %2488 }
 0x3f5   :  { %v1350_v6 = vmul.f32 0.5, %v2489_v0 }
 0x3f6   :  { %v2491_v8 = vpop.eup %2490 }
 0x3f7   :  { %v1351_v14 = vadd.f32 0.5, %v1350_v6  ;;  %v1354_v36 = vmul.f32 0.5, %v2491_v8  ;;  %v2493_v29 = vpop.eup %2492 }
 0x3f8   :  { %v2495_v61 = vpop.eup %2494 }
 0x3f9   :  { %v1355_v2 = vadd.f32 0.5, %v1354_v36  ;;  %v1362_v12 = vmul.f32 %v2493_v29, %v1351_v14  ;;  %v1359_v60 = vmul.f32 0.5, %v2495_v61  ;;  %v3932_v14 = vld [vmem:[#allocation20_spill] sm:$0xff]  ;;  %v3937_v36 = vld [vmem:[#allocation25_spill] sm:$0xff]  ;;  %v3938_v29 = vld [vmem:[#allocation26_spill] sm:$0xff] }
 0x3fa   :  { %v3943_v61 = vld [vmem:[#allocation31_spill] sm:$0xff] }
 0x3fb   :  { %v1361_v20 = vmul.f32 %v1355_v2, %v3436_v62  ;;  %v1360_v13 = vadd.f32 0.5, %v1359_v60  ;;  %v3939_v2 = vld [vmem:[#allocation27_spill] sm:$0xff]  ;;  %v3944_v60 = vld [vmem:[#allocation33_spill] sm:$0xff] }
 0x3fd   :  { %v1363_v63 = vadd.f32 %v1362_v12, %v1361_v20  ;;  %v3931_v12 = vld [vmem:[#allocation19_spill] sm:$0xff]  ;;  %v3940_v20 = vld [vmem:[#allocation28_spill] sm:$0xff] }
 0x3ff   :  { %2496 = vtanh.f32 %v1363_v63  ;;  %v3515_v4 = vsel %vm1373_vm12, %v1363_v63, %v3436_v62  ;;  %v3929_v62 = vld [vmem:[#allocation17_spill] sm:$0xff]  ;;  %v3942_v63 = vld [vmem:[#allocation30_spill] sm:$0xff] }
 0x40c   :  { %v2497_v0 = vpop.eup %2496 }
 0x40d   :  { %v1365_v3 = vmul.f32 %v2497_v0, %v1360_v13  ;;  %v3945_v13 = vld [vmem:[#allocation34_spill] sm:$0xff]  ;;  %v3946_v0 = vld [vmem:[#allocation35_spill] sm:$0xff] }
 0x40f   :  { %v1374_v6 = vsel %vm1373_vm12, %v1365_v3, 0.0  ;;  %v3518_v8 = vsel %vm1373_vm12, %v1365_v3, %v3439_v11  ;;  %v3930_v11 = vld [vmem:[#allocation18_spill] sm:$0xff]  ;;  %v3947_v3 = vld [vmem:[#allocation36_spill] sm:$0xff] }
 0x410   :  { %1376 = vst [vmem:[#allocation8 + $0x18] sm:$0xff] %v1374_v6  ;;  %1515 = vmatmul.mubr.f32.vlgmr.msra.gmra.mxu0 %v3518_v8  ;;  %1586 = vmatmul.mubr.f32.vlgmr.msra.gmra.mxu1 %v3518_v8  ;;  %v3948_v6 = vmov 0.0  }
 0x411   :  { %1699 = vmatpush1.msra.mxu0 %v3242_v16  ;;  %1770 = vmatpush1.msra.mxu1 %v3244_v38 }
 0x412   :  { %1700 = vmatprep.subr.mxu0 %v3248_v17  ;;  %1771 = vmatprep.subr.mxu1 %v3250_v18 }
 0x413   :  { %1701 = vmatpush1.msra.mxu0 %v3254_v19  ;;  %1772 = vmatpush1.msra.mxu1 %v3256_v21 }
 0x414   :  { %1702 = vmatprep.subr.mxu0 %v3260_v22  ;;  %1773 = vmatprep.subr.mxu1 %v3262_v23 }
 0x415   :  { %1703 = vmatpush1.msra.mxu0 %v3266_v24  ;;  %1774 = vmatpush1.msra.mxu1 %v3268_v25 }
 0x416   :  { %1704 = vmatprep.subr.mxu0 %v3272_v26  ;;  %1775 = vmatprep.subr.mxu1 %v3274_v27 }
 0x417   :  { %1705 = vmatpush1.msra.mxu0 %v3278_v28  ;;  %1776 = vmatpush1.msra.mxu1 %v3280_v30 }
 0x418   :  { %1706 = vmatprep.subr.mxu0 %v3284_v31  ;;  %1777 = vmatprep.subr.mxu1 %v3286_v32 }
 0x419   :  { %1707 = vmatpush1.msra.mxu0 %v3290_v33  ;;  %1778 = vmatpush1.msra.mxu1 %v3292_v34 }
 0x41a   :  { %1708 = vmatprep.subr.mxu0 %v3296_v35  ;;  %1779 = vmatprep.subr.mxu1 %v3298_v37 }
 0x41b   :  { %1709 = vmatpush1.msra.mxu0 %v3300_v39  ;;  %1780 = vmatpush1.msra.mxu1 %v3304_v40 }
 0x41c   :  { %1710 = vmatprep.subr.mxu0 %v3306_v41  ;;  %1781 = vmatprep.subr.mxu1 %v3308_v42 }
 0x41d   :  { %1711 = vmatpush1.msra.mxu0 %v3314_v43  ;;  %1782 = vmatpush1.msra.mxu1 %v3316_v44 }
 0x41e   :  { %1712 = vmatprep.subr.mxu0 %v3320_v45  ;;  %1783 = vmatprep.subr.mxu1 %v3322_v46 }
 0x41f   :  { %1713 = vmatpush1.msra.mxu0 %v3326_v48  ;;  %1784 = vmatpush1.msra.mxu1 %v3328_v49 }
 0x420   :  { %1714 = vmatprep.subr.mxu0 %v3332_v50  ;;  %1785 = vmatprep.subr.mxu1 %v3334_v51 }
 0x421   :  { %1715 = vmatpush1.msra.mxu0 %v3338_v52  ;;  %1786 = vmatpush1.msra.mxu1 %v3340_v53 }
 0x422   :  { %1716 = vmatprep.subr.mxu0 %v3344_v54  ;;  %1787 = vmatprep.subr.mxu1 %v3346_v55 }
 0x423   :  { %1717 = vmatpush1.msra.mxu0 %v3350_v57  ;;  %1788 = vmatpush1.msra.mxu1 %v3352_v58 }
 0x424   :  { %1718 = vmatprep.subr.mxu0 %v3356_v59  ;;  %1789 = vmatprep.subr.mxu1 %v3358_v10 }
 0x425   :  { %1719 = vmatpush1.msra.mxu0 %v3362_v47  ;;  %1790 = vmatpush1.msra.mxu1 %v3364_v5 }
 0x426   :  { %1720 = vmatprep.subr.mxu0 %v3929_v62  ;;  %1791 = vmatprep.subr.mxu1 %v3930_v11 }
 0x427   :  { %1721 = vmatpush1.msra.mxu0 %v3931_v12  ;;  %1792 = vmatpush1.msra.mxu1 %v3932_v14 }
 0x428   :  { %1722 = vmatprep.subr.mxu0 %v3933_v1  ;;  %1793 = vmatprep.subr.mxu1 %v3934_v9 }
 0x429   :  { %1723 = vmatpush1.msra.mxu0 %v3935_v56  ;;  %1794 = vmatpush1.msra.mxu1 %v3936_v15  ;;  %v3953_v15 = vld [vmem:[#allocation51_spill] sm:$0xff] }
 0x42a   :  { %1724 = vmatprep.subr.mxu0 %v3937_v36  ;;  %1795 = vmatprep.subr.mxu1 %v3938_v29  ;;  %v3949_v29 = vld [vmem:[#allocation32_spill] sm:$0xff] }
 0x42b   :  { %1725 = vmatpush1.msra.mxu0 %v3939_v2  ;;  %1796 = vmatpush1.msra.mxu1 %v3940_v20  ;;  %v3950_v20 = vld [vmem:[#allocation15_spill] sm:$0xff] }
 0x42c   :  { %1726 = vmatprep.subr.mxu0 %v3941_v7  ;;  %1797 = vmatprep.subr.mxu1 %v3942_v63  ;;  %v3951_v7 = vld [vmem:[#allocation16_spill] sm:$0xff] }
 0x42d   :  { %1727 = vmatpush1.msra.mxu0 %v3943_v61  ;;  %1798 = vmatpush1.msra.mxu1 %v3944_v60  ;;  %v3952_v61 = vld [vmem:[#allocation49_spill] sm:$0xff] }
 0x42e   :  { %1728 = vmatprep.subr.mxu0 %v3945_v13  ;;  %1799 = vmatprep.subr.mxu1 %v3946_v0 }
 0x42f   :  { %1729 = vmatpush1.msra.mxu0 %v3947_v3  ;;  %1762 = vmatprep.mubr.f32.mxu0 %v3948_v6  ;;  %v3954_v3 = vld [vmem:[#allocation50_spill] sm:$0xff] }
 0x430   :  { %1800 = vmatpush1.msra.mxu1 %v3949_v29  ;;  %1833 = vmatprep.mubr.f32.mxu1 %v3948_v6  ;;  %v3955_v6 = vld [vmem:[#allocation52_spill] sm:$0xff] }
 0x431   :  { %1946 = vmatprep.subr.mxu0 %v3950_v20  ;;  %2017 = vmatprep.subr.mxu1 %v3951_v7 }
 0x4d0   :  { %v1516_v63 = vpop.f32.mrf.mxu0  ;;  %v1587_v60 = vpop.f32.mrf.mxu1 }
 0x4d1   :  { %v1592_v2 = vadd.f32 %v1516_v63, %v3952_v61  ;;  %v1594_v56 = vadd.f32 %v1587_v60, %v3954_v3 }
 0x4d2   :  { %v1518_v36 = vpop.f32.mrf.mxu0  ;;  %v1589_v29 = vpop.f32.mrf.mxu1 }
 0x4d3   :  { %v1596_v13 = vmul.f32 0.5, %v1592_v2  ;;  %v1593_v0 = vadd.f32 %v1518_v36, %v3953_v15  ;;  %v1595_v1 = vadd.f32 %v1589_v29, %v3955_v6  ;;  %v1620_v36 = vpop.permute.xlu0 %1619 }
 0x4d4   :  { %vm1621_vm13 = vcmp.eq.s32.totalorder %v1620_v36, 1 }
 0x4d5   :  { %2498 = vtanh.f32 %v1596_v13  ;;  %v1600_v9 = vmul.f32 0.5, %v1593_v0  ;;  %v1605_v20 = vmul.f32 0.5, %v1595_v1 }
 0x4d7   :  { %2500 = vtanh.f32 %v1600_v9 }
 0x4d8   :  { %2502 = vtanh.f32 %v1594_v56 }
 0x4d9   :  { %2504 = vtanh.f32 %v1605_v20 }
 0x4e2   :  { %v2499_v14 = vpop.eup %2498 }
 0x4e3   :  { %v1598_v7 = vmul.f32 0.5, %v2499_v14 }
 0x4e4   :  { %v2501_v12 = vpop.eup %2500 }
 0x4e5   :  { %v1599_v11 = vadd.f32 0.5, %v1598_v7  ;;  %v1602_v63 = vmul.f32 0.5, %v2501_v12  ;;  %v2503_v61 = vpop.eup %2502 }
 0x4e6   :  { %v2505_v56 = vpop.eup %2504 }
 0x4e7   :  { %v1603_v2 = vadd.f32 0.5, %v1602_v63  ;;  %v1610_v62 = vmul.f32 %v2503_v61, %v1599_v11  ;;  %v1607_v1 = vmul.f32 0.5, %v2505_v56  ;;  %v1868_v11 = vpop.permute.xlu1 %1867  ;;  %v2190_v56 = vld [vmem:[#allocation5 + $0x1e0] sm:$0xff] }
 0x4e8   :  { %vm1869_vm14 = vcmp.eq.s32.totalorder %v1868_v11, 1  ;;  %v2138_v11 = vld [vmem:[#allocation5 + $0x40] sm:$0xff] }
 0x4e9   :  { %v1609_v15 = vmul.f32 %v1603_v2, %v3515_v4  ;;  %v1608_v29 = vadd.f32 0.5, %v1607_v1  ;;  %v2192_v1 = vld [vmem:[#allocation5 + $0x1f0] sm:$0xff] }
 0x4eb   :  { %v1611_v60 = vadd.f32 %v1610_v62, %v1609_v15 }
 0x4ed   :  { %2506 = vtanh.f32 %v1611_v60  ;;  %v3594_v9 = vsel %vm1621_vm13, %v1611_v60, %v3515_v4  ;;  %v2191_v60 = vld [vmem:[#allocation5 + $0x1e8] sm:$0xff] }
 0x4fa   :  { %v2507_v14 = vpop.eup %2506 }
 0x4fb   :  { %v1613_v13 = vmul.f32 %v2507_v14, %v1608_v29  ;;  %v2187_v29 = vld [vmem:[#allocation5 + $0x1c8] sm:$0xff]  ;;  %v2189_v14 = vld [vmem:[#allocation5 + $0x1d8] sm:$0xff] }
 0x4fd   :  { %v1622_v0 = vsel %vm1621_vm13, %v1613_v13, 0.0  ;;  %v3597_v12 = vsel %vm1621_vm13, %v1613_v13, %v3518_v8  ;;  %v2186_v13 = vld [vmem:[#allocation5 + $0x1c0] sm:$0xff] }
 0x4fe   :  { %1624 = vst [vmem:[#allocation8 + $0x20] sm:$0xff] %v1622_v0  ;;  %1763 = vmatmul.mubr.f32.vlgmr.msra.gmra.mxu0 %v3597_v12  ;;  %1834 = vmatmul.mubr.f32.vlgmr.msra.gmra.mxu1 %v3597_v12  ;;  %v2188_v0 = vld [vmem:[#allocation5 + $0x1d0] sm:$0xff] }
 0x4ff   :  { %1947 = vmatpush1.msra.mxu0 %v3242_v16  ;;  %2018 = vmatpush1.msra.mxu1 %v3244_v38  ;;  %v3956_v16 = vld [vmem:[#allocation17_spill] sm:$0xff]  ;;  %v3957_v38 = vld [vmem:[#allocation18_spill] sm:$0xff] }
 0x500   :  { %1948 = vmatprep.subr.mxu0 %v3248_v17  ;;  %2019 = vmatprep.subr.mxu1 %v3250_v18  ;;  %v3958_v17 = vld [vmem:[#allocation19_spill] sm:$0xff]  ;;  %v3959_v18 = vld [vmem:[#allocation20_spill] sm:$0xff] }
 0x501   :  { %1949 = vmatpush1.msra.mxu0 %v3254_v19  ;;  %2020 = vmatpush1.msra.mxu1 %v3256_v21  ;;  %v3960_v19 = vld [vmem:[#allocation21_spill] sm:$0xff]  ;;  %v3961_v21 = vld [vmem:[#allocation22_spill] sm:$0xff] }
 0x502   :  { %1950 = vmatprep.subr.mxu0 %v3260_v22  ;;  %2021 = vmatprep.subr.mxu1 %v3262_v23  ;;  %v3962_v22 = vld [vmem:[#allocation23_spill] sm:$0xff]  ;;  %v3963_v23 = vld [vmem:[#allocation24_spill] sm:$0xff] }
 0x503   :  { %1951 = vmatpush1.msra.mxu0 %v3266_v24  ;;  %2022 = vmatpush1.msra.mxu1 %v3268_v25  ;;  %v3964_v24 = vld [vmem:[#allocation25_spill] sm:$0xff]  ;;  %v3965_v25 = vld [vmem:[#allocation26_spill] sm:$0xff] }
 0x504   :  { %1952 = vmatprep.subr.mxu0 %v3272_v26  ;;  %2023 = vmatprep.subr.mxu1 %v3274_v27  ;;  %v3966_v26 = vld [vmem:[#allocation27_spill] sm:$0xff]  ;;  %v3967_v27 = vld [vmem:[#allocation28_spill] sm:$0xff] }
 0x505   :  { %1953 = vmatpush1.msra.mxu0 %v3278_v28  ;;  %2024 = vmatpush1.msra.mxu1 %v3280_v30  ;;  %v3968_v28 = vld [vmem:[#allocation29_spill] sm:$0xff]  ;;  %v3969_v30 = vld [vmem:[#allocation30_spill] sm:$0xff] }
 0x506   :  { %1954 = vmatprep.subr.mxu0 %v3284_v31  ;;  %2025 = vmatprep.subr.mxu1 %v3286_v32  ;;  %v3970_v31 = vld [vmem:[#allocation31_spill] sm:$0xff]  ;;  %v3971_v32 = vld [vmem:[#allocation33_spill] sm:$0xff] }
 0x507   :  { %1955 = vmatpush1.msra.mxu0 %v3290_v33  ;;  %2026 = vmatpush1.msra.mxu1 %v3292_v34  ;;  %v3972_v33 = vld [vmem:[#allocation34_spill] sm:$0xff]  ;;  %v3973_v34 = vld [vmem:[#allocation35_spill] sm:$0xff] }
 0x508   :  { %1956 = vmatprep.subr.mxu0 %v3296_v35  ;;  %2027 = vmatprep.subr.mxu1 %v3298_v37  ;;  %v3974_v35 = vld [vmem:[#allocation36_spill] sm:$0xff]  ;;  %v3975_v37 = vmov 0.0  }
 0x509   :  { %1957 = vmatpush1.msra.mxu0 %v3300_v39  ;;  %2028 = vmatpush1.msra.mxu1 %v3304_v40  ;;  %v3976_v39 = vld [vmem:[#allocation32_spill] sm:$0xff] }
 0x50a   :  { %1958 = vmatprep.subr.mxu0 %v3306_v41  ;;  %2029 = vmatprep.subr.mxu1 %v3308_v42  ;;  %v3977_v41 = vld [vmem:[#allocation53_spill] sm:$0xff] }
 0x50b   :  { %1959 = vmatpush1.msra.mxu0 %v3314_v43  ;;  %2030 = vmatpush1.msra.mxu1 %v3316_v44 }
 0x50c   :  { %1960 = vmatprep.subr.mxu0 %v3320_v45  ;;  %2031 = vmatprep.subr.mxu1 %v3322_v46  ;;  %v3978_v46 = vld [vmem:[#allocation55_spill] sm:$0xff] }
 0x50d   :  { %1961 = vmatpush1.msra.mxu0 %v3326_v48  ;;  %2032 = vmatpush1.msra.mxu1 %v3328_v49  ;;  %v3979_v49 = vld [vmem:[#allocation54_spill] sm:$0xff] }
 0x50e   :  { %1962 = vmatprep.subr.mxu0 %v3332_v50  ;;  %2033 = vmatprep.subr.mxu1 %v3334_v51 }
 0x50f   :  { %1963 = vmatpush1.msra.mxu0 %v3338_v52  ;;  %2034 = vmatpush1.msra.mxu1 %v3340_v53  ;;  %v3980_v53 = vld [vmem:[#allocation56_spill] sm:$0xff] }
 0x510   :  { %1964 = vmatprep.subr.mxu0 %v3344_v54  ;;  %2035 = vmatprep.subr.mxu1 %v3346_v55 }
 0x511   :  { %1965 = vmatpush1.msra.mxu0 %v3350_v57  ;;  %2036 = vmatpush1.msra.mxu1 %v3352_v58 }
 0x512   :  { %1966 = vmatprep.subr.mxu0 %v3356_v59  ;;  %2037 = vmatprep.subr.mxu1 %v3358_v10 }
 0x513   :  { %1967 = vmatpush1.msra.mxu0 %v3362_v47  ;;  %2038 = vmatpush1.msra.mxu1 %v3364_v5 }
 0x514   :  { %1968 = vmatprep.subr.mxu0 %v3956_v16  ;;  %2039 = vmatprep.subr.mxu1 %v3957_v38  ;;  %v2185_v16 = vld [vmem:[#allocation5 + $0x1b8] sm:$0xff]  ;;  %v2182_v38 = vld [vmem:[#allocation5 + $0x1a0] sm:$0xff] }
 0x515   :  { %1969 = vmatpush1.msra.mxu0 %v3958_v17  ;;  %2040 = vmatpush1.msra.mxu1 %v3959_v18  ;;  %v2184_v17 = vld [vmem:[#allocation5 + $0x1b0] sm:$0xff]  ;;  %v2179_v18 = vld [vmem:[#allocation5 + $0x188] sm:$0xff] }
 0x516   :  { %1970 = vmatprep.subr.mxu0 %v3960_v19  ;;  %2041 = vmatprep.subr.mxu1 %v3961_v21  ;;  %v2181_v19 = vld [vmem:[#allocation5 + $0x198] sm:$0xff]  ;;  %v2178_v21 = vld [vmem:[#allocation5 + $0x180] sm:$0xff] }
 0x517   :  { %1971 = vmatpush1.msra.mxu0 %v3962_v22  ;;  %2042 = vmatpush1.msra.mxu1 %v3963_v23  ;;  %v2180_v22 = vld [vmem:[#allocation5 + $0x190] sm:$0xff]  ;;  %v2175_v23 = vld [vmem:[#allocation5 + $0x168] sm:$0xff] }
 0x518   :  { %1972 = vmatprep.subr.mxu0 %v3964_v24  ;;  %2043 = vmatprep.subr.mxu1 %v3965_v25  ;;  %v2177_v24 = vld [vmem:[#allocation5 + $0x178] sm:$0xff]  ;;  %v2174_v25 = vld [vmem:[#allocation5 + $0x160] sm:$0xff] }
 0x519   :  { %1973 = vmatpush1.msra.mxu0 %v3966_v26  ;;  %2044 = vmatpush1.msra.mxu1 %v3967_v27  ;;  %v2176_v26 = vld [vmem:[#allocation5 + $0x170] sm:$0xff]  ;;  %v2171_v27 = vld [vmem:[#allocation5 + $0x148] sm:$0xff] }
 0x51a   :  { %1974 = vmatprep.subr.mxu0 %v3968_v28  ;;  %2045 = vmatprep.subr.mxu1 %v3969_v30  ;;  %v2173_v28 = vld [vmem:[#allocation5 + $0x158] sm:$0xff]  ;;  %v2170_v30 = vld [vmem:[#allocation5 + $0x140] sm:$0xff] }
 0x51b   :  { %1975 = vmatpush1.msra.mxu0 %v3970_v31  ;;  %2046 = vmatpush1.msra.mxu1 %v3971_v32  ;;  %v2172_v31 = vld [vmem:[#allocation5 + $0x150] sm:$0xff]  ;;  %v2167_v32 = vld [vmem:[#allocation5 + $0x128] sm:$0xff] }
 0x51c   :  { %1976 = vmatprep.subr.mxu0 %v3972_v33  ;;  %2047 = vmatprep.subr.mxu1 %v3973_v34  ;;  %v2169_v33 = vld [vmem:[#allocation5 + $0x138] sm:$0xff]  ;;  %v2166_v34 = vld [vmem:[#allocation5 + $0x120] sm:$0xff] }
 0x51d   :  { %1977 = vmatpush1.msra.mxu0 %v3974_v35  ;;  %2010 = vmatprep.mubr.f32.mxu0 %v3975_v37  ;;  %v2168_v35 = vld [vmem:[#allocation5 + $0x130] sm:$0xff] }
 0x51e   :  { %2048 = vmatpush1.msra.mxu1 %v3976_v39  ;;  %2081 = vmatprep.mubr.f32.mxu1 %v3975_v37  ;;  %v2165_v39 = vld [vmem:[#allocation5 + $0x118] sm:$0xff] }
 0x51f   :  { %2194 = vmatprep.subr.mxu0 %v2191_v60  ;;  %v2130_v60 = vld [vmem:[#allocation5] sm:$0xff] }
 0x5be   :  { %v1764_v40 = vpop.f32.mrf.mxu0  ;;  %v1835_v43 = vpop.f32.mrf.mxu1 }
 0x5bf   :  { %v1840_v42 = vadd.f32 %v1764_v40, %v3977_v41  ;;  %v1842_v50 = vadd.f32 %v1835_v43, %v3979_v49  ;;  %v2162_v40 = vld [vmem:[#allocation5 + $0x100] sm:$0xff]  ;;  %v2164_v41 = vld [vmem:[#allocation5 + $0x110] sm:$0xff]  ;;  %v2161_v43 = vld [vmem:[#allocation5 + $0xf8] sm:$0xff] }
 0x5c0   :  { %v1766_v44 = vpop.f32.mrf.mxu0  ;;  %v1837_v52 = vpop.f32.mrf.mxu1  ;;  %v2154_v49 = vld [vmem:[#allocation5 + $0xc0] sm:$0xff] }
 0x5c1   :  { %v1844_v45 = vmul.f32 0.5, %v1840_v42  ;;  %v1841_v48 = vadd.f32 %v1766_v44, %v3978_v46  ;;  %v1843_v54 = vadd.f32 %v1837_v52, %v3980_v53  ;;  %v2159_v42 = vld [vmem:[#allocation5 + $0xe8] sm:$0xff]  ;;  %v2158_v44 = vld [vmem:[#allocation5 + $0xe0] sm:$0xff]  ;;  %v2153_v52 = vld [vmem:[#allocation5 + $0xb8] sm:$0xff] }
 0x5c2   :  { %v2155_v46 = vld [vmem:[#allocation5 + $0xc8] sm:$0xff]  ;;  %v2150_v53 = vld [vmem:[#allocation5 + $0xa0] sm:$0xff] }
 0x5c3   :  { %2508 = vtanh.f32 %v1844_v45  ;;  %v1848_v51 = vmul.f32 0.5, %v1841_v48  ;;  %v1853_v55 = vmul.f32 0.5, %v1843_v54  ;;  %v2160_v45 = vld [vmem:[#allocation5 + $0xf0] sm:$0xff]  ;;  %v2157_v48 = vld [vmem:[#allocation5 + $0xd8] sm:$0xff] }
 0x5c4   :  { %v2152_v54 = vld [vmem:[#allocation5 + $0xb0] sm:$0xff] }
 0x5c5   :  { %2510 = vtanh.f32 %v1848_v51  ;;  %v2151_v51 = vld [vmem:[#allocation5 + $0xa8] sm:$0xff] }
 0x5c6   :  { %2512 = vtanh.f32 %v1842_v50  ;;  %v2156_v50 = vld [vmem:[#allocation5 + $0xd0] sm:$0xff] }
 0x5c7   :  { %2514 = vtanh.f32 %v1853_v55  ;;  %v2147_v55 = vld [vmem:[#allocation5 + $0x88] sm:$0xff] }
 0x5d0   :  { %v2509_v57 = vpop.eup %2508 }
 0x5d1   :  { %v1846_v58 = vmul.f32 0.5, %v2509_v57  ;;  %v2149_v57 = vld [vmem:[#allocation5 + $0x98] sm:$0xff] }
 0x5d2   :  { %v2511_v59 = vpop.eup %2510 }
 0x5d3   :  { %v1847_v10 = vadd.f32 0.5, %v1846_v58  ;;  %v1850_v47 = vmul.f32 0.5, %v2511_v59  ;;  %v2513_v5 = vpop.eup %2512  ;;  %v2146_v58 = vld [vmem:[#allocation5 + $0x80] sm:$0xff]  ;;  %v2148_v59 = vld [vmem:[#allocation5 + $0x90] sm:$0xff] }
 0x5d4   :  { %v2515_v20 = vpop.eup %2514 }
 0x5d5   :  { %v1851_v4 = vadd.f32 0.5, %v1850_v47  ;;  %v1858_v8 = vmul.f32 %v2513_v5, %v1847_v10  ;;  %v1855_v7 = vmul.f32 0.5, %v2515_v20  ;;  %v2143_v10 = vld [vmem:[#allocation5 + $0x68] sm:$0xff]  ;;  %v2145_v47 = vld [vmem:[#allocation5 + $0x78] sm:$0xff]  ;;  %v2142_v5 = vld [vmem:[#allocation5 + $0x60] sm:$0xff] }
 0x5d6   :  { %v2135_v20 = vld [vmem:[#allocation5 + $0x28] sm:$0xff] }
 0x5d7   :  { %v1857_v62 = vmul.f32 %v1851_v4, %v3594_v9  ;;  %v1856_v63 = vadd.f32 0.5, %v1855_v7  ;;  %v2144_v4 = vld [vmem:[#allocation5 + $0x70] sm:$0xff]  ;;  %v2137_v7 = vld [vmem:[#allocation5 + $0x38] sm:$0xff] }
 0x5d9   :  { %v1859_v3 = vadd.f32 %v1858_v8, %v1857_v62  ;;  %v2139_v8 = vld [vmem:[#allocation5 + $0x48] sm:$0xff]  ;;  %v2141_v62 = vld [vmem:[#allocation5 + $0x58] sm:$0xff] }
 0x5db   :  { %2516 = vtanh.f32 %v1859_v3  ;;  %v3671_v6 = vsel %vm1869_vm14, %v1859_v3, %v3594_v9  ;;  %v2193_v9 = vld [vmem:[#allocation5 + $0x1f8] sm:$0xff]  ;;  %v2140_v3 = vld [vmem:[#allocation5 + $0x50] sm:$0xff] }
 0x5dc   :  { %2265 = vmatprep.subr.mxu1 %v2193_v9  ;;  %v2132_v9 = vld [vmem:[#allocation5 + $0x10] sm:$0xff] }
 0x5e8   :  { %v2517_v61 = vpop.eup %2516 }
 0x5e9   :  { %v1861_v2 = vmul.f32 %v2517_v61, %v1856_v63  ;;  %v2134_v63 = vld [vmem:[#allocation5 + $0x20] sm:$0xff]  ;;  %v2136_v61 = vld [vmem:[#allocation5 + $0x30] sm:$0xff] }
 0x5eb   :  { %v1870_v15 = vsel %vm1869_vm14, %v1861_v2, 0.0  ;;  %v3674_v36 = vsel %vm1869_vm14, %v1861_v2, %v3597_v12  ;;  %v2183_v12 = vld [vmem:[#allocation5 + $0x1a8] sm:$0xff] }
 0x5ec   :  { %1872 = vst [vmem:[#allocation8 + $0x28] sm:$0xff] %v1870_v15  ;;  %2011 = vmatmul.mubr.f32.vlgmr.msra.gmra.mxu0 %v3674_v36  ;;  %2082 = vmatmul.mubr.f32.vlgmr.msra.gmra.mxu1 %v3674_v36  ;;  %v2131_v2 = vld [vmem:[#allocation5 + $0x8] sm:$0xff]  ;;  %v2133_v15 = vld [vmem:[#allocation5 + $0x18] sm:$0xff] }
 0x5ed   :  { %2258 = vmatprep.mubr.f32.mxu0 %v3975_v37  ;;  %2329 = vmatprep.mubr.f32.mxu1 %v3975_v37  ;;  %v2163_v37 = vld [vmem:[#allocation5 + $0x108] sm:$0xff] }
 0x5ee   :  { %2195 = vmatpush1.msra.mxu0 %v2190_v56  ;;  %2266 = vmatpush1.msra.mxu1 %v2192_v1  ;;  %v3981_v1 = vld [vmem:[#allocation57_spill] sm:$0xff] }
 0x5ef   :  { %2196 = vmatprep.subr.mxu0 %v2187_v29  ;;  %2267 = vmatprep.subr.mxu1 %v2189_v14 }
 0x5f0   :  { %2197 = vmatpush1.msra.mxu0 %v2186_v13  ;;  %2268 = vmatpush1.msra.mxu1 %v2188_v0 }
 0x5f1   :  { %2198 = vmatprep.subr.mxu0 %v2183_v12  ;;  %2269 = vmatprep.subr.mxu1 %v2185_v16  ;;  %v3982_v12 = vld [vmem:[#allocation59_spill] sm:$0xff] }
 0x5f2   :  { %2199 = vmatpush1.msra.mxu0 %v2182_v38  ;;  %2270 = vmatpush1.msra.mxu1 %v2184_v17  ;;  %v3983_v38 = vld [vmem:[#allocation58_spill] sm:$0xff] }
 0x5f3   :  { %2200 = vmatprep.subr.mxu0 %v2179_v18  ;;  %2271 = vmatprep.subr.mxu1 %v2181_v19 }
 0x5f4   :  { %2201 = vmatpush1.msra.mxu0 %v2178_v21  ;;  %2272 = vmatpush1.msra.mxu1 %v2180_v22  ;;  %v3984_v21 = vld [vmem:[#allocation60_spill] sm:$0xff] }
 0x5f5   :  { %2202 = vmatprep.subr.mxu0 %v2175_v23  ;;  %2273 = vmatprep.subr.mxu1 %v2177_v24 }
 0x5f6   :  { %2203 = vmatpush1.msra.mxu0 %v2174_v25  ;;  %2274 = vmatpush1.msra.mxu1 %v2176_v26 }
 0x5f7   :  { %2204 = vmatprep.subr.mxu0 %v2171_v27  ;;  %2275 = vmatprep.subr.mxu1 %v2173_v28 }
 0x5f8   :  { %2205 = vmatpush1.msra.mxu0 %v2170_v30  ;;  %2276 = vmatpush1.msra.mxu1 %v2172_v31 }
 0x5f9   :  { %2206 = vmatprep.subr.mxu0 %v2167_v32  ;;  %2277 = vmatprep.subr.mxu1 %v2169_v33  ;;  %v2116_v33 = vpop.permute.xlu0 %2115 }
 0x5fa   :  { %2207 = vmatpush1.msra.mxu0 %v2166_v34  ;;  %2278 = vmatpush1.msra.mxu1 %v2168_v35  ;;  %vm2117_vm15 = vcmp.eq.s32.totalorder %v2116_v33, 1 }
 0x5fb   :  { %2208 = vmatprep.subr.mxu0 %v2163_v37  ;;  %2279 = vmatprep.subr.mxu1 %v2165_v39 }
 0x5fc   :  { %2209 = vmatpush1.msra.mxu0 %v2162_v40  ;;  %2280 = vmatpush1.msra.mxu1 %v2164_v41 }
 0x5fd   :  { %2210 = vmatprep.subr.mxu0 %v2159_v42  ;;  %2281 = vmatprep.subr.mxu1 %v2161_v43 }
 0x5fe   :  { %2211 = vmatpush1.msra.mxu0 %v2158_v44  ;;  %2282 = vmatpush1.msra.mxu1 %v2160_v45 }
 0x5ff   :  { %2212 = vmatprep.subr.mxu0 %v2155_v46  ;;  %2283 = vmatprep.subr.mxu1 %v2157_v48  ;;  %v3985_v48 = vld [vmem:[#allocation61_spill] sm:$0xff] }
 0x600   :  { %2213 = vmatpush1.msra.mxu0 %v2154_v49  ;;  %2284 = vmatpush1.msra.mxu1 %v2156_v50 }
 0x601   :  { %2214 = vmatprep.subr.mxu0 %v2151_v51  ;;  %2285 = vmatprep.subr.mxu1 %v2153_v52 }
 0x602   :  { %2215 = vmatpush1.msra.mxu0 %v2150_v53  ;;  %2286 = vmatpush1.msra.mxu1 %v2152_v54  ;;  %v3986_v53 = vld [vmem:[#allocation63_spill] sm:$0xff] }
 0x603   :  { %2216 = vmatprep.subr.mxu0 %v2147_v55  ;;  %2287 = vmatprep.subr.mxu1 %v2149_v57 }
 0x604   :  { %2217 = vmatpush1.msra.mxu0 %v2146_v58  ;;  %2288 = vmatpush1.msra.mxu1 %v2148_v59  ;;  %v3988_v59 = vld [vmem:[#allocation64_spill] sm:$0xff] }
 0x605   :  { %2218 = vmatprep.subr.mxu0 %v2143_v10  ;;  %2289 = vmatprep.subr.mxu1 %v2145_v47 }
 0x606   :  { %2219 = vmatpush1.msra.mxu0 %v2142_v5  ;;  %2290 = vmatpush1.msra.mxu1 %v2144_v4 }
 0x607   :  { %2220 = vmatprep.subr.mxu0 %v2139_v8  ;;  %2291 = vmatprep.subr.mxu1 %v2141_v62 }
 0x608   :  { %2221 = vmatpush1.msra.mxu0 %v2138_v11  ;;  %2292 = vmatpush1.msra.mxu1 %v2140_v3 }
 0x609   :  { %2222 = vmatprep.subr.mxu0 %v2135_v20  ;;  %2293 = vmatprep.subr.mxu1 %v2137_v7  ;;  %v2364_v7 = vpop.permute.xlu1 %2363 }
 0x60a   :  { %2223 = vmatpush1.msra.mxu0 %v2134_v63  ;;  %2294 = vmatpush1.msra.mxu1 %v2136_v61  ;;  %vm2365_vm0 = vcmp.eq.s32.totalorder %v2364_v7, 1 }
 0x60b   :  { %2224 = vmatprep.subr.mxu0 %v2131_v2  ;;  %2295 = vmatprep.subr.mxu1 %v2133_v15 }
 0x60c   :  { %2225 = vmatpush1.msra.mxu0 %v2130_v60  ;;  %2296 = vmatpush1.msra.mxu1 %v2132_v9 }
 0x6ac   :  { %v2012_v56 = vpop.f32.mrf.mxu0  ;;  %v2083_v14 = vpop.f32.mrf.mxu1 }
 0x6ad   :  { %v2088_v29 = vadd.f32 %v2012_v56, %v3981_v1  ;;  %v2090_v17 = vadd.f32 %v2083_v14, %v3983_v38 }
 0x6ae   :  { %v2014_v13 = vpop.f32.mrf.mxu0  ;;  %v2085_v19 = vpop.f32.mrf.mxu1 }
 0x6af   :  { %v2092_v0 = vmul.f32 0.5, %v2088_v29  ;;  %v2089_v16 = vadd.f32 %v2014_v13, %v3982_v12  ;;  %v2091_v22 = vadd.f32 %v2085_v19, %v3984_v21 }
 0x6b1   :  { %2518 = vtanh.f32 %v2092_v0  ;;  %v2096_v18 = vmul.f32 0.5, %v2089_v16  ;;  %v2101_v23 = vmul.f32 0.5, %v2091_v22 }
 0x6b3   :  { %2520 = vtanh.f32 %v2096_v18 }
 0x6b4   :  { %2522 = vtanh.f32 %v2090_v17 }
 0x6b5   :  { %2524 = vtanh.f32 %v2101_v23 }
 0x6be   :  { %v2519_v24 = vpop.eup %2518 }
 0x6bf   :  { %v2094_v25 = vmul.f32 0.5, %v2519_v24 }
 0x6c0   :  { %v2521_v26 = vpop.eup %2520 }
 0x6c1   :  { %v2095_v27 = vadd.f32 0.5, %v2094_v25  ;;  %v2098_v28 = vmul.f32 0.5, %v2521_v26  ;;  %v2523_v30 = vpop.eup %2522 }
 0x6c2   :  { %v2525_v39 = vpop.eup %2524 }
 0x6c3   :  { %v2099_v31 = vadd.f32 0.5, %v2098_v28  ;;  %v2106_v32 = vmul.f32 %v2523_v30, %v2095_v27  ;;  %v2103_v40 = vmul.f32 0.5, %v2525_v39 }
 0x6c5   :  { %v2105_v34 = vmul.f32 %v2099_v31, %v3671_v6  ;;  %v2104_v41 = vadd.f32 0.5, %v2103_v40 }
 0x6c7   :  { %v2107_v35 = vadd.f32 %v2106_v32, %v2105_v34 }
 0x6c9   :  { %2526 = vtanh.f32 %v2107_v35  ;;  %v2122_v37 = vsel %vm2117_vm15, %v2107_v35, %v3671_v6  ;;  %v3987_v6 = vld [vmem:[#allocation62_spill] sm:$0xff] }
 0x6d6   :  { %v2527_v42 = vpop.eup %2526 }
 0x6d7   :  { %v2109_v43 = vmul.f32 %v2527_v42, %v2104_v41 }
 0x6d9   :  { %v2118_v44 = vsel %vm2117_vm15, %v2109_v43, 0.0  ;;  %v2121_v45 = vsel %vm2117_vm15, %v2109_v43, %v3674_v36 }
 0x6da   :  { %2120 = vst [vmem:[#allocation8 + $0x30] sm:$0xff] %v2118_v44  ;;  %2259 = vmatmul.mubr.f32.vlgmr.msra.gmra.mxu0 %v2121_v45  ;;  %2330 = vmatmul.mubr.f32.vlgmr.msra.gmra.mxu1 %v2121_v45 }
 0x79a   :  { %v2260_v46 = vpop.f32.mrf.mxu0  ;;  %v2331_v50 = vpop.f32.mrf.mxu1 }
 0x79b   :  { %v2336_v49 = vadd.f32 %v2260_v46, %v3985_v48  ;;  %v2338_v55 = vadd.f32 %v2331_v50, %v3987_v6 }
 0x79c   :  { %v2262_v51 = vpop.f32.mrf.mxu0  ;;  %v2333_v58 = vpop.f32.mrf.mxu1 }
 0x79d   :  { %v2340_v52 = vmul.f32 0.5, %v2336_v49  ;;  %v2337_v54 = vadd.f32 %v2262_v51, %v3986_v53  ;;  %v2339_v36 = vadd.f32 %v2333_v58, %v3988_v59 }
 0x79f   :  { %2528 = vtanh.f32 %v2340_v52  ;;  %v2344_v57 = vmul.f32 0.5, %v2337_v54  ;;  %v2349_v10 = vmul.f32 0.5, %v2339_v36 }
 0x7a1   :  { %2530 = vtanh.f32 %v2344_v57 }
 0x7a2   :  { %2532 = vtanh.f32 %v2338_v55 }
 0x7a3   :  { %2534 = vtanh.f32 %v2349_v10 }
 0x7ac   :  { %v2529_v47 = vpop.eup %2528 }
 0x7ad   :  { %v2342_v5 = vmul.f32 0.5, %v2529_v47 }
 0x7ae   :  { %v2531_v4 = vpop.eup %2530 }
 0x7af   :  { %v2343_v8 = vadd.f32 0.5, %v2342_v5  ;;  %v2346_v62 = vmul.f32 0.5, %v2531_v4  ;;  %v2533_v11 = vpop.eup %2532 }
 0x7b0   :  { %v2535_v15 = vpop.eup %2534 }
 0x7b1   :  { %v2347_v3 = vadd.f32 0.5, %v2346_v62  ;;  %v2354_v20 = vmul.f32 %v2533_v11, %v2343_v8  ;;  %v2351_v60 = vmul.f32 0.5, %v2535_v15 }
 0x7b3   :  { %v2353_v63 = vmul.f32 %v2347_v3, %v2122_v37  ;;  %v2352_v9 = vadd.f32 0.5, %v2351_v60 }
 0x7b5   :  { %v2355_v61 = vadd.f32 %v2354_v20, %v2353_v63 }
 0x7b7   :  { %2536 = vtanh.f32 %v2355_v61  ;;  %v2370_v2 = vsel %vm2365_vm0, %v2355_v61, %v2122_v37 }
 0x7b8   :  { %2372 = vst [vmem:[#allocation11] sm:$0xff] %v2370_v2 }
 0x7c4   :  { %v2537_v56 = vpop.eup %2536 }
 0x7c5   :  { %v2357_v1 = vmul.f32 %v2537_v56, %v2352_v9 }
 0x7c7   :  { %v2366_v29 = vsel %vm2365_vm0, %v2357_v1, 0.0  ;;  %v2369_v14 = vsel %vm2365_vm0, %v2357_v1, %v2121_v45 }
 0x7c8   :  { %2368 = vst [vmem:[#allocation8 + $0x38] sm:$0xff] %v2366_v29  ;;  %2371 = vst [vmem:[#allocation9] sm:$0xff] %v2369_v14 }
 0x7c9 PF:  { %s2631_s4 = smov [#allocation9]   ;;  %s2632_s24 = smov [#allocation8]  }
 0x7ca   :  { %s2391_s23 = sshll.u32 %s2631_s4, 4  ;;  %s2378_s25 = sshll.u32 %s2632_s24, 4  ;;  %s2392_s23 = int_to_ptr.vmem [resolvable:$true] %s2391_s23  ;;  %s2379_s25 = int_to_ptr.vmem [resolvable:$true] %s2378_s25 }
 0x7cb   :  { %s2558_s26 = scalar_lea.vmem %s2392_s23, 128  ;;  %p2563_p8 = scmp.lt.s32.totalorder %s2392_s23, %s2392_s23 }
 0x7cc   :  { %p2559_p7 = scmp.ne.s32.totalorder %s2392_s23, %s2558_s26  ;;  %p2564_p9 = scmp.lt.s32.totalorder %s2558_s26, %s2558_s26 }
 0x7ce   :  { %p2565_p10 = por %p2564_p9, %p2563_p8 }
 0x7d0   :  { %p2566_p11 = pnand %p2565_p10, %p2559_p7 }
 0x7d2   :  { %2569 = shalt.err (!%p2566_p11)
}
 0x7d3   :  { %2394 = dma.vmem_to_hbm [thread:$0]  %s2392_s23, 128, %s3707_s7, [#allocation10]  }
 0x7d4   :  { %s2578_s29 = scalar_lea.vmem %s2379_s25, 1024  ;;  %p2583_p13 = scmp.lt.s32.totalorder %s2379_s25, %s2379_s25 }
 0x7d5   :  { %p2579_p12 = scmp.ne.s32.totalorder %s2379_s25, %s2578_s29  ;;  %p2584_p0 = scmp.lt.s32.totalorder %s2578_s29, %s2578_s29 }
 0x7d7   :  { %p2585_p1 = por %p2584_p0, %p2583_p13 }
 0x7d9   :  { %p2586_p2 = pnand %p2585_p1, %p2579_p12 }
 0x7db   :  { %2589 = shalt.err (!%p2586_p2)
}
 0x7dc   :  { %s2633_s30 = smov 128   ;;  %s2634_s9 = smov 8  }
 0x7dd   :  { %2384 = dma.vmem_to_hbm [thread:$0]  %s2379_s25, 1024, %s3706_s6, [#allocation7], %s2633_s30, %s2633_s30, %s2634_s9  }
 0x7de   :  { %s2635_s11 = smov [#allocation11]  }
 0x7df   :  { %s2401_s12 = sshll.u32 %s2635_s11, 4  ;;  %s2402_s12 = int_to_ptr.vmem [resolvable:$true] %s2401_s12 }
 0x7e0   :  { %s2598_s13 = scalar_lea.vmem %s2402_s12, 128  ;;  %p2603_p4 = scmp.lt.s32.totalorder %s2402_s12, %s2402_s12 }
 0x7e1   :  { %p2599_p3 = scmp.ne.s32.totalorder %s2402_s12, %s2598_s13  ;;  %p2604_p5 = scmp.lt.s32.totalorder %s2598_s13, %s2598_s13 }
 0x7e3   :  { %p2605_p6 = por %p2604_p5, %p2603_p4 }
 0x7e5   :  { %p2606_p7 = pnand %p2605_p6, %p2599_p3 }
 0x7e7   :  { %2609 = shalt.err (!%p2606_p7)
}
 0x7e8   :  { %2404 = dma.vmem_to_hbm [thread:$0]  %s2402_s12, 128, %s3708_s8, [#allocation10]  }
 0x7e9   :  { %2620 = dma.done.wait [#allocation7], 1024  }
 0x7ea   :  { %2621 = vsyncadd [#allocation7], 4294966272 }
 0x7eb   :  { %2622 = dma.done.wait [#allocation10], 256  }
 0x7ec   :  { %2623 = vsyncadd [#allocation10], 4294967040 }
 0x7ed   :  { %2414 = vsyncpa [#allocation6], 1 }
 0x7ee   :  { %2415 = vsyncpa [#allocation7], 1 }
 0x7ef   :  { %2416 = vsyncpa [#allocation10], 1 }

</bundles_post_ra>
